<compile_context>
chip_gen: v7x
topology: tpu7x:2x2x1
jax: 0.10.0
libtpu: 0.0.40
codegen_flags: <defaults>
</compile_context>

<pallas_src>
import functools

import jax
import jax.numpy as jnp
from jax.experimental import pallas as pl
from jax.experimental.pallas import tpu as pltpu


# ---------------------------------------------------------------------------
# Deterministic KNRM kernel mu / sigma construction (standard KNRM scheme).
# ---------------------------------------------------------------------------
def kernel_mu(n_kernels):
    l_mu = [1.0]
    if n_kernels == 1:
        return l_mu
    bin_size = 2.0 / (n_kernels - 1)
    l_mu.append(1.0 - bin_size / 2.0)
    for i in range(1, n_kernels - 1):
        l_mu.append(l_mu[i] - bin_size)
    return l_mu


def kernel_sigma(n_kernels):
    l_sigma = [0.001]
    if n_kernels == 1:
        return l_sigma
    l_sigma += [0.1] * (n_kernels - 1)
    return l_sigma


def _round_up(x, m):
    return ((x + m - 1) // m) * m


# ---------------------------------------------------------------------------
# Generation-aware VMEM budget / batch-tile sizing.
# ---------------------------------------------------------------------------
def _vmem_limit_bytes():
    try:
        phys = pltpu.get_tpu_info().vmem_capacity_bytes
    except Exception:
        phys = 64 * 1024 * 1024          # assume the smallest (v7x) if unknown
    return max(32 * 1024 * 1024, min(int(phys * 3 // 4), 112 * 1024 * 1024))


def _block_bytes(bt, lq_p, ld_p, e):
    e_pad = _round_up(e, 128)            # minor dim < 128 pads to a lane tile
    q_blk = bt * lq_p * e_pad * 4
    d_blk = bt * ld_p * e_pad * 4
    qm_blk = bt * lq_p * 128 * 4
    dm_blk = bt * 8 * ld_p * 4
    out_blk = bt * 128 * 4
    # x2: every input/output block is double-buffered by the pipeline.
    return 2 * (q_blk + d_blk + qm_blk + dm_blk + out_blk)


def _pick_bt(batch, lq_p, ld_p, e, budget):
    b_cap = _round_up(batch, 8)
    best = 8
    for cand in range(8, min(128, b_cap) + 1, 8):
        if b_cap % cand:
            continue                     # avoid extra batch padding
        if b_cap >= 16 and b_cap // cand < 2:
            continue                     # keep grid >= 2 for v7x's 2 TCs
        temps = 4 * cand * min(lq_p, 8) * ld_p * 4   # match/delta/kp chunk
        if _block_bytes(cand, lq_p, ld_p, e) + temps <= budget:
            best = cand
    return best


# ---------------------------------------------------------------------------
# Pallas kernel: Bt batch examples per grid step.
# ---------------------------------------------------------------------------
def knrm_kernel(q_ref, d_ref, qm_ref, dm_ref,
                mu_ref, nis_ref, w_ref, b_ref,
                o_ref, *, n_kernels, out_lanes, lq_chunk):
    q = q_ref[...]            # (Bt, Lq, E)  f32, rows pre-L2-normalized
    d = d_ref[...]            # (Bt, Ld, E)  f32, rows pre-L2-normalized
    qm = qm_ref[...]          # (Bt, Lq, 1)
    dm = dm_ref[...]          # (Bt, 1, Ld)
    bt, lq, _ = q.shape

    score = jnp.zeros((bt, 1), jnp.float32) + b_ref[0]          # dense bias

    for c0 in range(0, lq, lq_chunk):                           # static chunks
        q_c = q[:, c0:c0 + lq_chunk, :]                         # (Bt, c, E)
        qm_c = qm[:, c0:c0 + lq_chunk, :]                       # (Bt, c, 1)

        # Cosine match chunk on the MXU (contract over E), accumulate in f32.
        raw = jnp.einsum('bqe,bke->bqk', q_c, d,
                         preferred_element_type=jnp.float32)    # (Bt, c, Ld)

        # Bake the doc mask in once: finite sentinel so delta^2 * nis stays
        # finite and exp underflows to exactly 0 for masked/padded columns.
        match = jnp.where(dm > 0.0, raw, -1e4)

        # Gaussian kernel pooling; w_k fused into one per-row accumulator,
        # `* q_mask * 0.01` applied once after the K loop.
        acc = jnp.zeros((bt, lq_chunk, 1), jnp.float32)
        for k in range(n_kernels):                              # static small K
            delta = match - mu_ref[k]
            kp = jnp.exp(delta * delta * nis_ref[k])            # nis=-1/(2s^2)
            row_sum = jnp.sum(kp, axis=2, keepdims=True)        # (Bt, c, 1)
            acc = acc + w_ref[k] * jnp.log(jnp.maximum(row_sum, 1e-10))

        score = score + 0.01 * jnp.sum(acc * qm_c, axis=1)      # (Bt, 1)

    sig = jax.nn.sigmoid(score)                                 # (Bt, 1)
    # Lane-dense store: replicate the score across all 128 lanes (unmasked vst).
    o_ref[...] = jnp.broadcast_to(sig, (bt, out_lanes))


# ---------------------------------------------------------------------------
# Wrapper: padding + table normalization + embedding gather + pallas_call.
# ---------------------------------------------------------------------------
def knrm_forward(query, doc, q_mask, d_mask,
                 embed_w, dense_w, dense_b, mus, sigmas, *, bt=None):
    B, Lq = query.shape
    _, Ld = doc.shape
    E = embed_w.shape[1]
    K = mus.shape[0]

    # TPU-friendly padding: Lq -> x8 (sublanes), Ld -> x128 (lanes).
    Lq_p = _round_up(Lq, 8)
    Ld_p = _round_up(Ld, 128)

    vmem_limit = _vmem_limit_bytes()
    if bt is None:
        bt = _pick_bt(B, Lq_p, Ld_p, E, budget=int(vmem_limit * 0.8))
    assert bt % 8 == 0, "bt must be a multiple of 8 (output sublane tile)"
    B_p = _round_up(B, bt)

    pad_b, pad_q, pad_d = B_p - B, Lq_p - Lq, Ld_p - Ld
    query_p = jnp.pad(query, ((0, pad_b), (0, pad_q)))           # pad id 0
    doc_p = jnp.pad(doc, ((0, pad_b), (0, pad_d)))               # pad id 0
    qm_p = jnp.pad(q_mask.astype(jnp.float32), ((0, pad_b), (0, pad_q)))
    dm_p = jnp.pad(d_mask.astype(jnp.float32), ((0, pad_b), (0, pad_d)))

    # Pre-normalize the table once; per-vocab-row op, identical to
    # F.normalize(p=2, dim=2, eps=1e-12) applied after the gather.
    row_norm = jnp.sqrt(jnp.sum(embed_w * embed_w, axis=1, keepdims=True))
    embed_n = embed_w / jnp.maximum(row_norm, 1e-12)

    # TODO(synk): replace with an in-kernel DMA row-gather to avoid the HBM
    #             round-trip of the gathered embeddings.
    q_emb = jnp.take(embed_n, query_p, axis=0)                   # (B_p, Lq_p, E)
    d_emb = jnp.take(embed_n, doc_p, axis=0)                     # (B_p, Ld_p, E)
    qm = qm_p.reshape(B_p, Lq_p, 1)
    dm = dm_p.reshape(B_p, 1, Ld_p)

    # Host-side precompute: -1/(2*sigma^2) — removes per-element divisions.
    neg_half_inv_sig2 = -1.0 / (2.0 * sigmas * sigmas)

    # Keep the match chunk (+ exp temporaries) vreg-resident across the K loop.
    lq_chunk = Lq_p if bt * Lq_p * Ld_p * 4 <= 256 * 1024 else 8

    OUT_LANES = 128
    grid = (B_p // bt,)

    cost = pl.CostEstimate(
        flops=int(2 * B_p * Lq_p * Ld_p * E + 5 * K * B_p * Lq_p * Ld_p),
        transcendentals=int(K * B_p * Lq_p * Ld_p + K * B_p * Lq_p + B_p),
        bytes_accessed=int(4 * (B_p * Lq_p * E + B_p * Ld_p * E
                                + B_p * Lq_p + B_p * Ld_p + B_p * OUT_LANES)),
    )

    out = pl.pallas_call(
        functools.partial(knrm_kernel, n_kernels=K, out_lanes=OUT_LANES,
                          lq_chunk=lq_chunk),
        out_shape=jax.ShapeDtypeStruct((B_p, OUT_LANES), jnp.float32),
        grid_spec=pltpu.PrefetchScalarGridSpec(
            num_scalar_prefetch=0,
            grid=grid,
            in_specs=[
                pl.BlockSpec((bt, Lq_p, E), lambda b: (b, 0, 0)),
                pl.BlockSpec((bt, Ld_p, E), lambda b: (b, 0, 0)),
                pl.BlockSpec((bt, Lq_p, 1), lambda b: (b, 0, 0)),
                pl.BlockSpec((bt, 1, Ld_p), lambda b: (b, 0, 0)),
                pl.BlockSpec(memory_space=pltpu.MemorySpace.SMEM),  # mus
                pl.BlockSpec(memory_space=pltpu.MemorySpace.SMEM),  # -1/(2s^2)
                pl.BlockSpec(memory_space=pltpu.MemorySpace.SMEM),  # dense w
                pl.BlockSpec(memory_space=pltpu.MemorySpace.SMEM),  # dense b
            ],
            out_specs=pl.BlockSpec((bt, OUT_LANES), lambda b: (b, 0)),
        ),
        compiler_params=pltpu.CompilerParams(
            dimension_semantics=("parallel",),
            vmem_limit_bytes=vmem_limit),
        cost_estimate=cost,
    )(q_emb, d_emb, qm, dm, mus, neg_half_inv_sig2,
      dense_w.reshape(-1), dense_b)

    return out[:B, 0]


# ---------------------------------------------------------------------------
# Pure-JAX reference (mirrors the PyTorch forward) for correctness check.
# ---------------------------------------------------------------------------
def knrm_reference(query, doc, q_mask, d_mask,
                   embed_w, dense_w, dense_b, mus, sigmas):
    q_emb = embed_w[query]                                      # (B, Lq, E)
    d_emb = embed_w[doc]                                        # (B, Ld, E)
    q_n = q_emb / jnp.maximum(
        jnp.linalg.norm(q_emb, axis=2, keepdims=True), 1e-12)
    d_n = d_emb / jnp.maximum(
        jnp.linalg.norm(d_emb, axis=2, keepdims=True), 1e-12)
    match = jnp.einsum('bqe,bde->bqd', q_n, d_n)[..., None]     # (B,Lq,Ld,1)
    mus4 = mus.reshape(1, 1, 1, -1)
    sig4 = sigmas.reshape(1, 1, 1, -1)
    kp = jnp.exp(-(match - mus4) ** 2 / (2.0 * sig4 ** 2))      # (B,Lq,Ld,K)
    kp = kp * d_mask.astype(jnp.float32)[:, None, :, None]
    row_sum = jnp.sum(kp, axis=2)                               # (B,Lq,K)
    log_pool = jnp.log(jnp.clip(row_sum, 1e-10)) \
        * q_mask.astype(jnp.float32)[:, :, None] * 0.01
    pooled = jnp.sum(log_pool, axis=1)                          # (B,K)
    logits = pooled @ dense_w.T + dense_b                       # (B,1)
    return jax.nn.sigmoid(logits).squeeze(1)


if __name__ == "__main__":
    B, Lq, Ld, E, K, VOCAB = 2, 8, 16, 32, 11, 64

    key = jax.random.PRNGKey(0)
    k_emb, k_q, k_d, k_w, k_b = jax.random.split(key, 5)

    # Deterministic "word2vec" embedding table; row 0 is the padding vector.
    embed_w = (jax.random.normal(k_emb, (VOCAB, E), jnp.float32) * 0.1
               ).at[0].set(0.0)

    # Dense(K -> 1) parameters.
    dense_w = jax.random.normal(k_w, (1, K), jnp.float32) * 0.1
    dense_b = jax.random.normal(k_b, (1,), jnp.float32) * 0.1

    mus = jnp.asarray(kernel_mu(K), jnp.float32)
    sigmas = jnp.asarray(kernel_sigma(K), jnp.float32)

    # Token ids (0 = padding); masks derived from padding.
    query = jax.random.randint(k_q, (B, Lq), 0, VOCAB, jnp.int32)
    doc = jax.random.randint(k_d, (B, Ld), 0, VOCAB, jnp.int32)
    q_mask = (query != 0).astype(jnp.float32)
    d_mask = (doc != 0).astype(jnp.float32)

    out = knrm_forward(query, doc, q_mask, d_mask,
                       embed_w, dense_w, dense_b, mus, sigmas)
    out = jax.block_until_ready(out)

    ref = knrm_reference(query, doc, q_mask, d_mask,
                         embed_w, dense_w, dense_b, mus, sigmas)
    assert out.shape == (B,)
    assert jnp.allclose(out, ref, atol=2e-4, rtol=2e-4), (out, ref)

    print("KERNEL_OK")
</pallas_src>

<mosaic_0001>
module attributes {stable_mosaic.version = 11 : i64} {
  func.func @knrm_kernel(%arg0: i32, %arg1: memref<8x8x32xf32, #tpu.memory_space<vmem>>, %arg2: memref<8x128x32xf32, #tpu.memory_space<vmem>>, %arg3: memref<8x8x1xf32, #tpu.memory_space<vmem>>, %arg4: memref<8x1x128xf32, #tpu.memory_space<vmem>>, %arg5: memref<11xf32, #tpu.memory_space<smem>>, %arg6: memref<11xf32, #tpu.memory_space<smem>>, %arg7: memref<11xf32, #tpu.memory_space<smem>>, %arg8: memref<1xf32, #tpu.memory_space<smem>>, %arg9: memref<8x128xf32, #tpu.memory_space<vmem>>) attributes {dimension_semantics = [#tpu.dimension_semantics<parallel>], iteration_bounds = array<i64: 1>, scalar_prefetch = 0 : i64, scratch_operands = 0 : i64, tpu.core_type = #tpu.core_type<tc>, window_params = [{transform_indices = @transform_0, window_bounds = array<i64: 8, 8, 32>}, {transform_indices = @transform_1, window_bounds = array<i64: 8, 128, 32>}, {transform_indices = @transform_2, window_bounds = array<i64: 8, 8, 1>}, {transform_indices = @transform_3, window_bounds = array<i64: 8, 1, 128>}, {transform_indices = @transform_4, window_bounds = array<i64: 11>}, {transform_indices = @transform_5, window_bounds = array<i64: 11>}, {transform_indices = @transform_6, window_bounds = array<i64: 11>}, {transform_indices = @transform_7, window_bounds = array<i64: 1>}, {transform_indices = @transform_8, window_bounds = array<i64: 8, 128>}]} {
    %c0 = arith.constant 0 : index
    %c0_0 = arith.constant 0 : index
    %c0_1 = arith.constant 0 : index
    %0 = vector.load %arg1[%c0, %c0_0, %c0_1] : memref<8x8x32xf32, #tpu.memory_space<vmem>>, vector<8x8x32xf32>
    %c0_2 = arith.constant 0 : index
    %c0_3 = arith.constant 0 : index
    %c0_4 = arith.constant 0 : index
    %1 = vector.load %arg2[%c0_2, %c0_3, %c0_4] : memref<8x128x32xf32, #tpu.memory_space<vmem>>, vector<8x128x32xf32>
    %c0_5 = arith.constant 0 : index
    %c0_6 = arith.constant 0 : index
    %c0_7 = arith.constant 0 : index
    %2 = vector.load %arg3[%c0_5, %c0_6, %c0_7] : memref<8x8x1xf32, #tpu.memory_space<vmem>>, vector<8x8x1xf32>
    %c0_8 = arith.constant 0 : index
    %c0_9 = arith.constant 0 : index
    %c0_10 = arith.constant 0 : index
    %3 = vector.load %arg4[%c0_8, %c0_9, %c0_10] : memref<8x1x128xf32, #tpu.memory_space<vmem>>, vector<8x1x128xf32>
    %cst = arith.constant 0.000000e+00 : f32
    %4 = vector.broadcast %cst : f32 to vector<8x1xf32>
    %c0_11 = arith.constant 0 : index
    %5 = memref.load %arg8[%c0_11] : memref<1xf32, #tpu.memory_space<smem>>
    %6 = vector.broadcast %5 : f32 to vector<8x1xf32>
    %7 = arith.addf %4, %6 : vector<8x1xf32>
    "tpu.trace_start"() <{level = 10 : i32, message = "bqe,bke->bqk"}> : () -> ()
    %cst_12 = arith.constant dense<0.000000e+00> : vector<8x8x128xf32>
    %8 = tpu.matmul %0, %1, %cst_12 {dimension_numbers = #tpu.dot_dimension_numbers<[2], [2], [1], [1], [0, 0, 0, 1, 1, 1], [0], [0]>} : vector<8x8x32xf32>, vector<8x128x32xf32>, vector<8x8x128xf32> -> vector<8x8x128xf32>
    %cst_13 = arith.constant 0.000000e+00 : f32
    "tpu.trace_stop"() : () -> ()
    %9 = vector.broadcast %cst_13 : f32 to vector<8x1x128xf32>
    %10 = arith.cmpf ogt, %3, %9 : vector<8x1x128xf32>
    %cst_14 = arith.constant -1.000000e+04 : f32
    %11 = vector.shape_cast %10 : vector<8x1x128xi1> to vector<8x1x128xi1>
    %12 = vector.broadcast %11 : vector<8x1x128xi1> to vector<8x8x128xi1>
    %13 = vector.broadcast %cst_14 : f32 to vector<8x8x128xf32>
    %14 = arith.select %12, %8, %13 : vector<8x8x128xi1>, vector<8x8x128xf32>
    %cst_15 = arith.constant 0.000000e+00 : f32
    %15 = vector.broadcast %cst_15 : f32 to vector<8x8x1xf32>
    %c0_16 = arith.constant 0 : index
    %16 = memref.load %arg5[%c0_16] : memref<11xf32, #tpu.memory_space<smem>>
    %17 = vector.broadcast %16 : f32 to vector<8x8x128xf32>
    %18 = arith.subf %14, %17 : vector<8x8x128xf32>
    %19 = arith.mulf %18, %18 : vector<8x8x128xf32>
    %c0_17 = arith.constant 0 : index
    %20 = memref.load %arg6[%c0_17] : memref<11xf32, #tpu.memory_space<smem>>
    %21 = vector.broadcast %20 : f32 to vector<8x8x128xf32>
    %22 = arith.mulf %19, %21 : vector<8x8x128xf32>
    %23 = math.exp %22 : vector<8x8x128xf32>
    %cst_18 = arith.constant dense<0.000000e+00> : vector<8x8xf32>
    %24 = vector.multi_reduction <add>, %23, %cst_18 [2] : vector<8x8x128xf32> to vector<8x8xf32>
    %25 = vector.shape_cast %24 : vector<8x8xf32> to vector<8x8x1xf32>
    %c0_19 = arith.constant 0 : index
    %26 = memref.load %arg7[%c0_19] : memref<11xf32, #tpu.memory_space<smem>>
    %cst_20 = arith.constant 1.000000e-10 : f32
    %27 = vector.broadcast %cst_20 : f32 to vector<8x8x1xf32>
    %28 = arith.maximumf %25, %27 : vector<8x8x1xf32>
    %29 = math.log %28 : vector<8x8x1xf32>
    %30 = vector.broadcast %26 : f32 to vector<8x8x1xf32>
    %31 = arith.mulf %30, %29 : vector<8x8x1xf32>
    %32 = arith.addf %15, %31 : vector<8x8x1xf32>
    %c1 = arith.constant 1 : index
    %33 = memref.load %arg5[%c1] : memref<11xf32, #tpu.memory_space<smem>>
    %34 = vector.broadcast %33 : f32 to vector<8x8x128xf32>
    %35 = arith.subf %14, %34 : vector<8x8x128xf32>
    %36 = arith.mulf %35, %35 : vector<8x8x128xf32>
    %c1_21 = arith.constant 1 : index
    %37 = memref.load %arg6[%c1_21] : memref<11xf32, #tpu.memory_space<smem>>
    %38 = vector.broadcast %37 : f32 to vector<8x8x128xf32>
    %39 = arith.mulf %36, %38 : vector<8x8x128xf32>
    %40 = math.exp %39 : vector<8x8x128xf32>
    %cst_22 = arith.constant dense<0.000000e+00> : vector<8x8xf32>
    %41 = vector.multi_reduction <add>, %40, %cst_22 [2] : vector<8x8x128xf32> to vector<8x8xf32>
    %42 = vector.shape_cast %41 : vector<8x8xf32> to vector<8x8x1xf32>
    %c1_23 = arith.constant 1 : index
    %43 = memref.load %arg7[%c1_23] : memref<11xf32, #tpu.memory_space<smem>>
    %cst_24 = arith.constant 1.000000e-10 : f32
    %44 = vector.broadcast %cst_24 : f32 to vector<8x8x1xf32>
    %45 = arith.maximumf %42, %44 : vector<8x8x1xf32>
    %46 = math.log %45 : vector<8x8x1xf32>
    %47 = vector.broadcast %43 : f32 to vector<8x8x1xf32>
    %48 = arith.mulf %47, %46 : vector<8x8x1xf32>
    %49 = arith.addf %32, %48 : vector<8x8x1xf32>
    %c2 = arith.constant 2 : index
    %50 = memref.load %arg5[%c2] : memref<11xf32, #tpu.memory_space<smem>>
    %51 = vector.broadcast %50 : f32 to vector<8x8x128xf32>
    %52 = arith.subf %14, %51 : vector<8x8x128xf32>
    %53 = arith.mulf %52, %52 : vector<8x8x128xf32>
    %c2_25 = arith.constant 2 : index
    %54 = memref.load %arg6[%c2_25] : memref<11xf32, #tpu.memory_space<smem>>
    %55 = vector.broadcast %54 : f32 to vector<8x8x128xf32>
    %56 = arith.mulf %53, %55 : vector<8x8x128xf32>
    %57 = math.exp %56 : vector<8x8x128xf32>
    %cst_26 = arith.constant dense<0.000000e+00> : vector<8x8xf32>
    %58 = vector.multi_reduction <add>, %57, %cst_26 [2] : vector<8x8x128xf32> to vector<8x8xf32>
    %59 = vector.shape_cast %58 : vector<8x8xf32> to vector<8x8x1xf32>
    %c2_27 = arith.constant 2 : index
    %60 = memref.load %arg7[%c2_27] : memref<11xf32, #tpu.memory_space<smem>>
    %cst_28 = arith.constant 1.000000e-10 : f32
    %61 = vector.broadcast %cst_28 : f32 to vector<8x8x1xf32>
    %62 = arith.maximumf %59, %61 : vector<8x8x1xf32>
    %63 = math.log %62 : vector<8x8x1xf32>
    %64 = vector.broadcast %60 : f32 to vector<8x8x1xf32>
    %65 = arith.mulf %64, %63 : vector<8x8x1xf32>
    %66 = arith.addf %49, %65 : vector<8x8x1xf32>
    %c3 = arith.constant 3 : index
    %67 = memref.load %arg5[%c3] : memref<11xf32, #tpu.memory_space<smem>>
    %68 = vector.broadcast %67 : f32 to vector<8x8x128xf32>
    %69 = arith.subf %14, %68 : vector<8x8x128xf32>
    %70 = arith.mulf %69, %69 : vector<8x8x128xf32>
    %c3_29 = arith.constant 3 : index
    %71 = memref.load %arg6[%c3_29] : memref<11xf32, #tpu.memory_space<smem>>
    %72 = vector.broadcast %71 : f32 to vector<8x8x128xf32>
    %73 = arith.mulf %70, %72 : vector<8x8x128xf32>
    %74 = math.exp %73 : vector<8x8x128xf32>
    %cst_30 = arith.constant dense<0.000000e+00> : vector<8x8xf32>
    %75 = vector.multi_reduction <add>, %74, %cst_30 [2] : vector<8x8x128xf32> to vector<8x8xf32>
    %76 = vector.shape_cast %75 : vector<8x8xf32> to vector<8x8x1xf32>
    %c3_31 = arith.constant 3 : index
    %77 = memref.load %arg7[%c3_31] : memref<11xf32, #tpu.memory_space<smem>>
    %cst_32 = arith.constant 1.000000e-10 : f32
    %78 = vector.broadcast %cst_32 : f32 to vector<8x8x1xf32>
    %79 = arith.maximumf %76, %78 : vector<8x8x1xf32>
    %80 = math.log %79 : vector<8x8x1xf32>
    %81 = vector.broadcast %77 : f32 to vector<8x8x1xf32>
    %82 = arith.mulf %81, %80 : vector<8x8x1xf32>
    %83 = arith.addf %66, %82 : vector<8x8x1xf32>
    %c4 = arith.constant 4 : index
    %84 = memref.load %arg5[%c4] : memref<11xf32, #tpu.memory_space<smem>>
    %85 = vector.broadcast %84 : f32 to vector<8x8x128xf32>
    %86 = arith.subf %14, %85 : vector<8x8x128xf32>
    %87 = arith.mulf %86, %86 : vector<8x8x128xf32>
    %c4_33 = arith.constant 4 : index
    %88 = memref.load %arg6[%c4_33] : memref<11xf32, #tpu.memory_space<smem>>
    %89 = vector.broadcast %88 : f32 to vector<8x8x128xf32>
    %90 = arith.mulf %87, %89 : vector<8x8x128xf32>
    %91 = math.exp %90 : vector<8x8x128xf32>
    %cst_34 = arith.constant dense<0.000000e+00> : vector<8x8xf32>
    %92 = vector.multi_reduction <add>, %91, %cst_34 [2] : vector<8x8x128xf32> to vector<8x8xf32>
    %93 = vector.shape_cast %92 : vector<8x8xf32> to vector<8x8x1xf32>
    %c4_35 = arith.constant 4 : index
    %94 = memref.load %arg7[%c4_35] : memref<11xf32, #tpu.memory_space<smem>>
    %cst_36 = arith.constant 1.000000e-10 : f32
    %95 = vector.broadcast %cst_36 : f32 to vector<8x8x1xf32>
    %96 = arith.maximumf %93, %95 : vector<8x8x1xf32>
    %97 = math.log %96 : vector<8x8x1xf32>
    %98 = vector.broadcast %94 : f32 to vector<8x8x1xf32>
    %99 = arith.mulf %98, %97 : vector<8x8x1xf32>
    %100 = arith.addf %83, %99 : vector<8x8x1xf32>
    %c5 = arith.constant 5 : index
    %101 = memref.load %arg5[%c5] : memref<11xf32, #tpu.memory_space<smem>>
    %102 = vector.broadcast %101 : f32 to vector<8x8x128xf32>
    %103 = arith.subf %14, %102 : vector<8x8x128xf32>
    %104 = arith.mulf %103, %103 : vector<8x8x128xf32>
    %c5_37 = arith.constant 5 : index
    %105 = memref.load %arg6[%c5_37] : memref<11xf32, #tpu.memory_space<smem>>
    %106 = vector.broadcast %105 : f32 to vector<8x8x128xf32>
    %107 = arith.mulf %104, %106 : vector<8x8x128xf32>
    %108 = math.exp %107 : vector<8x8x128xf32>
    %cst_38 = arith.constant dense<0.000000e+00> : vector<8x8xf32>
    %109 = vector.multi_reduction <add>, %108, %cst_38 [2] : vector<8x8x128xf32> to vector<8x8xf32>
    %110 = vector.shape_cast %109 : vector<8x8xf32> to vector<8x8x1xf32>
    %c5_39 = arith.constant 5 : index
    %111 = memref.load %arg7[%c5_39] : memref<11xf32, #tpu.memory_space<smem>>
    %cst_40 = arith.constant 1.000000e-10 : f32
    %112 = vector.broadcast %cst_40 : f32 to vector<8x8x1xf32>
    %113 = arith.maximumf %110, %112 : vector<8x8x1xf32>
    %114 = math.log %113 : vector<8x8x1xf32>
    %115 = vector.broadcast %111 : f32 to vector<8x8x1xf32>
    %116 = arith.mulf %115, %114 : vector<8x8x1xf32>
    %117 = arith.addf %100, %116 : vector<8x8x1xf32>
    %c6 = arith.constant 6 : index
    %118 = memref.load %arg5[%c6] : memref<11xf32, #tpu.memory_space<smem>>
    %119 = vector.broadcast %118 : f32 to vector<8x8x128xf32>
    %120 = arith.subf %14, %119 : vector<8x8x128xf32>
    %121 = arith.mulf %120, %120 : vector<8x8x128xf32>
    %c6_41 = arith.constant 6 : index
    %122 = memref.load %arg6[%c6_41] : memref<11xf32, #tpu.memory_space<smem>>
    %123 = vector.broadcast %122 : f32 to vector<8x8x128xf32>
    %124 = arith.mulf %121, %123 : vector<8x8x128xf32>
    %125 = math.exp %124 : vector<8x8x128xf32>
    %cst_42 = arith.constant dense<0.000000e+00> : vector<8x8xf32>
    %126 = vector.multi_reduction <add>, %125, %cst_42 [2] : vector<8x8x128xf32> to vector<8x8xf32>
    %127 = vector.shape_cast %126 : vector<8x8xf32> to vector<8x8x1xf32>
    %c6_43 = arith.constant 6 : index
    %128 = memref.load %arg7[%c6_43] : memref<11xf32, #tpu.memory_space<smem>>
    %cst_44 = arith.constant 1.000000e-10 : f32
    %129 = vector.broadcast %cst_44 : f32 to vector<8x8x1xf32>
    %130 = arith.maximumf %127, %129 : vector<8x8x1xf32>
    %131 = math.log %130 : vector<8x8x1xf32>
    %132 = vector.broadcast %128 : f32 to vector<8x8x1xf32>
    %133 = arith.mulf %132, %131 : vector<8x8x1xf32>
    %134 = arith.addf %117, %133 : vector<8x8x1xf32>
    %c7 = arith.constant 7 : index
    %135 = memref.load %arg5[%c7] : memref<11xf32, #tpu.memory_space<smem>>
    %136 = vector.broadcast %135 : f32 to vector<8x8x128xf32>
    %137 = arith.subf %14, %136 : vector<8x8x128xf32>
    %138 = arith.mulf %137, %137 : vector<8x8x128xf32>
    %c7_45 = arith.constant 7 : index
    %139 = memref.load %arg6[%c7_45] : memref<11xf32, #tpu.memory_space<smem>>
    %140 = vector.broadcast %139 : f32 to vector<8x8x128xf32>
    %141 = arith.mulf %138, %140 : vector<8x8x128xf32>
    %142 = math.exp %141 : vector<8x8x128xf32>
    %cst_46 = arith.constant dense<0.000000e+00> : vector<8x8xf32>
    %143 = vector.multi_reduction <add>, %142, %cst_46 [2] : vector<8x8x128xf32> to vector<8x8xf32>
    %144 = vector.shape_cast %143 : vector<8x8xf32> to vector<8x8x1xf32>
    %c7_47 = arith.constant 7 : index
    %145 = memref.load %arg7[%c7_47] : memref<11xf32, #tpu.memory_space<smem>>
    %cst_48 = arith.constant 1.000000e-10 : f32
    %146 = vector.broadcast %cst_48 : f32 to vector<8x8x1xf32>
    %147 = arith.maximumf %144, %146 : vector<8x8x1xf32>
    %148 = math.log %147 : vector<8x8x1xf32>
    %149 = vector.broadcast %145 : f32 to vector<8x8x1xf32>
    %150 = arith.mulf %149, %148 : vector<8x8x1xf32>
    %151 = arith.addf %134, %150 : vector<8x8x1xf32>
    %c8 = arith.constant 8 : index
    %152 = memref.load %arg5[%c8] : memref<11xf32, #tpu.memory_space<smem>>
    %153 = vector.broadcast %152 : f32 to vector<8x8x128xf32>
    %154 = arith.subf %14, %153 : vector<8x8x128xf32>
    %155 = arith.mulf %154, %154 : vector<8x8x128xf32>
    %c8_49 = arith.constant 8 : index
    %156 = memref.load %arg6[%c8_49] : memref<11xf32, #tpu.memory_space<smem>>
    %157 = vector.broadcast %156 : f32 to vector<8x8x128xf32>
    %158 = arith.mulf %155, %157 : vector<8x8x128xf32>
    %159 = math.exp %158 : vector<8x8x128xf32>
    %cst_50 = arith.constant dense<0.000000e+00> : vector<8x8xf32>
    %160 = vector.multi_reduction <add>, %159, %cst_50 [2] : vector<8x8x128xf32> to vector<8x8xf32>
    %161 = vector.shape_cast %160 : vector<8x8xf32> to vector<8x8x1xf32>
    %c8_51 = arith.constant 8 : index
    %162 = memref.load %arg7[%c8_51] : memref<11xf32, #tpu.memory_space<smem>>
    %cst_52 = arith.constant 1.000000e-10 : f32
    %163 = vector.broadcast %cst_52 : f32 to vector<8x8x1xf32>
    %164 = arith.maximumf %161, %163 : vector<8x8x1xf32>
    %165 = math.log %164 : vector<8x8x1xf32>
    %166 = vector.broadcast %162 : f32 to vector<8x8x1xf32>
    %167 = arith.mulf %166, %165 : vector<8x8x1xf32>
    %168 = arith.addf %151, %167 : vector<8x8x1xf32>
    %c9 = arith.constant 9 : index
    %169 = memref.load %arg5[%c9] : memref<11xf32, #tpu.memory_space<smem>>
    %170 = vector.broadcast %169 : f32 to vector<8x8x128xf32>
    %171 = arith.subf %14, %170 : vector<8x8x128xf32>
    %172 = arith.mulf %171, %171 : vector<8x8x128xf32>
    %c9_53 = arith.constant 9 : index
    %173 = memref.load %arg6[%c9_53] : memref<11xf32, #tpu.memory_space<smem>>
    %174 = vector.broadcast %173 : f32 to vector<8x8x128xf32>
    %175 = arith.mulf %172, %174 : vector<8x8x128xf32>
    %176 = math.exp %175 : vector<8x8x128xf32>
    %cst_54 = arith.constant dense<0.000000e+00> : vector<8x8xf32>
    %177 = vector.multi_reduction <add>, %176, %cst_54 [2] : vector<8x8x128xf32> to vector<8x8xf32>
    %178 = vector.shape_cast %177 : vector<8x8xf32> to vector<8x8x1xf32>
    %c9_55 = arith.constant 9 : index
    %179 = memref.load %arg7[%c9_55] : memref<11xf32, #tpu.memory_space<smem>>
    %cst_56 = arith.constant 1.000000e-10 : f32
    %180 = vector.broadcast %cst_56 : f32 to vector<8x8x1xf32>
    %181 = arith.maximumf %178, %180 : vector<8x8x1xf32>
    %182 = math.log %181 : vector<8x8x1xf32>
    %183 = vector.broadcast %179 : f32 to vector<8x8x1xf32>
    %184 = arith.mulf %183, %182 : vector<8x8x1xf32>
    %185 = arith.addf %168, %184 : vector<8x8x1xf32>
    %c10 = arith.constant 10 : index
    %186 = memref.load %arg5[%c10] : memref<11xf32, #tpu.memory_space<smem>>
    %187 = vector.broadcast %186 : f32 to vector<8x8x128xf32>
    %188 = arith.subf %14, %187 : vector<8x8x128xf32>
    %189 = arith.mulf %188, %188 : vector<8x8x128xf32>
    %c10_57 = arith.constant 10 : index
    %190 = memref.load %arg6[%c10_57] : memref<11xf32, #tpu.memory_space<smem>>
    %191 = vector.broadcast %190 : f32 to vector<8x8x128xf32>
    %192 = arith.mulf %189, %191 : vector<8x8x128xf32>
    %193 = math.exp %192 : vector<8x8x128xf32>
    %cst_58 = arith.constant dense<0.000000e+00> : vector<8x8xf32>
    %194 = vector.multi_reduction <add>, %193, %cst_58 [2] : vector<8x8x128xf32> to vector<8x8xf32>
    %195 = vector.shape_cast %194 : vector<8x8xf32> to vector<8x8x1xf32>
    %c10_59 = arith.constant 10 : index
    %196 = memref.load %arg7[%c10_59] : memref<11xf32, #tpu.memory_space<smem>>
    %cst_60 = arith.constant 1.000000e-10 : f32
    %197 = vector.broadcast %cst_60 : f32 to vector<8x8x1xf32>
    %198 = arith.maximumf %195, %197 : vector<8x8x1xf32>
    %199 = math.log %198 : vector<8x8x1xf32>
    %200 = vector.broadcast %196 : f32 to vector<8x8x1xf32>
    %201 = arith.mulf %200, %199 : vector<8x8x1xf32>
    %202 = arith.addf %185, %201 : vector<8x8x1xf32>
    %203 = arith.mulf %202, %2 : vector<8x8x1xf32>
    %cst_61 = arith.constant dense<0.000000e+00> : vector<8x1xf32>
    %204 = vector.multi_reduction <add>, %203, %cst_61 [1] : vector<8x8x1xf32> to vector<8x1xf32>
    %cst_62 = arith.constant 0.00999999977 : f32
    %205 = vector.broadcast %cst_62 : f32 to vector<8x1xf32>
    %206 = arith.mulf %205, %204 : vector<8x1xf32>
    %207 = arith.addf %7, %206 : vector<8x1xf32>
    %208 = arith.negf %207 : vector<8x1xf32>
    %209 = math.exp %208 : vector<8x1xf32>
    %cst_63 = arith.constant 1.000000e+00 : f32
    %210 = vector.broadcast %cst_63 : f32 to vector<8x1xf32>
    %211 = arith.addf %210, %209 : vector<8x1xf32>
    %212 = arith.divf %210, %211 : vector<8x1xf32>
    %213 = vector.shape_cast %212 : vector<8x1xf32> to vector<8x1xf32>
    %214 = vector.broadcast %213 : vector<8x1xf32> to vector<8x128xf32>
    %c0_64 = arith.constant 0 : index
    %c0_65 = arith.constant 0 : index
    %215 = vector.load %arg9[%c0_64, %c0_65] : memref<8x128xf32, #tpu.memory_space<vmem>>, vector<8x128xf32>
    tpu.vector_store %arg9[%c0_64, %c0_65], %214 {strides = array<i32>} : memref<8x128xf32, #tpu.memory_space<vmem>>, vector<8x128xf32>,
    return
  }
  func.func @transform_0(%arg0: i32) -> (i32, i32, i32) {
    %c0_i32 = arith.constant 0 : i32
    %c0_i32_0 = arith.constant 0 : i32
    %c0_i32_1 = arith.constant 0 : i32
    return %arg0, %c0_i32, %c0_i32_0 : i32, i32, i32
  }
  func.func @transform_1(%arg0: i32) -> (i32, i32, i32) {
    %c0_i32 = arith.constant 0 : i32
    %c0_i32_0 = arith.constant 0 : i32
    %c0_i32_1 = arith.constant 0 : i32
    return %arg0, %c0_i32, %c0_i32_0 : i32, i32, i32
  }
  func.func @transform_2(%arg0: i32) -> (i32, i32, i32) {
    %c0_i32 = arith.constant 0 : i32
    %c0_i32_0 = arith.constant 0 : i32
    %c0_i32_1 = arith.constant 0 : i32
    return %arg0, %c0_i32, %c0_i32_0 : i32, i32, i32
  }
  func.func @transform_3(%arg0: i32) -> (i32, i32, i32) {
    %c0_i32 = arith.constant 0 : i32
    %c0_i32_0 = arith.constant 0 : i32
    %c0_i32_1 = arith.constant 0 : i32
    return %arg0, %c0_i32, %c0_i32_0 : i32, i32, i32
  }
  func.func @transform_4(%arg0: i32) -> i32 {
    %c0_i32 = arith.constant 0 : i32
    %c0_i32_0 = arith.constant 0 : i32
    return %c0_i32 : i32
  }
  func.func @transform_5(%arg0: i32) -> i32 {
    %c0_i32 = arith.constant 0 : i32
    %c0_i32_0 = arith.constant 0 : i32
    return %c0_i32 : i32
  }
  func.func @transform_6(%arg0: i32) -> i32 {
    %c0_i32 = arith.constant 0 : i32
    %c0_i32_0 = arith.constant 0 : i32
    return %c0_i32 : i32
  }
  func.func @transform_7(%arg0: i32) -> i32 {
    %c0_i32 = arith.constant 0 : i32
    %c0_i32_0 = arith.constant 0 : i32
    return %c0_i32 : i32
  }
  func.func @transform_8(%arg0: i32) -> (i32, i32) {
    %c0_i32 = arith.constant 0 : i32
    %c0_i32_0 = arith.constant 0 : i32
    return %arg0, %c0_i32 : i32, i32
  }
}

</mosaic_0001>

<bundles_post_ra>
// kernel: tpu_custom_call.1
= control target key start
LH: loop header
LB: loop body
LE: loop exit
PB: predicated region body
PF: predicated region fallthrough
CT: control target
= control target key end

     0   :  { %14 = vsyncpa [#allocation5], 0  ;;  %s5178_s0 = inlined_call_operand.vmem [shape: f32[8,8,32], index: 0, kind: input, shape index: {}]   ;;  %s5179_s1 = inlined_call_operand.vmem [shape: f32[8,128,32], index: 1, kind: input, shape index: {}]   ;;  %s5180_s2 = inlined_call_operand.vmem [shape: f32[8,8,1], index: 2, kind: input, shape index: {}]   ;;  %s5181_s3 = inlined_call_operand.vmem [shape: f32[8,1,128], index: 3, kind: input, shape index: {}]   ;;  %s5182_s4 = inlined_call_operand.vmem [shape: f32[11], index: 4, kind: input, shape index: {}]   ;;  %s5183_s5 = inlined_call_operand.vmem [shape: f32[11], index: 5, kind: input, shape index: {}]   ;;  %s5184_s6 = inlined_call_operand.vmem [shape: f32[11], index: 6, kind: input, shape index: {}]   ;;  %s5185_s7 = inlined_call_operand.<no memory space> [shape: f32[1], index: 7, kind: input, shape index: {}]   ;;  %s5186_s8 = inlined_call_operand.hbm [shape: f32[8,128], index: 8, kind: output, shape index: {}]  }
   0x1   :  { %15 = vsyncpa [#allocation7], 0  ;;  %s41_s29 = sshll.u32 %s5183_s5, 4  ;;  %s42_s29 = int_to_ptr.vmem [resolvable:$true] %s41_s29 }
   0x2   :  { %16 = vsyncpa [#allocation4], 0  ;;  %s31_s10 = sshll.u32 %s5182_s4, 4  ;;  %s3810_s11 = scalar_lea.vmem %s42_s29, 16  ;;  %s32_s10 = int_to_ptr.vmem [resolvable:$true] %s31_s10 }
   0x3   :  { %p3811_p0 = scmp.ne.s32.totalorder %s42_s29, %s3810_s11  ;;  %p3815_p1 = scmp.lt.s32.totalorder %s42_s29, %s42_s29 }
   0x4   :  { %p3816_p2 = scmp.lt.s32.totalorder %s3810_s11, %s3810_s11 }
   0x6   :  { %p3817_p3 = por %p3816_p2, %p3815_p1 }
   0x8   :  { %p3818_p4 = pnand %p3817_p3, %p3811_p0 }
   0xa   :  { %3821 = shalt.err (!%p3818_p4)
}
   0xb   :  { %s3874_s12 = smov [#allocation6]   ;;  %s3822_s13 = scalar_lea.vmem %s32_s10, 16 }
   0xc   :  { %44 = dma.vmem_to_smem %s42_s29, 16, %s3874_s12, [#allocation7]  }
   0xd   :  { %p3823_p5 = scmp.ne.s32.totalorder %s32_s10, %s3822_s13  ;;  %p3827_p6 = scmp.lt.s32.totalorder %s32_s10, %s32_s10 }
   0xe   :  { %p3828_p7 = scmp.lt.s32.totalorder %s3822_s13, %s3822_s13 }
  0x10   :  { %p3829_p8 = por %p3828_p7, %p3827_p6 }
  0x12   :  { %p3830_p9 = pnand %p3829_p8, %p3823_p5 }
  0x14   :  { %3833 = shalt.err (!%p3830_p9)
}
  0x15   :  { %s3875_s5 = smov [#allocation3]   ;;  %s51_s15 = sshll.u32 %s5184_s6, 4  ;;  %s52_s15 = int_to_ptr.vmem [resolvable:$true] %s51_s15 }
  0x16   :  { %34 = dma.vmem_to_smem %s32_s10, 16, %s3875_s5, [#allocation5]  }
  0x17   :  { %s3834_s16 = scalar_lea.vmem %s52_s15, 16  ;;  %p3839_p11 = scmp.lt.s32.totalorder %s52_s15, %s52_s15 }
  0x18   :  { %p3835_p10 = scmp.ne.s32.totalorder %s52_s15, %s3834_s16  ;;  %p3840_p12 = scmp.lt.s32.totalorder %s3834_s16, %s3834_s16 }
  0x1a   :  { %p3841_p13 = por %p3840_p12, %p3839_p11 }
  0x1c   :  { %p3842_p0 = pnand %p3841_p13, %p3835_p10 }
  0x1e   :  { %3845 = shalt.err (!%p3842_p0)
}
  0x1f   :  { %s3876_s17 = smov [#allocation8]  }
  0x20   :  { %54 = dma.vmem_to_smem %s52_s15, 16, %s3876_s17, [#allocation7]  }
  0x21   :  { %3868 = dma.done.wait [#allocation5], 16  }
  0x22   :  { %3869 = vsyncadd [#allocation5], 4294967280 }
  0x23   :  { %3870 = dma.done.wait [#allocation7], 32  }
  0x24   :  { %3871 = vsyncadd [#allocation7], 4294967264 }
  0x25   :  { %66 = sfence }
  0x26   :  { %v75_v0 = vld [vmem:[%s5179_s1] sm:$0xff]  ;;  %v76_v1 = vld [vmem:[%s5179_s1 + $0x8] sm:$0xff]  ;;  %vm222_vm0 = vcmask 261120   ;;  %v3877_v3 = vmov 0.0|0.0   ;;  %vm3878_vm2 = vmmov 0   ;;  %v3879_v8 = vmov 0.0  }
  0x27   :  { %v91_v2 = vld [vmem:[%s5179_s1 + $0x80] sm:$0xff]  ;;  %3160 = vmatprep.subr.bf16.mxu0 %v3877_v3  ;;  %v3161_v4 = vpack.c.bf16 %v76_v1, %v75_v0  ;;  %vm3948_vm1 = vmpackc.low %vm222_vm0, %vm222_vm0  ;;  %3192 = vmatprep.subr.bf16.mxu1 %v3877_v3  ;;  %v92_v6 = vld [vmem:[%s5179_s1 + $0x88] sm:$0xff]  ;;  %s1255_s18 = sld [smem:[#allocation3]]  ;;  %s2709_s19 = sld [smem:[#allocation3 + $0x2]] }
  0x28   :  { %v3193_v7 = vpack.c.bf16 %v92_v6, %v91_v2  ;;  %2912 = vmatprep.mubr.msk.f32.mxu0 %vm3878_vm2, %v3879_v8  ;;  %2947 = vmatprep.mubr.msk.f32.mxu1 %vm3878_vm2, %v3879_v8  ;;  %v77_v9 = vld [vmem:[%s5179_s1 + $0x10] sm:$0xff]  ;;  %v78_v10 = vld [vmem:[%s5179_s1 + $0x18] sm:$0xff]  ;;  %v79_v15 = vld [vmem:[%s5179_s1 + $0x20] sm:$0xff]  ;;  %s2707_s6 = sld [smem:[#allocation6 + $0x1]]  ;;  %s1273_s20 = sld [smem:[#allocation6]] }
  0x29   :  { %3163 = vmatpush3.bf16.xpose.msk.msra.mxu0 %vm3948_vm1, %v3161_v4  ;;  %v93_v11 = vld [vmem:[%s5179_s1 + $0x90] sm:$0xff]  ;;  %v94_v12 = vld [vmem:[%s5179_s1 + $0x98] sm:$0xff]  ;;  %v3165_v13 = vpack.c.bf16 %v78_v10, %v77_v9  ;;  %v80_v16 = vld [vmem:[%s5179_s1 + $0x28] sm:$0xff]  ;;  %s2712_s21 = sld [smem:[#allocation3 + $0x3]]  ;;  %s4586_s22 = sld [smem:[#allocation6 + $0x2]] }
  0x2a   :  { %3195 = vmatpush3.bf16.xpose.msk.msra.mxu1 %vm3948_vm1, %v3193_v7  ;;  %3164 = vmatprep.subr.bf16.mxu0 %v3877_v3  ;;  %v3197_v14 = vpack.c.bf16 %v94_v12, %v93_v11  ;;  %v95_v17 = vld [vmem:[%s5179_s1 + $0xa0] sm:$0xff]  ;;  %v96_v18 = vld [vmem:[%s5179_s1 + $0xa8] sm:$0xff]  ;;  %v3169_v19 = vpack.c.bf16 %v80_v16, %v79_v15  ;;  %v81_v21 = vld [vmem:[%s5179_s1 + $0x30] sm:$0xff]  ;;  %s4588_s23 = sld [smem:[#allocation3 + $0x4]]  ;;  %s2713_s24 = sld [smem:[#allocation6 + $0x3]] }
  0x2b   :  { %3196 = vmatprep.subr.bf16.mxu1 %v3877_v3  ;;  %v3201_v20 = vpack.c.bf16 %v96_v18, %v95_v17  ;;  %v82_v22 = vld [vmem:[%s5179_s1 + $0x38] sm:$0xff]  ;;  %v97_v23 = vld [vmem:[%s5179_s1 + $0xb0] sm:$0xff]  ;;  %v83_v27 = vld [vmem:[%s5179_s1 + $0x40] sm:$0xff]  ;;  %s2718_s25 = sld [smem:[#allocation3 + $0x5]]  ;;  %s2721_s26 = sld [smem:[#allocation3 + $0x6]] }
  0x2c   :  { %v98_v24 = vld [vmem:[%s5179_s1 + $0xb8] sm:$0xff]  ;;  %v3173_v25 = vpack.c.bf16 %v82_v22, %v81_v21  ;;  %v84_v28 = vld [vmem:[%s5179_s1 + $0x48] sm:$0xff]  ;;  %v99_v29 = vld [vmem:[%s5179_s1 + $0xc0] sm:$0xff]  ;;  %s2716_s27 = sld [smem:[#allocation6 + $0x4]]  ;;  %s2719_s28 = sld [smem:[#allocation6 + $0x5]] }
  0x2d   :  { %v3205_v26 = vpack.c.bf16 %v98_v24, %v97_v23  ;;  %v100_v30 = vld [vmem:[%s5179_s1 + $0xc8] sm:$0xff]  ;;  %v3177_v31 = vpack.c.bf16 %v84_v28, %v83_v27  ;;  %v85_v33 = vld [vmem:[%s5179_s1 + $0x50] sm:$0xff]  ;;  %v86_v34 = vld [vmem:[%s5179_s1 + $0x58] sm:$0xff]  ;;  %s2724_s29 = sld [smem:[#allocation3 + $0x7]]  ;;  %s2722_s30 = sld [smem:[#allocation6 + $0x6]] }
  0x2e   :  { %v3209_v32 = vpack.c.bf16 %v100_v30, %v99_v29  ;;  %v101_v35 = vld [vmem:[%s5179_s1 + $0xd0] sm:$0xff]  ;;  %v102_v36 = vld [vmem:[%s5179_s1 + $0xd8] sm:$0xff]  ;;  %v3181_v37 = vpack.c.bf16 %v86_v34, %v85_v33  ;;  %v87_v39 = vld [vmem:[%s5179_s1 + $0x60] sm:$0xff]  ;;  %s4646_s9 = sld [smem:[#allocation3 + $0x8]]  ;;  %s4652_s10 = sld [smem:[#allocation3 + $0x9]] }
  0x2f   :  { %v3213_v38 = vpack.c.bf16 %v102_v36, %v101_v35  ;;  %v88_v40 = vld [vmem:[%s5179_s1 + $0x68] sm:$0xff]  ;;  %v103_v41 = vld [vmem:[%s5179_s1 + $0xe0] sm:$0xff]  ;;  %v89_v45 = vld [vmem:[%s5179_s1 + $0x70] sm:$0xff]  ;;  %s4660_s11 = sld [smem:[#allocation6 + $0x7]]  ;;  %s4673_s12 = sld [smem:[#allocation6 + $0x8]] }
  0x30   :  { %v104_v42 = vld [vmem:[%s5179_s1 + $0xe8] sm:$0xff]  ;;  %v3185_v43 = vpack.c.bf16 %v88_v40, %v87_v39  ;;  %v90_v46 = vld [vmem:[%s5179_s1 + $0x78] sm:$0xff]  ;;  %v105_v47 = vld [vmem:[%s5179_s1 + $0xf0] sm:$0xff]  ;;  %s4675_s13 = sld [smem:[#allocation3 + $0xa]]  ;;  %s4689_s5 = sld [smem:[#allocation6 + $0x9]] }
  0x31   :  { %3167 = vmatpush3.bf16.xpose.msk.msra.mxu0 %vm3948_vm1, %v3165_v13  ;;  %v3217_v44 = vpack.c.bf16 %v104_v42, %v103_v41  ;;  %v106_v48 = vld [vmem:[%s5179_s1 + $0xf8] sm:$0xff]  ;;  %v3189_v49 = vpack.c.bf16 %v90_v46, %v89_v45  ;;  %v107_v51 = vld [vmem:[%s5179_s1 + $0x100] sm:$0xff]  ;;  %v108_v52 = vld [vmem:[%s5179_s1 + $0x108] sm:$0xff]  ;;  %s2734_s4 = sld [smem:[#allocation6 + $0xa]] }
  0x32   :  { %3199 = vmatpush3.bf16.xpose.msk.msra.mxu1 %vm3948_vm1, %v3197_v14  ;;  %3168 = vmatprep.subr.bf16.mxu0 %v3877_v3  ;;  %v3221_v50 = vpack.c.bf16 %v106_v48, %v105_v47  ;;  %v123_v53 = vld [vmem:[%s5179_s1 + $0x180] sm:$0xff]  ;;  %v124_v54 = vld [vmem:[%s5179_s1 + $0x188] sm:$0xff]  ;;  %v3225_v56 = vpack.c.bf16 %v108_v52, %v107_v51  ;;  %v109_v59 = vld [vmem:[%s5179_s1 + $0x110] sm:$0xff] }
  0x33   :  { %3200 = vmatprep.subr.bf16.mxu1 %v3877_v3  ;;  %v67_v55 = vld [vmem:[%s5178_s0] sm:$0xff]  ;;  %v68_v57 = vld [vmem:[%s5178_s0 + $0x8] sm:$0xff]  ;;  %v3257_v58 = vpack.c.bf16 %v124_v54, %v123_v53  ;;  %v110_v60 = vld [vmem:[%s5179_s1 + $0x118] sm:$0xff] }
  0x34   :  { %v125_v61 = vld [vmem:[%s5179_s1 + $0x190] sm:$0xff]  ;;  %v126_v62 = vld [vmem:[%s5179_s1 + $0x198] sm:$0xff]  ;;  %v3229_v63 = vpack.c.bf16 %v110_v60, %v109_v59  ;;  %v111_v1 = vld [vmem:[%s5179_s1 + $0x120] sm:$0xff]  ;;  %v3880_v60 = vmov 0  }
  0x35   :  { %v3261_v0 = vpack.c.bf16 %v126_v62, %v125_v61  ;;  %v112_v2 = vld [vmem:[%s5179_s1 + $0x128] sm:$0xff]  ;;  %v127_v4 = vld [vmem:[%s5179_s1 + $0x1a0] sm:$0xff]  ;;  %v113_v10 = vld [vmem:[%s5179_s1 + $0x130] sm:$0xff]  ;;  %3425 = vset.pattern.permute.xlu1 %v3880_v60  ;;  %3424 = vset.pattern.permute.xlu0 %v3880_v60 }
  0x36   :  { %v128_v6 = vld [vmem:[%s5179_s1 + $0x1a8] sm:$0xff]  ;;  %v3233_v7 = vpack.c.bf16 %v112_v2, %v111_v1  ;;  %v114_v11 = vld [vmem:[%s5179_s1 + $0x138] sm:$0xff]  ;;  %v129_v12 = vld [vmem:[%s5179_s1 + $0x1b0] sm:$0xff] }
  0x37   :  { %v3265_v9 = vpack.c.bf16 %v128_v6, %v127_v4  ;;  %v130_v13 = vld [vmem:[%s5179_s1 + $0x1b8] sm:$0xff]  ;;  %v3237_v14 = vpack.c.bf16 %v114_v11, %v113_v10  ;;  %v115_v16 = vld [vmem:[%s5179_s1 + $0x140] sm:$0xff]  ;;  %v116_v17 = vld [vmem:[%s5179_s1 + $0x148] sm:$0xff] }
  0x38   :  { %v3269_v15 = vpack.c.bf16 %v130_v13, %v129_v12  ;;  %v131_v18 = vld [vmem:[%s5179_s1 + $0x1c0] sm:$0xff]  ;;  %v117_v22 = vld [vmem:[%s5179_s1 + $0x150] sm:$0xff]  ;;  %v118_v23 = vld [vmem:[%s5179_s1 + $0x158] sm:$0xff] }
  0x39   :  { %3171 = vmatpush3.bf16.xpose.msk.msra.mxu0 %vm3948_vm1, %v3169_v19  ;;  %v132_v19 = vld [vmem:[%s5179_s1 + $0x1c8] sm:$0xff]  ;;  %v133_v24 = vld [vmem:[%s5179_s1 + $0x1d0] sm:$0xff]  ;;  %v119_v28 = vld [vmem:[%s5179_s1 + $0x160] sm:$0xff] }
  0x3a   :  { %3203 = vmatpush3.bf16.xpose.msk.msra.mxu1 %vm3948_vm1, %v3201_v20  ;;  %3172 = vmatprep.subr.bf16.mxu0 %v3877_v3  ;;  %v3241_v20 = vpack.c.bf16 %v116_v17, %v115_v16  ;;  %v3273_v21 = vpack.c.bf16 %v132_v19, %v131_v18  ;;  %v120_v29 = vld [vmem:[%s5179_s1 + $0x168] sm:$0xff]  ;;  %v135_v30 = vld [vmem:[%s5179_s1 + $0x1e0] sm:$0xff]  ;;  %v121_v34 = vld [vmem:[%s5179_s1 + $0x170] sm:$0xff] }
  0x3b   :  { %3204 = vmatprep.subr.bf16.mxu1 %v3877_v3  ;;  %v122_v35 = vld [vmem:[%s5179_s1 + $0x178] sm:$0xff]  ;;  %v137_v36 = vld [vmem:[%s5179_s1 + $0x1f0] sm:$0xff]  ;;  %v139_v40 = vld [vmem:[%s5179_s1 + $0x200] sm:$0xff] }
  0x3c   :  { %v140_v41 = vld [vmem:[%s5179_s1 + $0x208] sm:$0xff]  ;;  %v155_v42 = vld [vmem:[%s5179_s1 + $0x280] sm:$0xff]  ;;  %v70_v46 = vld [vmem:[%s5178_s0 + $0x18] sm:$0xff] }
  0x3d   :  { %v3289_v45 = vpack.c.bf16 %v140_v41, %v139_v40  ;;  %v141_v48 = vld [vmem:[%s5179_s1 + $0x210] sm:$0xff]  ;;  %v158_v51 = vld [vmem:[%s5179_s1 + $0x298] sm:$0xff]  ;;  %v143_v54 = vld [vmem:[%s5179_s1 + $0x220] sm:$0xff] }
  0x3e   :  { %v145_v61 = vld [vmem:[%s5179_s1 + $0x230] sm:$0xff]  ;;  %v146_v62 = vld [vmem:[%s5179_s1 + $0x238] sm:$0xff]  ;;  %v147_v4 = vld [vmem:[%s5179_s1 + $0x240] sm:$0xff] }
  0x3f   :  { %v3301_v1 = vpack.c.bf16 %v146_v62, %v145_v61  ;;  %v148_v6 = vld [vmem:[%s5179_s1 + $0x248] sm:$0xff]  ;;  %v149_v12 = vld [vmem:[%s5179_s1 + $0x250] sm:$0xff]  ;;  %v150_v13 = vld [vmem:[%s5179_s1 + $0x258] sm:$0xff] }
  0x40   :  { %v3305_v10 = vpack.c.bf16 %v148_v6, %v147_v4  ;;  %v3309_v16 = vpack.c.bf16 %v150_v13, %v149_v12  ;;  %v151_v18 = vld [vmem:[%s5179_s1 + $0x260] sm:$0xff]  ;;  %v152_v19 = vld [vmem:[%s5179_s1 + $0x268] sm:$0xff]  ;;  %v189_v40 = vld [vmem:[%s5179_s1 + $0x390] sm:$0xff] }
  0x41   :  { %3175 = vmatpush3.bf16.xpose.msk.msra.mxu0 %vm3948_vm1, %v3173_v25  ;;  %v134_v25 = vld [vmem:[%s5179_s1 + $0x1d8] sm:$0xff]  ;;  %v181_v62 = vld [vmem:[%s5179_s1 + $0x350] sm:$0xff]  ;;  %v183_v6 = vld [vmem:[%s5179_s1 + $0x360] sm:$0xff] }
  0x42   :  { %3207 = vmatpush3.bf16.xpose.msk.msra.mxu1 %vm3948_vm1, %v3205_v26  ;;  %3176 = vmatprep.subr.bf16.mxu0 %v3877_v3  ;;  %v3245_v26 = vpack.c.bf16 %v118_v23, %v117_v22  ;;  %v3277_v27 = vpack.c.bf16 %v134_v25, %v133_v24  ;;  %v3313_v22 = vpack.c.bf16 %v152_v19, %v151_v18  ;;  %v153_v24 = vld [vmem:[%s5179_s1 + $0x270] sm:$0xff]  ;;  %v154_v25 = vld [vmem:[%s5179_s1 + $0x278] sm:$0xff]  ;;  %v212_v5 = vld [vmem:[%s5181_s3 + $0x1] sm:$0x1] }
  0x43   :  { %3208 = vmatprep.subr.bf16.mxu1 %v3877_v3  ;;  %v190_v41 = vld [vmem:[%s5179_s1 + $0x398] sm:$0xff]  ;;  %v185_v13 = vld [vmem:[%s5179_s1 + $0x370] sm:$0xff]  ;;  %vm1192_vm4 = vcmp.gt.f32.partialorder %v212_v5, 0.0 }
  0x44   :  { %v74_v19 = vld [vmem:[%s5178_s0 + $0x38] sm:$0xff] }
  0x49   :  { %3179 = vmatpush3.bf16.xpose.msk.msra.mxu0 %vm3948_vm1, %v3177_v31  ;;  %v136_v31 = vld [vmem:[%s5179_s1 + $0x1e8] sm:$0xff] }
  0x4a   :  { %3211 = vmatpush3.bf16.xpose.msk.msra.mxu1 %vm3948_vm1, %v3209_v32  ;;  %3180 = vmatprep.subr.bf16.mxu0 %v3877_v3  ;;  %v3249_v32 = vpack.c.bf16 %v120_v29, %v119_v28  ;;  %v3281_v33 = vpack.c.bf16 %v136_v31, %v135_v30  ;;  %v3317_v28 = vpack.c.bf16 %v154_v25, %v153_v24  ;;  %v171_v30 = vld [vmem:[%s5179_s1 + $0x300] sm:$0xff]  ;;  %v172_v31 = vld [vmem:[%s5179_s1 + $0x308] sm:$0xff]  ;;  %v1200_v25 = vsel %vm1192_vm4, 1, %v3880_v60 }
  0x4b   :  { %3212 = vmatprep.subr.bf16.mxu1 %v3877_v3  ;;  %vm2538_vm4 = vcmask 1041409  }
  0x51   :  { %3183 = vmatpush3.bf16.xpose.msk.msra.mxu0 %vm3948_vm1, %v3181_v37  ;;  %v138_v37 = vld [vmem:[%s5179_s1 + $0x1f8] sm:$0xff] }
  0x52   :  { %3215 = vmatpush3.bf16.xpose.msk.msra.mxu1 %vm3948_vm1, %v3213_v38  ;;  %3184 = vmatprep.subr.bf16.mxu0 %v3877_v3  ;;  %v3253_v38 = vpack.c.bf16 %v122_v35, %v121_v34  ;;  %v3285_v39 = vpack.c.bf16 %v138_v37, %v137_v36  ;;  %v71_v34 = vld [vmem:[%s5178_s0 + $0x20] sm:$0xff]  ;;  %v3353_v35 = vpack.c.bf16 %v172_v31, %v171_v30  ;;  %v72_v36 = vld [vmem:[%s5178_s0 + $0x28] sm:$0xff]  ;;  %v4584_v31 = vstv %s2709_s19 }
  0x53   :  { %3216 = vmatprep.subr.bf16.mxu1 %v3877_v3 }
  0x59   :  { %3187 = vmatpush3.bf16.xpose.msk.msra.mxu0 %vm3948_vm1, %v3185_v43  ;;  %v156_v43 = vld [vmem:[%s5179_s1 + $0x288] sm:$0xff] }
  0x5a   :  { %3219 = vmatpush3.bf16.xpose.msk.msra.mxu1 %vm3948_vm1, %v3217_v44  ;;  %3188 = vmatprep.subr.bf16.mxu0 %v3877_v3  ;;  %v69_v44 = vld [vmem:[%s5178_s0 + $0x10] sm:$0xff]  ;;  %v3321_v47 = vpack.c.bf16 %v156_v43, %v155_v42  ;;  %v3389_v43 = vpack.c.bf16 %v190_v41, %v189_v40  ;;  %v4600_v40 = vstv %s1273_s20  ;;  %s4879_s20 = sld [smem:[#allocation8]] }
  0x5b   :  { %3220 = vmatprep.subr.bf16.mxu1 %v3877_v3 }
  0x61   :  { %3191 = vmatpush3.bf16.xpose.msk.msra.mxu0 %vm3948_vm1, %v3189_v49  ;;  %v142_v49 = vld [vmem:[%s5179_s1 + $0x218] sm:$0xff] }
  0x62   :  { %3223 = vmatpush3.bf16.xpose.msk.msra.mxu1 %vm3948_vm1, %v3221_v50  ;;  %3224 = vmatprep.subr.bf16.mxu0 %v3877_v3  ;;  %v157_v50 = vld [vmem:[%s5179_s1 + $0x290] sm:$0xff]  ;;  %v3293_v52 = vpack.c.bf16 %v142_v49, %v141_v48 }
  0x63   :  { %3256 = vmatprep.subr.bf16.mxu1 %v3877_v3  ;;  %v3325_v53 = vpack.c.bf16 %v158_v51, %v157_v50  ;;  %v177_v49 = vld [vmem:[%s5179_s1 + $0x330] sm:$0xff]  ;;  %v178_v50 = vld [vmem:[%s5179_s1 + $0x338] sm:$0xff] }
  0x64   :  { %v193_v51 = vld [vmem:[%s5179_s1 + $0x3b0] sm:$0xff] }
  0x68   :  { %2913 = vmatmul.mubr.msk.f32.vlgmr.msra.gmra.mrb[0].mxu0 %vm222_vm0, %v67_v55  ;;  %v144_v55 = vld [vmem:[%s5179_s1 + $0x228] sm:$0xff] }
  0x69   :  { %3227 = vmatpush3.bf16.xpose.msk.msra.mxu0 %vm3948_vm1, %v3225_v56  ;;  %2948 = vmatmul.mubr.msk.f32.vlgmr.msra.gmra.mrb[0].mxu1 %vm222_vm0, %v68_v57  ;;  %v159_v56 = vld [vmem:[%s5179_s1 + $0x2a0] sm:$0xff]  ;;  %v160_v57 = vld [vmem:[%s5179_s1 + $0x2a8] sm:$0xff] }
  0x6a   :  { %3259 = vmatpush3.bf16.xpose.msk.msra.mxu1 %vm3948_vm1, %v3257_v58  ;;  %3228 = vmatprep.subr.bf16.mxu0 %v3877_v3  ;;  %v3297_v58 = vpack.c.bf16 %v144_v55, %v143_v54  ;;  %v3329_v59 = vpack.c.bf16 %v160_v57, %v159_v56  ;;  %v179_v55 = vld [vmem:[%s5179_s1 + $0x340] sm:$0xff]  ;;  %v180_v56 = vld [vmem:[%s5179_s1 + $0x348] sm:$0xff] }
  0x6b   :  { %3260 = vmatprep.subr.bf16.mxu1 %v3877_v3  ;;  %2982 = vmatprep.mubr.msk.f32.mxu0 %vm3878_vm2, %v3879_v8  ;;  %v195_v57 = vld [vmem:[%s5179_s1 + $0x3c0] sm:$0xff] }
  0x6c   :  { %3017 = vmatprep.mubr.msk.f32.mxu1 %vm3878_vm2, %v3879_v8 }
  0x71   :  { %3231 = vmatpush3.bf16.xpose.msk.msra.mxu0 %vm3948_vm1, %v3229_v63  ;;  %v161_v63 = vld [vmem:[%s5179_s1 + $0x2b0] sm:$0xff] }
  0x72   :  { %3263 = vmatpush3.bf16.xpose.msk.msra.mxu1 %vm3948_vm1, %v3261_v0  ;;  %3232 = vmatprep.subr.bf16.mxu0 %v3877_v3  ;;  %v162_v0 = vld [vmem:[%s5179_s1 + $0x2b8] sm:$0xff] }
  0x73   :  { %3264 = vmatprep.subr.bf16.mxu1 %v3877_v3  ;;  %v3333_v2 = vpack.c.bf16 %v162_v0, %v161_v63  ;;  %v182_v63 = vld [vmem:[%s5179_s1 + $0x358] sm:$0xff]  ;;  %v197_v0 = vld [vmem:[%s5179_s1 + $0x3d0] sm:$0xff] }
  0x79   :  { %3235 = vmatpush3.bf16.xpose.msk.msra.mxu0 %vm3948_vm1, %v3233_v7  ;;  %v163_v7 = vld [vmem:[%s5179_s1 + $0x2c0] sm:$0xff] }
  0x7a   :  { %3267 = vmatpush3.bf16.xpose.msk.msra.mxu1 %vm3948_vm1, %v3265_v9  ;;  %3236 = vmatprep.subr.bf16.mxu0 %v3877_v3  ;;  %v164_v9 = vld [vmem:[%s5179_s1 + $0x2c8] sm:$0xff] }
  0x7b   :  { %3268 = vmatprep.subr.bf16.mxu1 %v3877_v3  ;;  %v3337_v11 = vpack.c.bf16 %v164_v9, %v163_v7  ;;  %v184_v7 = vld [vmem:[%s5179_s1 + $0x368] sm:$0xff]  ;;  %v199_v9 = vld [vmem:[%s5179_s1 + $0x3e0] sm:$0xff] }
  0x81   :  { %3239 = vmatpush3.bf16.xpose.msk.msra.mxu0 %vm3948_vm1, %v3237_v14  ;;  %v165_v14 = vld [vmem:[%s5179_s1 + $0x2d0] sm:$0xff] }
  0x82   :  { %3271 = vmatpush3.bf16.xpose.msk.msra.mxu1 %vm3948_vm1, %v3269_v15  ;;  %3240 = vmatprep.subr.bf16.mxu0 %v3877_v3  ;;  %v166_v15 = vld [vmem:[%s5179_s1 + $0x2d8] sm:$0xff] }
  0x83   :  { %3272 = vmatprep.subr.bf16.mxu1 %v3877_v3  ;;  %v3341_v17 = vpack.c.bf16 %v166_v15, %v165_v14  ;;  %v186_v14 = vld [vmem:[%s5179_s1 + $0x378] sm:$0xff]  ;;  %v201_v15 = vld [vmem:[%s5179_s1 + $0x3f0] sm:$0xff] }
  0x89   :  { %3243 = vmatpush3.bf16.xpose.msk.msra.mxu0 %vm3948_vm1, %v3241_v20  ;;  %v167_v20 = vld [vmem:[%s5179_s1 + $0x2e0] sm:$0xff] }
  0x8a   :  { %3275 = vmatpush3.bf16.xpose.msk.msra.mxu1 %vm3948_vm1, %v3273_v21  ;;  %3244 = vmatprep.subr.bf16.mxu0 %v3877_v3  ;;  %v168_v21 = vld [vmem:[%s5179_s1 + $0x2e8] sm:$0xff] }
  0x8b   :  { %3276 = vmatprep.subr.bf16.mxu1 %v3877_v3  ;;  %v3345_v23 = vpack.c.bf16 %v168_v21, %v167_v20  ;;  %v1207_v20 = vlaneseq  ;;  %v211_v21 = vld [vmem:[%s5181_s3] sm:$0x1] }
  0x8c   :  { %vm1191_vm3 = vcmp.gt.f32.partialorder %v211_v21, 0.0 }
  0x8d   :  { %v1199_v24 = vsel %vm1191_vm3, 1, %v3880_v60  ;;  %vm2385_vm3 = vcmask 7168  }
  0x91   :  { %3247 = vmatpush3.bf16.xpose.msk.msra.mxu0 %vm3948_vm1, %v3245_v26  ;;  %v169_v26 = vld [vmem:[%s5179_s1 + $0x2f0] sm:$0xff] }
  0x92   :  { %3279 = vmatpush3.bf16.xpose.msk.msra.mxu1 %vm3948_vm1, %v3277_v27  ;;  %3248 = vmatprep.subr.bf16.mxu0 %v3877_v3  ;;  %v170_v27 = vld [vmem:[%s5179_s1 + $0x2f8] sm:$0xff] }
  0x93   :  { %3280 = vmatprep.subr.bf16.mxu1 %v3877_v3  ;;  %v3349_v29 = vpack.c.bf16 %v170_v27, %v169_v26 }
  0x99   :  { %3251 = vmatpush3.bf16.xpose.msk.msra.mxu0 %vm3948_vm1, %v3249_v32  ;;  %v187_v32 = vld [vmem:[%s5179_s1 + $0x380] sm:$0xff] }
  0x9a   :  { %3283 = vmatpush3.bf16.xpose.msk.msra.mxu1 %vm3948_vm1, %v3281_v33  ;;  %3252 = vmatprep.subr.bf16.mxu0 %v3877_v3  ;;  %v188_v33 = vld [vmem:[%s5179_s1 + $0x388] sm:$0xff] }
  0x9b   :  { %3284 = vmatprep.subr.bf16.mxu1 %v3877_v3  ;;  %v3385_v37 = vpack.c.bf16 %v188_v33, %v187_v32 }
  0xa1   :  { %3255 = vmatpush3.bf16.xpose.msk.msra.mxu0 %vm3948_vm1, %v3253_v38  ;;  %v173_v38 = vld [vmem:[%s5179_s1 + $0x310] sm:$0xff] }
  0xa2   :  { %3287 = vmatpush3.bf16.xpose.msk.msra.mxu1 %vm3948_vm1, %v3285_v39  ;;  %3288 = vmatprep.subr.bf16.mxu0 %v3877_v3  ;;  %v174_v39 = vld [vmem:[%s5179_s1 + $0x318] sm:$0xff] }
  0xa3   :  { %3320 = vmatprep.subr.bf16.mxu1 %v3877_v3  ;;  %v3357_v42 = vpack.c.bf16 %v174_v39, %v173_v38 }
  0xa8   :  { %2983 = vmatmul.mubr.msk.f32.vlgmr.msra.gmra.mrb[2].mxu0 %vm222_vm0, %v69_v44  ;;  %v175_v44 = vld [vmem:[%s5179_s1 + $0x320] sm:$0xff] }
  0xa9   :  { %3291 = vmatpush3.bf16.xpose.msk.msra.mxu0 %vm3948_vm1, %v3289_v45  ;;  %3018 = vmatmul.mubr.msk.f32.vlgmr.msra.gmra.mrb[2].mxu1 %vm222_vm0, %v70_v46  ;;  %v176_v45 = vld [vmem:[%s5179_s1 + $0x328] sm:$0xff] }
  0xaa   :  { %3323 = vmatpush3.bf16.xpose.msk.msra.mxu1 %vm3948_vm1, %v3321_v47  ;;  %3292 = vmatprep.subr.bf16.mxu0 %v3877_v3  ;;  %v192_v46 = vld [vmem:[%s5179_s1 + $0x3a8] sm:$0xff]  ;;  %v3361_v47 = vpack.c.bf16 %v176_v45, %v175_v44 }
  0xab   :  { %3324 = vmatprep.subr.bf16.mxu1 %v3877_v3  ;;  %3052 = vmatprep.mubr.msk.f32.mxu0 %vm3878_vm2, %v3879_v8 }
  0xac   :  { %3087 = vmatprep.mubr.msk.f32.mxu1 %vm3878_vm2, %v3879_v8 }
  0xb1   :  { %3295 = vmatpush3.bf16.xpose.msk.msra.mxu0 %vm3948_vm1, %v3293_v52  ;;  %v194_v52 = vld [vmem:[%s5179_s1 + $0x3b8] sm:$0xff] }
  0xb2   :  { %3327 = vmatpush3.bf16.xpose.msk.msra.mxu1 %vm3948_vm1, %v3325_v53  ;;  %3296 = vmatprep.subr.bf16.mxu0 %v3877_v3  ;;  %v3365_v53 = vpack.c.bf16 %v178_v50, %v177_v49  ;;  %v3397_v54 = vpack.c.bf16 %v194_v52, %v193_v51 }
  0xb3   :  { %3328 = vmatprep.subr.bf16.mxu1 %v3877_v3 }
  0xb9   :  { %3299 = vmatpush3.bf16.xpose.msk.msra.mxu0 %vm3948_vm1, %v3297_v58  ;;  %v196_v58 = vld [vmem:[%s5179_s1 + $0x3c8] sm:$0xff] }
  0xba   :  { %3331 = vmatpush3.bf16.xpose.msk.msra.mxu1 %vm3948_vm1, %v3329_v59  ;;  %3300 = vmatprep.subr.bf16.mxu0 %v3877_v3  ;;  %v3369_v59 = vpack.c.bf16 %v180_v56, %v179_v55  ;;  %v3401_v61 = vpack.c.bf16 %v196_v58, %v195_v57 }
  0xbb   :  { %3332 = vmatprep.subr.bf16.mxu1 %v3877_v3 }
  0xc1   :  { %3303 = vmatpush3.bf16.xpose.msk.msra.mxu0 %vm3948_vm1, %v3301_v1  ;;  %v198_v1 = vld [vmem:[%s5179_s1 + $0x3d8] sm:$0xff] }
  0xc2   :  { %3335 = vmatpush3.bf16.xpose.msk.msra.mxu1 %vm3948_vm1, %v3333_v2  ;;  %3304 = vmatprep.subr.bf16.mxu0 %v3877_v3  ;;  %v3373_v2 = vpack.c.bf16 %v182_v63, %v181_v62  ;;  %v3405_v4 = vpack.c.bf16 %v198_v1, %v197_v0 }
  0xc3   :  { %3336 = vmatprep.subr.bf16.mxu1 %v3877_v3 }
  0xc9   :  { %3307 = vmatpush3.bf16.xpose.msk.msra.mxu0 %vm3948_vm1, %v3305_v10  ;;  %v200_v10 = vld [vmem:[%s5179_s1 + $0x3e8] sm:$0xff] }
  0xca   :  { %3339 = vmatpush3.bf16.xpose.msk.msra.mxu1 %vm3948_vm1, %v3337_v11  ;;  %3308 = vmatprep.subr.bf16.mxu0 %v3877_v3  ;;  %v3377_v11 = vpack.c.bf16 %v184_v7, %v183_v6  ;;  %v3409_v12 = vpack.c.bf16 %v200_v10, %v199_v9  ;;  %v4632_v9 = vstv %s2713_s24  ;;  %v4634_v10 = vstv %s2718_s25  ;;  %s4888_s24 = sld [smem:[#allocation8 + $0x5]] }
  0xcb   :  { %3340 = vmatprep.subr.bf16.mxu1 %v3877_v3 }
  0xd1   :  { %3311 = vmatpush3.bf16.xpose.msk.msra.mxu0 %vm3948_vm1, %v3309_v16  ;;  %v202_v16 = vld [vmem:[%s5179_s1 + $0x3f8] sm:$0xff] }
  0xd2   :  { %3343 = vmatpush3.bf16.xpose.msk.msra.mxu1 %vm3948_vm1, %v3341_v17  ;;  %3312 = vmatprep.subr.bf16.mxu0 %v3877_v3  ;;  %v3381_v17 = vpack.c.bf16 %v186_v14, %v185_v13  ;;  %v3413_v18 = vpack.c.bf16 %v202_v16, %v201_v15 }
  0xd3   :  { %3344 = vmatprep.subr.bf16.mxu1 %v3877_v3 }
  0xd9   :  { %3315 = vmatpush3.bf16.xpose.msk.msra.mxu0 %vm3948_vm1, %v3313_v22  ;;  %v1208_v22 = vshrl.u32 %v1207_v20, 7 }
  0xda   :  { %3347 = vmatpush3.bf16.xpose.msk.msra.mxu1 %vm3948_vm1, %v3345_v23  ;;  %3316 = vmatprep.subr.bf16.mxu0 %v3877_v3 }
  0xdb   :  { %3348 = vmatprep.subr.bf16.mxu1 %v3877_v3  ;;  %v4574_v23 = vsub.s32 0, %v1208_v22 }
  0xdd   :  { %v1210_v26 = vrot.slane %v1199_v24, %v4574_v23  ;;  %v1214_v27 = vrot.slane %v1200_v25, %v4574_v23 }
  0xdf   :  { %vm1239_vm5 = vcmp.eq.s32.totalorder %v1210_v26, 1  ;;  %vm1240_vm6 = vcmp.eq.s32.totalorder %v1214_v27, 1 }
  0xe1   :  { %3319 = vmatpush3.bf16.xpose.msk.msra.mxu0 %vm3948_vm1, %v3317_v28 }
  0xe2   :  { %3351 = vmatpush3.bf16.xpose.msk.msra.mxu1 %vm3948_vm1, %v3349_v29  ;;  %3352 = vmatprep.subr.bf16.mxu0 %v3877_v3  ;;  %v4582_v29 = vstv %s1255_s18 }
  0xe3   :  { %3384 = vmatprep.subr.bf16.mxu1 %v3877_v3 }
  0xe8   :  { %3053 = vmatmul.mubr.msk.f32.vlgmr.msra.gmra.mrb[4].mxu0 %vm222_vm0, %v71_v34 }
  0xe9   :  { %3355 = vmatpush3.bf16.xpose.msk.msra.mxu0 %vm3948_vm1, %v3353_v35  ;;  %3088 = vmatmul.mubr.msk.f32.vlgmr.msra.gmra.mrb[4].mxu1 %vm222_vm0, %v72_v36  ;;  %v4592_v35 = vstv %s2707_s6  ;;  %s4877_s6 = sld [smem:[#allocation8 + $0x1]] }
  0xea   :  { %3387 = vmatpush3.bf16.xpose.msk.msra.mxu1 %vm3948_vm1, %v3385_v37  ;;  %3356 = vmatprep.subr.bf16.mxu0 %v3877_v3 }
  0xeb   :  { %3388 = vmatprep.subr.bf16.mxu1 %v3877_v3  ;;  %3122 = vmatprep.mubr.msk.f32.mxu0 %vm3878_vm2, %v3879_v8 }
  0xec   :  { %3157 = vmatprep.mubr.msk.f32.mxu1 %vm3878_vm2, %v3879_v8  ;;  %v191_v8 = vld [vmem:[%s5179_s1 + $0x3a0] sm:$0xff] }
  0xed   :  { %v3393_v48 = vpack.c.bf16 %v192_v46, %v191_v8  ;;  %v4610_v46 = vstv %s2712_s21  ;;  %s4882_s21 = sld [smem:[#allocation8 + $0x2]] }
  0xf1   :  { %3359 = vmatpush3.bf16.xpose.msk.msra.mxu0 %vm3948_vm1, %v3357_v42 }
  0xf2   :  { %3391 = vmatpush3.bf16.xpose.msk.msra.mxu1 %vm3948_vm1, %v3389_v43  ;;  %3360 = vmatprep.subr.bf16.mxu0 %v3877_v3 }
  0xf3   :  { %3392 = vmatprep.subr.bf16.mxu1 %v3877_v3 }
  0xf9   :  { %3363 = vmatpush3.bf16.xpose.msk.msra.mxu0 %vm3948_vm1, %v3361_v47 }
  0xfa   :  { %3395 = vmatpush3.bf16.xpose.msk.msra.mxu1 %vm3948_vm1, %v3393_v48  ;;  %3364 = vmatprep.subr.bf16.mxu0 %v3877_v3 }
  0xfb   :  { %3396 = vmatprep.subr.bf16.mxu1 %v3877_v3 }
 0x101   :  { %3367 = vmatpush3.bf16.xpose.msk.msra.mxu0 %vm3948_vm1, %v3365_v53 }
 0x102   :  { %3399 = vmatpush3.bf16.xpose.msk.msra.mxu1 %vm3948_vm1, %v3397_v54  ;;  %3368 = vmatprep.subr.bf16.mxu0 %v3877_v3 }
 0x103   :  { %3400 = vmatprep.subr.bf16.mxu1 %v3877_v3 }
 0x109   :  { %3371 = vmatpush3.bf16.xpose.msk.msra.mxu0 %vm3948_vm1, %v3369_v59  ;;  %v4621_v59 = vstv %s4586_s22  ;;  %s4884_s22 = sld [smem:[#allocation8 + $0x3]] }
 0x10a   :  { %3403 = vmatpush3.bf16.xpose.msk.msra.mxu1 %vm3948_vm1, %v3401_v61  ;;  %3372 = vmatprep.subr.bf16.mxu0 %v3877_v3  ;;  %v4624_v61 = vstv %s4588_s23  ;;  %s4886_s23 = sld [smem:[#allocation8 + $0x4]] }
 0x10b   :  { %3404 = vmatprep.subr.bf16.mxu1 %v3877_v3 }
 0x111   :  { %3375 = vmatpush3.bf16.xpose.msk.msra.mxu0 %vm3948_vm1, %v3373_v2 }
 0x112   :  { %3407 = vmatpush3.bf16.xpose.msk.msra.mxu1 %vm3948_vm1, %v3405_v4  ;;  %3376 = vmatprep.subr.bf16.mxu0 %v3877_v3 }
 0x113   :  { %3408 = vmatprep.subr.bf16.mxu1 %v3877_v3 }
 0x119   :  { %3379 = vmatpush3.bf16.xpose.msk.msra.mxu0 %vm3948_vm1, %v3377_v11  ;;  %v4636_v11 = vstv %s2721_s26 }
 0x11a   :  { %3411 = vmatpush3.bf16.xpose.msk.msra.mxu1 %vm3948_vm1, %v3409_v12  ;;  %3380 = vmatprep.subr.bf16.mxu0 %v3877_v3 }
 0x11b   :  { %3412 = vmatprep.subr.bf16.mxu1 %v3877_v3  ;;  %v73_v3 = vld [vmem:[%s5178_s0 + $0x30] sm:$0xff]  ;;  %s2706_s0 = sld [smem:[#allocation3 + $0x1]] }
 0x121   :  { %3383 = vmatpush3.bf16.xpose.msk.msra.mxu0 %vm3948_vm1, %v3381_v17  ;;  %v4580_v28 = vstv %s2706_s0 }
 0x122   :  { %3415 = vmatpush3.bf16.xpose.msk.msra.mxu1 %vm3948_vm1, %v3413_v18 }
 0x128   :  { %3123 = vmatmul.mubr.msk.f32.vlgmr.msra.gmra.mrb[6].mxu0 %vm222_vm0, %v73_v3 }
 0x129   :  { %3158 = vmatmul.mubr.msk.f32.vlgmr.msra.gmra.mrb[6].mxu1 %vm222_vm0, %v74_v19  ;;  %v4644_v19 = vstv %s2716_s27 }
 0x13b   :  { %v340_v30 = vpop.f32.mrb[0].mxu0 }
 0x13c   :  { %v4590_v32 = vsel %vm1239_vm5, %v340_v30, -10000.0  ;;  %v2914_v33 = vpop.f32.mrb[1].mxu0  ;;  %v461_v34 = vpop.f32.mrb[0].mxu1  ;;  %vm2540_vm5 = vcmask 1042434  }
 0x13d   :  { %v4594_v36 = vsel %vm1240_vm6, %v461_v34, -10000.0  ;;  %v2949_v37 = vpop.f32.mrb[1].mxu1  ;;  %v1359_v38 = vsub.f32 %v4590_v32, %v4580_v28  ;;  %v1257_v39 = vsub.f32 %v4590_v32, %v4582_v29  ;;  %v1461_v44 = vsub.f32 %v4590_v32, %v4584_v31 }
 0x13e   :  { %v1360_v41 = vsub.f32 %v4594_v36, %v4580_v28  ;;  %v1258_v42 = vsub.f32 %v4594_v36, %v4582_v29  ;;  %v1462_v43 = vsub.f32 %v4594_v36, %v4584_v31  ;;  %v1564_v52 = vsub.f32 %v4594_v36, %v4610_v46 }
 0x13f   :  { %v1367_v45 = vmul.f32 %v1359_v38, %v1359_v38  ;;  %v1265_v8 = vmul.f32 %v1257_v39, %v1257_v39  ;;  %v1469_v55 = vmul.f32 %v1461_v44, %v1461_v44  ;;  %v1563_v56 = vsub.f32 %v4590_v32, %v4610_v46 }
 0x140   :  { %v1368_v47 = vmul.f32 %v1360_v41, %v1360_v41  ;;  %v1266_v48 = vmul.f32 %v1258_v42, %v1258_v42  ;;  %v1470_v51 = vmul.f32 %v1462_v43, %v1462_v43  ;;  %v1572_v1 = vmul.f32 %v1564_v52, %v1564_v52 }
 0x141   :  { %v1377_v49 = vmul.f32 %v4592_v35, %v1367_v45  ;;  %v1275_v50 = vmul.f32 %v4600_v40, %v1265_v8  ;;  %v1666_v2 = vsub.f32 %v4594_v36, %v4624_v61  ;;  %v1479_v4 = vmul.f32 %v4621_v59, %v1469_v55 }
 0x142   :  { %v1378_v53 = vmul.f32 %v4592_v35, %v1368_v47  ;;  %v1276_v54 = vmul.f32 %v4600_v40, %v1266_v48  ;;  %v1480_v0 = vmul.f32 %v4621_v59, %v1470_v51  ;;  %v1571_v6 = vmul.f32 %v1563_v56, %v1563_v56 }
 0x143   :  { %v1385_v57 = vmul.f32 1.442695, %v1377_v49  ;;  %v1283_v58 = vmul.f32 1.442695, %v1275_v50  ;;  %v1665_v7 = vsub.f32 %v4590_v32, %v4624_v61  ;;  %v1582_v13 = vmul.f32 %v4632_v9, %v1572_v1 }
 0x144   :  { %v1387_v62 = vmul.f32 1.442695, %v1378_v53  ;;  %v1285_v63 = vmul.f32 1.442695, %v1276_v54  ;;  %v1489_v12 = vmul.f32 1.442695, %v1480_v0  ;;  %v1674_v14 = vmul.f32 %v1666_v2, %v1666_v2 }
 0x145   :  { %3426 = vpow2.f32 %v1385_v57  ;;  %v1768_v15 = vsub.f32 %v4594_v36, %v4634_v10  ;;  %v1487_v16 = vmul.f32 1.442695, %v1479_v4  ;;  %v1581_v17 = vmul.f32 %v4632_v9, %v1571_v6 }
 0x146   :  { %3428 = vpow2.f32 %v1283_v58  ;;  %v1673_v18 = vmul.f32 %v1665_v7, %v1665_v7  ;;  %v1767_v3 = vsub.f32 %v4590_v32, %v4634_v10  ;;  %v1870_v20 = vsub.f32 %v4594_v36, %v4636_v11 }
 0x147   :  { %3430 = vpow2.f32 %v1387_v62  ;;  %v1869_v21 = vsub.f32 %v4590_v32, %v4636_v11  ;;  %v1591_v22 = vmul.f32 1.442695, %v1582_v13  ;;  %v1684_v5 = vmul.f32 %v4644_v19, %v1674_v14 }
 0x148   :  { %3432 = vpow2.f32 %v1285_v63  ;;  %v1776_v24 = vmul.f32 %v1768_v15, %v1768_v15  ;;  %v1589_v25 = vmul.f32 1.442695, %v1581_v17  ;;  %v1683_v26 = vmul.f32 %v4644_v19, %v1673_v18 }
 0x149   :  { %3434 = vpow2.f32 %v1489_v12  ;;  %v1775_v27 = vmul.f32 %v1767_v3, %v1767_v3  ;;  %v4656_v33 = vstv %s2719_s28  ;;  %v4658_v34 = vstv %s2724_s29  ;;  %s4896_s29 = sld [smem:[#allocation8 + $0x6]] }
 0x14a   :  { %3436 = vpow2.f32 %v1487_v16  ;;  %v1878_v38 = vmul.f32 %v1870_v20, %v1870_v20  ;;  %v4662_v39 = vstv %s2722_s30  ;;  %v1877_v41 = vmul.f32 %v1869_v21, %v1869_v21  ;;  %s4898_s30 = sld [smem:[#allocation8 + $0x7]] }
 0x14b   :  { %3438 = vpow2.f32 %v1591_v22  ;;  %v1693_v43 = vmul.f32 1.442695, %v1684_v5  ;;  %v1786_v44 = vmul.f32 %v4656_v33, %v1776_v24  ;;  %v1972_v45 = vsub.f32 %v4594_v36, %v4658_v34 }
 0x14c   :  { %3440 = vpow2.f32 %v1589_v25  ;;  %v1691_v47 = vmul.f32 1.442695, %v1683_v26  ;;  %v1785_v48 = vmul.f32 %v4656_v33, %v1775_v27  ;;  %v1971_v49 = vsub.f32 %v4590_v32, %v4658_v34 }
 0x14d   :  { %v4671_v50 = vstv %s4646_s9  ;;  %v1888_v51 = vmul.f32 %v4662_v39, %v1878_v38  ;;  %v1887_v52 = vmul.f32 %v4662_v39, %v1877_v41  ;;  %v4680_v53 = vstv %s4652_s10  ;;  %s4906_s9 = sld [smem:[#allocation8 + $0x8]]  ;;  %s4923_s10 = sld [smem:[#allocation8 + $0xa]] }
 0x14e   :  { %3442 = vpow2.f32 %v1693_v43  ;;  %v1795_v54 = vmul.f32 1.442695, %v1786_v44  ;;  %v1980_v55 = vmul.f32 %v1972_v45, %v1972_v45  ;;  %v2074_v56 = vsub.f32 %v4594_v36, %v4671_v50 }
 0x14f   :  { %v3427_v30 = vpop.eup %3426  ;;  %3444 = vpow2.f32 %v1691_v47  ;;  %v1793_v57 = vmul.f32 1.442695, %v1785_v48  ;;  %v1979_v58 = vmul.f32 %v1971_v49, %v1971_v49  ;;  %v2073_v62 = vsub.f32 %v4590_v32, %v4671_v50 }
 0x150   :  { %v3429_v37 = vpop.eup %3428  ;;  %1401 = vadd.xlane.f32.xlu1 %v3427_v30  ;;  %v4687_v0 = vstv %s4660_s11  ;;  %v1897_v2 = vmul.f32 1.442695, %v1888_v51  ;;  %v2176_v4 = vsub.f32 %v4594_v36, %v4680_v53  ;;  %3446 = vpow2.f32 %v1795_v54 }
 0x151   :  { %v3431_v42 = vpop.eup %3430  ;;  %1299 = vadd.xlane.f32.xlu0 %v3429_v37  ;;  %v1990_v6 = vmul.f32 %v4687_v0, %v1980_v55  ;;  %v2082_v7 = vmul.f32 %v2074_v56, %v2074_v56  ;;  %v2175_v12 = vsub.f32 %v4590_v32, %v4680_v53  ;;  %3448 = vpow2.f32 %v1793_v57 }
 0x152   :  { %v3433_v8 = vpop.eup %3432  ;;  %v1895_v13 = vmul.f32 1.442695, %v1887_v52  ;;  %v1989_v14 = vmul.f32 %v4687_v0, %v1979_v58  ;;  %v2081_v15 = vmul.f32 %v2073_v62, %v2073_v62  ;;  %v4698_v17 = vstv %s4673_s12 }
 0x153   :  { %v3435_v63 = vpop.eup %3434  ;;  %v4701_v18 = vstv %s4675_s13  ;;  %3450 = vpow2.f32 %v1897_v2  ;;  %v2184_v20 = vmul.f32 %v2176_v4, %v2176_v4  ;;  %v1999_v21 = vmul.f32 1.442695, %v1990_v6 }
 0x154   :  { %1403 = vadd.xlane.f32.xlu1 %v3431_v42  ;;  %v3437_v1 = vpop.eup %3436  ;;  %v2092_v22 = vmul.f32 %v4698_v17, %v2082_v7  ;;  %v2183_v5 = vmul.f32 %v2175_v12, %v2175_v12  ;;  %v2278_v24 = vsub.f32 %v4594_v36, %v4701_v18  ;;  %3452 = vpow2.f32 %v1895_v13 }
 0x155   :  { %1301 = vadd.xlane.f32.xlu0 %v3433_v8  ;;  %v3439_v16 = vpop.eup %3438  ;;  %v1997_v25 = vmul.f32 1.442695, %v1989_v14  ;;  %v2091_v26 = vmul.f32 %v4698_v17, %v2081_v15  ;;  %v2277_v27 = vsub.f32 %v4590_v32, %v4701_v18  ;;  %v4710_v37 = vstv %s4689_s5 }
 0x156   :  { %v3441_v3 = vpop.eup %3440  ;;  %3454 = vpow2.f32 %v1999_v21  ;;  %v2101_v41 = vmul.f32 1.442695, %v2092_v22  ;;  %v2194_v42 = vmul.f32 %v4710_v37, %v2184_v20  ;;  %v2286_v43 = vmul.f32 %v2278_v24, %v2278_v24 }
 0x157   :  { %3456 = vpow2.f32 %v1997_v25  ;;  %v2099_v36 = vmul.f32 1.442695, %v2091_v26  ;;  %v2193_v44 = vmul.f32 %v4710_v37, %v2183_v5  ;;  %v2285_v45 = vmul.f32 %v2277_v27, %v2277_v27 }
 0x158   :  { %1505 = vadd.xlane.f32.xlu1 %v3435_v63  ;;  %v3443_v30 = vpop.eup %3442  ;;  %v4714_v47 = vstv %s2734_s4  ;;  %3458 = vpow2.f32 %v2101_v41  ;;  %v2203_v48 = vmul.f32 1.442695, %v2194_v42  ;;  %v213_v63 = vld [vmem:[%s5181_s3 + $0x2] sm:$0x1]  ;;  %vm2542_vm6 = vcmask 1043459  }
 0x159   :  { %1503 = vadd.xlane.f32.xlu0 %v3437_v1  ;;  %v3445_v38 = vpop.eup %3444  ;;  %v2296_v49 = vmul.f32 %v4714_v47, %v2286_v43  ;;  %3460 = vpow2.f32 %v2099_v36  ;;  %v2201_v52 = vmul.f32 1.442695, %v2193_v44  ;;  %v2295_v54 = vmul.f32 %v4714_v47, %v2285_v45  ;;  %v214_v1 = vld [vmem:[%s5181_s3 + $0x3] sm:$0x1] }
 0x15a   :  { %v3447_v8 = vpop.eup %3446  ;;  %3462 = vpow2.f32 %v2203_v48  ;;  %vm1193_vm7 = vcmp.gt.f32.partialorder %v213_v63, 0.0  ;;  %vm1194_vm8 = vcmp.gt.f32.partialorder %v214_v1, 0.0 }
 0x15b   :  { %v3449_v32 = vpop.eup %3448  ;;  %v2305_v56 = vmul.f32 1.442695, %v2296_v49  ;;  %3464 = vpow2.f32 %v2201_v52  ;;  %v2303_v57 = vmul.f32 1.442695, %v2295_v54  ;;  %v1201_v6 = vsel %vm1193_vm7, 1, %v3880_v60 }
 0x15c   :  { %1607 = vadd.xlane.f32.xlu1 %v3439_v16  ;;  %v1202_v12 = vsel %vm1194_vm8, 1, %v3880_v60  ;;  %v1218_v14 = vrot.slane %v1201_v6, %v4574_v23  ;;  %vm2544_vm7 = vcmask 1044484   ;;  %vm2546_vm8 = vcmask 1045509  }
 0x15d   :  { %1605 = vadd.xlane.f32.xlu0 %v3441_v3  ;;  %v3451_v51 = vpop.eup %3450  ;;  %3466 = vpow2.f32 %v2305_v56  ;;  %v1222_v15 = vrot.slane %v1202_v12, %v4574_v23 }
 0x15e   :  { %v3453_v55 = vpop.eup %3452  ;;  %3468 = vpow2.f32 %v2303_v57  ;;  %vm1241_vm9 = vcmp.eq.s32.totalorder %v1218_v14, 1 }
 0x15f   :  { %vm1242_vm10 = vcmp.eq.s32.totalorder %v1222_v15, 1 }
 0x160   :  { %1709 = vadd.xlane.f32.xlu1 %v3443_v30  ;;  %v3455_v58 = vpop.eup %3454 }
 0x161   :  { %1707 = vadd.xlane.f32.xlu0 %v3445_v38  ;;  %v3457_v62 = vpop.eup %3456 }
 0x162   :  { %v3459_v2 = vpop.eup %3458 }
 0x163   :  { %v3461_v4 = vpop.eup %3460 }
 0x164   :  { %1811 = vadd.xlane.f32.xlu1 %v3447_v8  ;;  %v3463_v7 = vpop.eup %3462 }
 0x165   :  { %1809 = vadd.xlane.f32.xlu0 %v3449_v32  ;;  %v3465_v13 = vpop.eup %3464 }
 0x167   :  { %v3467_v16 = vpop.eup %3466 }
 0x168   :  { %1913 = vadd.xlane.f32.xlu1 %v3451_v51  ;;  %v3469_v3 = vpop.eup %3468 }
 0x169   :  { %1911 = vadd.xlane.f32.xlu0 %v3453_v55 }
 0x16c   :  { %2015 = vadd.xlane.f32.xlu1 %v3455_v58 }
 0x16d   :  { %2013 = vadd.xlane.f32.xlu0 %v3457_v62 }
 0x170   :  { %2117 = vadd.xlane.f32.xlu1 %v3459_v2 }
 0x171   :  { %2115 = vadd.xlane.f32.xlu0 %v3461_v4 }
 0x174   :  { %2219 = vadd.xlane.f32.xlu1 %v3463_v7 }
 0x175   :  { %2217 = vadd.xlane.f32.xlu0 %v3465_v13 }
 0x178   :  { %2321 = vadd.xlane.f32.xlu1 %v3467_v16 }
 0x179   :  { %2319 = vadd.xlane.f32.xlu0 %v3469_v3 }
 0x17b   :  { %v582_v20 = vpop.f32.mrb[2].mxu0 }
 0x17c   :  { %v4728_v21 = vsel %vm1241_vm9, %v582_v20, -10000.0  ;;  %v2984_v22 = vpop.f32.mrb[3].mxu0  ;;  %v703_v5 = vpop.f32.mrb[2].mxu1  ;;  %vm2548_vm9 = vcmask 1046534  }
 0x17d   :  { %v4730_v24 = vsel %vm1242_vm10, %v703_v5, -10000.0  ;;  %v3019_v25 = vpop.f32.mrb[3].mxu1  ;;  %v1361_v26 = vsub.f32 %v4728_v21, %v4580_v28  ;;  %v1259_v27 = vsub.f32 %v4728_v21, %v4582_v29  ;;  %v1463_v42 = vsub.f32 %v4728_v21, %v4584_v31 }
 0x17e   :  { %v1362_v30 = vsub.f32 %v4730_v24, %v4580_v28  ;;  %v1260_v38 = vsub.f32 %v4730_v24, %v4582_v29  ;;  %v1464_v41 = vsub.f32 %v4730_v24, %v4584_v31  ;;  %v1565_v49 = vsub.f32 %v4728_v21, %v4610_v46 }
 0x17f   :  { %v1369_v43 = vmul.f32 %v1361_v26, %v1361_v26  ;;  %v1267_v36 = vmul.f32 %v1259_v27, %v1259_v27  ;;  %v1471_v54 = vmul.f32 %v1463_v42, %v1463_v42  ;;  %v1667_v55 = vsub.f32 %v4728_v21, %v4624_v61 }
 0x180   :  { %v1370_v44 = vmul.f32 %v1362_v30, %v1362_v30  ;;  %v1268_v45 = vmul.f32 %v1260_v38, %v1260_v38  ;;  %v1472_v48 = vmul.f32 %v1464_v41, %v1464_v41  ;;  %v1573_v1 = vmul.f32 %v1565_v49, %v1565_v49 }
 0x181   :  { %v1379_v8 = vmul.f32 %v4592_v35, %v1369_v43  ;;  %v1277_v32 = vmul.f32 %v4600_v40, %v1267_v36  ;;  %v1566_v2 = vsub.f32 %v4730_v24, %v4610_v46  ;;  %v1481_v4 = vmul.f32 %v4621_v59, %v1471_v54 }
 0x182   :  { %v1380_v51 = vmul.f32 %v4592_v35, %v1370_v44  ;;  %v1278_v52 = vmul.f32 %v4600_v40, %v1268_v45  ;;  %v1482_v63 = vmul.f32 %v4621_v59, %v1472_v48  ;;  %v1675_v6 = vmul.f32 %v1667_v55, %v1667_v55 }
 0x183   :  { %v1389_v56 = vmul.f32 1.442695, %v1379_v8  ;;  %v1287_v57 = vmul.f32 1.442695, %v1277_v32  ;;  %v1769_v7 = vsub.f32 %v4728_v21, %v4634_v10  ;;  %v1583_v13 = vmul.f32 %v4632_v9, %v1573_v1 }
 0x184   :  { %v1391_v58 = vmul.f32 1.442695, %v1380_v51  ;;  %v1289_v62 = vmul.f32 1.442695, %v1278_v52  ;;  %v1493_v12 = vmul.f32 1.442695, %v1482_v63  ;;  %v1574_v14 = vmul.f32 %v1566_v2, %v1566_v2 }
 0x185   :  { %3470 = vpow2.f32 %v1389_v56  ;;  %v1668_v15 = vsub.f32 %v4730_v24, %v4624_v61  ;;  %v1491_v16 = vmul.f32 1.442695, %v1481_v4  ;;  %v1685_v3 = vmul.f32 %v4644_v19, %v1675_v6 }
 0x186   :  { %3472 = vpow2.f32 %v1287_v57  ;;  %v1777_v20 = vmul.f32 %v1769_v7, %v1769_v7  ;;  %v1871_v22 = vsub.f32 %v4728_v21, %v4636_v11  ;;  %v1770_v5 = vsub.f32 %v4730_v24, %v4634_v10 }
 0x187   :  { %3474 = vpow2.f32 %v1391_v58  ;;  %v1973_v25 = vsub.f32 %v4728_v21, %v4658_v34  ;;  %v1593_v26 = vmul.f32 1.442695, %v1583_v13  ;;  %v1584_v27 = vmul.f32 %v4632_v9, %v1574_v14 }
 0x188   :  { %3476 = vpow2.f32 %v1289_v62  ;;  %v1676_v30 = vmul.f32 %v1668_v15, %v1668_v15  ;;  %v1695_v38 = vmul.f32 1.442695, %v1685_v3  ;;  %v1787_v41 = vmul.f32 %v4656_v33, %v1777_v20 }
 0x189   :  { %3478 = vpow2.f32 %v1493_v12  ;;  %v1879_v42 = vmul.f32 %v1871_v22, %v1871_v22  ;;  %v1778_v44 = vmul.f32 %v1770_v5, %v1770_v5  ;;  %v1981_v45 = vmul.f32 %v1973_v25, %v1973_v25 }
 0x18a   :  { %3480 = vpow2.f32 %v1491_v16  ;;  %v1595_v32 = vmul.f32 1.442695, %v1584_v27  ;;  %v1686_v48 = vmul.f32 %v4644_v19, %v1676_v30  ;;  %v1872_v49 = vsub.f32 %v4730_v24, %v4636_v11 }
 0x18b   :  { %3482 = vpow2.f32 %v1593_v26  ;;  %v1797_v52 = vmul.f32 1.442695, %v1787_v41  ;;  %v1889_v54 = vmul.f32 %v4662_v39, %v1879_v42  ;;  %v2075_v55 = vsub.f32 %v4728_v21, %v4671_v50 }
 0x18c   :  { %3484 = vpow2.f32 %v1695_v38  ;;  %v1788_v56 = vmul.f32 %v4656_v33, %v1778_v44  ;;  %v1991_v57 = vmul.f32 %v4687_v0, %v1981_v45  ;;  %v1697_v58 = vmul.f32 1.442695, %v1686_v48 }
 0x18d   :  { %3486 = vpow2.f32 %v1595_v32  ;;  %v1880_v62 = vmul.f32 %v1872_v49, %v1872_v49  ;;  %v1974_v63 = vsub.f32 %v4730_v24, %v4658_v34  ;;  %v1899_v1 = vmul.f32 1.442695, %v1889_v54 }
 0x18e   :  { %3488 = vpow2.f32 %v1797_v52  ;;  %v2083_v2 = vmul.f32 %v2075_v55, %v2075_v55  ;;  %v2177_v4 = vsub.f32 %v4728_v21, %v4680_v53  ;;  %v1799_v12 = vmul.f32 1.442695, %v1788_v56 }
 0x18f   :  { %v3471_v43 = vpop.eup %3470  ;;  %v2076_v13 = vsub.f32 %v4730_v24, %v4671_v50  ;;  %3490 = vpow2.f32 %v1697_v58  ;;  %v2001_v14 = vmul.f32 1.442695, %v1991_v57  ;;  %v1890_v15 = vmul.f32 %v4662_v39, %v1880_v62 }
 0x190   :  { %v3473_v36 = vpop.eup %3472  ;;  %1405 = vadd.xlane.f32.xlu1 %v3471_v43  ;;  %v1982_v16 = vmul.f32 %v1974_v63, %v1974_v63  ;;  %3492 = vpow2.f32 %v1899_v1  ;;  %v2093_v3 = vmul.f32 %v4698_v17, %v2083_v2  ;;  %v2185_v20 = vmul.f32 %v2177_v4, %v2177_v4  ;;  %v215_v4 = vld [vmem:[%s5181_s3 + $0x4] sm:$0x1] }
 0x191   :  { %v3475_v8 = vpop.eup %3474  ;;  %1303 = vadd.xlane.f32.xlu0 %v3473_v36  ;;  %v2279_v22 = vsub.f32 %v4728_v21, %v4701_v18  ;;  %v2084_v26 = vmul.f32 %v2076_v13, %v2076_v13  ;;  %3494 = vpow2.f32 %v1799_v12  ;;  %v1901_v27 = vmul.f32 1.442695, %v1890_v15 }
 0x192   :  { %v3477_v51 = vpop.eup %3476  ;;  %v1992_v30 = vmul.f32 %v4687_v0, %v1982_v16  ;;  %v2178_v38 = vsub.f32 %v4730_v24, %v4680_v53  ;;  %3496 = vpow2.f32 %v2001_v14  ;;  %v2103_v41 = vmul.f32 1.442695, %v2093_v3 }
 0x193   :  { %v3479_v6 = vpop.eup %3478  ;;  %v2195_v42 = vmul.f32 %v4710_v37, %v2185_v20  ;;  %v2287_v43 = vmul.f32 %v2279_v22, %v2279_v22  ;;  %v2094_v21 = vmul.f32 %v4698_v17, %v2084_v26  ;;  %3498 = vpow2.f32 %v1901_v27 }
 0x194   :  { %1407 = vadd.xlane.f32.xlu1 %v3475_v8  ;;  %v3481_v7 = vpop.eup %3480  ;;  %v2003_v45 = vmul.f32 1.442695, %v1992_v30  ;;  %v2186_v8 = vmul.f32 %v2178_v38, %v2178_v38  ;;  %v2280_v32 = vsub.f32 %v4730_v24, %v4701_v18  ;;  %3500 = vpow2.f32 %v2103_v41 }
 0x195   :  { %1305 = vadd.xlane.f32.xlu0 %v3477_v51  ;;  %v3483_v5 = vpop.eup %3482  ;;  %v2205_v48 = vmul.f32 1.442695, %v2195_v42  ;;  %v2297_v49 = vmul.f32 %v4714_v47, %v2287_v43  ;;  %v2105_v54 = vmul.f32 1.442695, %v2094_v21  ;;  %vm1195_vm11 = vcmp.gt.f32.partialorder %v215_v4, 0.0 }
 0x196   :  { %v3485_v25 = vpop.eup %3484  ;;  %3502 = vpow2.f32 %v2003_v45  ;;  %v2196_v55 = vmul.f32 %v4710_v37, %v2186_v8  ;;  %v2288_v56 = vmul.f32 %v2280_v32, %v2280_v32  ;;  %v1203_v14 = vsel %vm1195_vm11, 1, %v3880_v60 }
 0x197   :  { %v3487_v36 = vpop.eup %3486  ;;  %3504 = vpow2.f32 %v2205_v48  ;;  %v2307_v57 = vmul.f32 1.442695, %v2297_v49  ;;  %v1226_v20 = vrot.slane %v1203_v14, %v4574_v23  ;;  %vm2550_vm10 = vcmask 1047559  }
 0x198   :  { %1509 = vadd.xlane.f32.xlu1 %v3479_v6  ;;  %v3489_v44 = vpop.eup %3488  ;;  %3506 = vpow2.f32 %v2105_v54  ;;  %v2207_v24 = vmul.f32 1.442695, %v2196_v55  ;;  %v2298_v63 = vmul.f32 %v4714_v47, %v2288_v56 }
 0x199   :  { %1507 = vadd.xlane.f32.xlu0 %v3481_v7  ;;  %v3491_v51 = vpop.eup %3490  ;;  %3508 = vpow2.f32 %v2307_v57  ;;  %v216_v7 = vld [vmem:[%s5181_s3 + $0x5] sm:$0x1]  ;;  %vm1243_vm13 = vcmp.eq.s32.totalorder %v1226_v20, 1 }
 0x19a   :  { %v3493_v52 = vpop.eup %3492  ;;  %3510 = vpow2.f32 %v2207_v24  ;;  %v2309_v6 = vmul.f32 1.442695, %v2298_v63  ;;  %vm1196_vm12 = vcmp.gt.f32.partialorder %v216_v7, 0.0 }
 0x19b   :  { %v3495_v58 = vpop.eup %3494  ;;  %v1204_v16 = vsel %vm1196_vm12, 1, %v3880_v60 }
 0x19c   :  { %1609 = vadd.xlane.f32.xlu1 %v3483_v5  ;;  %v3497_v62 = vpop.eup %3496  ;;  %3512 = vpow2.f32 %v2309_v6  ;;  %v1230_v22 = vrot.slane %v1204_v16, %v4574_v23 }
 0x19d   :  { %1711 = vadd.xlane.f32.xlu0 %v3485_v25  ;;  %v3499_v1 = vpop.eup %3498 }
 0x19e   :  { %v3501_v2 = vpop.eup %3500  ;;  %vm1244_vm14 = vcmp.eq.s32.totalorder %v1230_v22, 1 }
 0x1a0   :  { %1611 = vadd.xlane.f32.xlu1 %v3487_v36  ;;  %v3503_v12 = vpop.eup %3502 }
 0x1a1   :  { %1813 = vadd.xlane.f32.xlu0 %v3489_v44  ;;  %v3505_v13 = vpop.eup %3504 }
 0x1a2   :  { %v3507_v15 = vpop.eup %3506 }
 0x1a3   :  { %v3509_v3 = vpop.eup %3508 }
 0x1a4   :  { %1713 = vadd.xlane.f32.xlu1 %v3491_v51  ;;  %v3511_v5 = vpop.eup %3510 }
 0x1a5   :  { %1915 = vadd.xlane.f32.xlu0 %v3493_v52 }
 0x1a6   :  { %v3513_v25 = vpop.eup %3512 }
 0x1a8   :  { %1815 = vadd.xlane.f32.xlu1 %v3495_v58 }
 0x1a9   :  { %2017 = vadd.xlane.f32.xlu0 %v3497_v62 }
 0x1ac   :  { %1917 = vadd.xlane.f32.xlu1 %v3499_v1 }
 0x1ad   :  { %2119 = vadd.xlane.f32.xlu0 %v3501_v2 }
 0x1b0   :  { %2019 = vadd.xlane.f32.xlu1 %v3503_v12 }
 0x1b1   :  { %2221 = vadd.xlane.f32.xlu0 %v3505_v13 }
 0x1b4   :  { %2121 = vadd.xlane.f32.xlu1 %v3507_v15 }
 0x1b5   :  { %2323 = vadd.xlane.f32.xlu0 %v3509_v3 }
 0x1b8   :  { %2223 = vadd.xlane.f32.xlu1 %v3511_v5 }
 0x1bb   :  { %v824_v26 = vpop.f32.mrb[4].mxu0 }
 0x1bc   :  { %v4808_v27 = vsel %vm1243_vm13, %v824_v26, -10000.0  ;;  %2325 = vadd.xlane.f32.xlu1 %v3513_v25  ;;  %v3054_v30 = vpop.f32.mrb[5].mxu0  ;;  %v945_v38 = vpop.f32.mrb[4].mxu1 }
 0x1bd   :  { %v4810_v41 = vsel %vm1244_vm14, %v945_v38, -10000.0  ;;  %v3089_v42 = vpop.f32.mrb[5].mxu1  ;;  %v1363_v43 = vsub.f32 %v4808_v27, %v4580_v28  ;;  %v1261_v36 = vsub.f32 %v4808_v27, %v4582_v29  ;;  %v1567_v44 = vsub.f32 %v4808_v27, %v4610_v46 }
 0x1be   :  { %v1262_v21 = vsub.f32 %v4810_v41, %v4582_v29  ;;  %v1364_v45 = vsub.f32 %v4810_v41, %v4580_v28  ;;  %v1465_v8 = vsub.f32 %v4808_v27, %v4584_v31  ;;  %v1669_v52 = vsub.f32 %v4808_v27, %v4624_v61 }
 0x1bf   :  { %v1371_v32 = vmul.f32 %v1363_v43, %v1363_v43  ;;  %v1269_v48 = vmul.f32 %v1261_v36, %v1261_v36  ;;  %v1575_v56 = vmul.f32 %v1567_v44, %v1567_v44  ;;  %v1466_v57 = vsub.f32 %v4810_v41, %v4584_v31 }
 0x1c0   :  { %v1270_v49 = vmul.f32 %v1262_v21, %v1262_v21  ;;  %v1372_v51 = vmul.f32 %v1364_v45, %v1364_v45  ;;  %v1473_v24 = vmul.f32 %v1465_v8, %v1465_v8  ;;  %v1677_v6 = vmul.f32 %v1669_v52, %v1669_v52 }
 0x1c1   :  { %v1381_v54 = vmul.f32 %v4592_v35, %v1371_v32  ;;  %v1279_v55 = vmul.f32 %v4600_v40, %v1269_v48  ;;  %v1585_v7 = vmul.f32 %v4632_v9, %v1575_v56  ;;  %v1474_v12 = vmul.f32 %v1466_v57, %v1466_v57 }
 0x1c2   :  { %v1280_v58 = vmul.f32 %v4600_v40, %v1270_v49  ;;  %v1382_v62 = vmul.f32 %v4592_v35, %v1372_v51  ;;  %v1771_v13 = vsub.f32 %v4808_v27, %v4634_v10  ;;  %v1483_v14 = vmul.f32 %v4621_v59, %v1473_v24 }
 0x1c3   :  { %v1393_v63 = vmul.f32 1.442695, %v1381_v54  ;;  %v1291_v1 = vmul.f32 1.442695, %v1279_v55  ;;  %v1568_v15 = vsub.f32 %v4810_v41, %v4610_v46  ;;  %v1687_v16 = vmul.f32 %v4644_v19, %v1677_v6 }
 0x1c4   :  { %v1293_v2 = vmul.f32 1.442695, %v1280_v58  ;;  %v1395_v4 = vmul.f32 1.442695, %v1382_v62  ;;  %v1597_v3 = vmul.f32 1.442695, %v1585_v7  ;;  %v1484_v20 = vmul.f32 %v4621_v59, %v1474_v12 }
 0x1c5   :  { %3514 = vpow2.f32 %v1393_v63  ;;  %v1779_v22 = vmul.f32 %v1771_v13, %v1771_v13  ;;  %v1873_v5 = vsub.f32 %v4808_v27, %v4636_v11  ;;  %v1495_v25 = vmul.f32 1.442695, %v1483_v14 }
 0x1c6   :  { %3516 = vpow2.f32 %v1291_v1  ;;  %v1576_v26 = vmul.f32 %v1568_v15, %v1568_v15  ;;  %v1670_v30 = vsub.f32 %v4810_v41, %v4624_v61  ;;  %v1699_v38 = vmul.f32 1.442695, %v1687_v16 }
 0x1c7   :  { %3518 = vpow2.f32 %v1293_v2  ;;  %v1975_v42 = vsub.f32 %v4808_v27, %v4658_v34  ;;  %v1497_v43 = vmul.f32 1.442695, %v1484_v20  ;;  %v1789_v36 = vmul.f32 %v4656_v33, %v1779_v22 }
 0x1c8   :  { %3520 = vpow2.f32 %v1395_v4  ;;  %v1881_v44 = vmul.f32 %v1873_v5, %v1873_v5  ;;  %v1586_v21 = vmul.f32 %v4632_v9, %v1576_v26  ;;  %v1678_v45 = vmul.f32 %v1670_v30, %v1670_v30 }
 0x1c9   :  { %3522 = vpow2.f32 %v1597_v3  ;;  %v1772_v8 = vsub.f32 %v4810_v41, %v4634_v10  ;;  %v2077_v48 = vsub.f32 %v4808_v27, %v4671_v50  ;;  %v1983_v51 = vmul.f32 %v1975_v42, %v1975_v42 }
 0x1ca   :  { %3524 = vpow2.f32 %v1495_v25  ;;  %v1874_v52 = vsub.f32 %v4810_v41, %v4636_v11  ;;  %v1801_v55 = vmul.f32 1.442695, %v1789_v36  ;;  %v1891_v56 = vmul.f32 %v4662_v39, %v1881_v44 }
 0x1cb   :  { %3526 = vpow2.f32 %v1699_v38  ;;  %v2179_v57 = vsub.f32 %v4808_v27, %v4680_v53  ;;  %v1599_v62 = vmul.f32 1.442695, %v1586_v21  ;;  %v1688_v24 = vmul.f32 %v4644_v19, %v1678_v45 }
 0x1cc   :  { %3528 = vpow2.f32 %v1497_v43  ;;  %v1780_v63 = vmul.f32 %v1772_v8, %v1772_v8  ;;  %v2085_v1 = vmul.f32 %v2077_v48, %v2077_v48  ;;  %v1882_v2 = vmul.f32 %v1874_v52, %v1874_v52 }
 0x1cd   :  { %3530 = vpow2.f32 %v1801_v55  ;;  %v1903_v4 = vmul.f32 1.442695, %v1891_v56  ;;  %v1993_v6 = vmul.f32 %v4687_v0, %v1983_v51  ;;  %v2187_v7 = vmul.f32 %v2179_v57, %v2179_v57 }
 0x1ce   :  { %3532 = vpow2.f32 %v1599_v62  ;;  %v1701_v12 = vmul.f32 1.442695, %v1688_v24  ;;  %v1790_v13 = vmul.f32 %v4656_v33, %v1780_v63  ;;  %v1976_v14 = vsub.f32 %v4810_v41, %v4658_v34 }
 0x1cf   :  { %v3515_v32 = vpop.eup %3514  ;;  %v2095_v16 = vmul.f32 %v4698_v17, %v2085_v1  ;;  %v2281_v3 = vsub.f32 %v4808_v27, %v4701_v18  ;;  %v1892_v22 = vmul.f32 %v4662_v39, %v1882_v2  ;;  %3534 = vpow2.f32 %v1903_v4 }
 0x1d0   :  { %v3517_v49 = vpop.eup %3516  ;;  %1409 = vadd.xlane.f32.xlu1 %v3515_v32  ;;  %v2005_v5 = vmul.f32 1.442695, %v1993_v6  ;;  %v2197_v25 = vmul.f32 %v4710_v37, %v2187_v7  ;;  %v2078_v26 = vsub.f32 %v4810_v41, %v4671_v50  ;;  %3536 = vpow2.f32 %v1701_v12 }
 0x1d1   :  { %v3519_v54 = vpop.eup %3518  ;;  %1307 = vadd.xlane.f32.xlu0 %v3517_v49  ;;  %v1803_v30 = vmul.f32 1.442695, %v1790_v13  ;;  %v1984_v38 = vmul.f32 %v1976_v14, %v1976_v14  ;;  %v2107_v43 = vmul.f32 1.442695, %v2095_v16  ;;  %v2289_v36 = vmul.f32 %v2281_v3, %v2281_v3 }
 0x1d2   :  { %v3521_v58 = vpop.eup %3520  ;;  %v2282_v27 = vsub.f32 %v4810_v41, %v4701_v18  ;;  %v1905_v21 = vmul.f32 1.442695, %v1892_v22  ;;  %3538 = vpow2.f32 %v2005_v5  ;;  %v2209_v8 = vmul.f32 1.442695, %v2197_v25 }
 0x1d3   :  { %v3523_v15 = vpop.eup %3522  ;;  %v2086_v32 = vmul.f32 %v2078_v26, %v2078_v26  ;;  %3540 = vpow2.f32 %v1803_v30  ;;  %v1994_v51 = vmul.f32 %v4687_v0, %v1984_v38  ;;  %v2180_v52 = vsub.f32 %v4810_v41, %v4680_v53 }
 0x1d4   :  { %1309 = vadd.xlane.f32.xlu1 %v3519_v54  ;;  %v3525_v20 = vpop.eup %3524  ;;  %3542 = vpow2.f32 %v2107_v43  ;;  %v2299_v56 = vmul.f32 %v4714_v47, %v2289_v36  ;;  %v2290_v57 = vmul.f32 %v2282_v27, %v2282_v27 }
 0x1d5   :  { %1411 = vadd.xlane.f32.xlu0 %v3521_v58  ;;  %v3527_v42 = vpop.eup %3526  ;;  %3544 = vpow2.f32 %v1905_v21  ;;  %v2096_v24 = vmul.f32 %v4698_v17, %v2086_v32  ;;  %v2007_v2 = vmul.f32 1.442695, %v1994_v51  ;;  %v2188_v4 = vmul.f32 %v2180_v52, %v2180_v52  ;;  %v218_v32 = vld [vmem:[%s5181_s3 + $0x7] sm:$0x1] }
 0x1d6   :  { %v3529_v44 = vpop.eup %3528  ;;  %3546 = vpow2.f32 %v2209_v8  ;;  %v2311_v7 = vmul.f32 1.442695, %v2299_v56  ;;  %v2300_v12 = vmul.f32 %v4714_v47, %v2290_v57  ;;  %v217_v8 = vld [vmem:[%s5181_s3 + $0x6] sm:$0x1]  ;;  %v4901_v52 = vstv %s4877_s6  ;;  %s4908_s3 = sld [smem:[#allocation8 + $0x9]] }
 0x1d7   :  { %v3531_v54 = vpop.eup %3530  ;;  %v2109_v3 = vmul.f32 1.442695, %v2096_v24  ;;  %vm1197_vm15 = vcmp.gt.f32.partialorder %v217_v8, 0.0  ;;  %vm1198_vm0 = vcmp.gt.f32.partialorder %v218_v32, 0.0 }
 0x1d8   :  { %1613 = vadd.xlane.f32.xlu1 %v3523_v15  ;;  %v3533_v58 = vpop.eup %3532  ;;  %v2313_v25 = vmul.f32 1.442695, %v2300_v12 }
 0x1d9   :  { %1511 = vadd.xlane.f32.xlu0 %v3525_v20  ;;  %v3535_v41 = vpop.eup %3534  ;;  %v2198_v20 = vmul.f32 %v4710_v37, %v2188_v4 }
 0x1da   :  { %v3537_v13 = vpop.eup %3536 }
 0x1db   :  { %v2211_v27 = vmul.f32 1.442695, %v2198_v20  ;;  %v1205_v20 = vsel %vm1197_vm15, 1, %v3880_v60 }
 0x1dc   :  { %1715 = vadd.xlane.f32.xlu1 %v3527_v42  ;;  %v3539_v22 = vpop.eup %3538 }
 0x1dd   :  { %1513 = vadd.xlane.f32.xlu0 %v3529_v44  ;;  %v1402_v45 = vpop.xlane.xlu1 %1401  ;;  %v3541_v26 = vpop.eup %3540 }
 0x1de   :  { %v1418_v48 = vmax.f32 %v1402_v45, 1e-10  ;;  %v1300_v49 = vpop.xlane.xlu0 %1299  ;;  %v3543_v30 = vpop.eup %3542 }
 0x1df   :  { %v1316_v55 = vmax.f32 %v1300_v49, 1e-10  ;;  %v3545_v42 = vpop.eup %3544 }
 0x1e0   :  { %1817 = vadd.xlane.f32.xlu1 %v3531_v54  ;;  %3548 = vlog2.f32 %v1418_v48  ;;  %v3547_v44 = vpop.eup %3546  ;;  %v4904_v54 = vstv %s4879_s20 }
 0x1e1   :  { %1615 = vadd.xlane.f32.xlu0 %v3533_v58  ;;  %v1404_v62 = vpop.xlane.xlu1 %1403  ;;  %3550 = vlog2.f32 %v1316_v55 }
 0x1e2   :  { %v1419_v63 = vmax.f32 %v1404_v62, 1e-10  ;;  %v1302_v1 = vpop.xlane.xlu0 %1301 }
 0x1e3   :  { %v1317_v6 = vmax.f32 %v1302_v1, 1e-10 }
 0x1e4   :  { %3552 = vlog2.f32 %v1419_v63  ;;  %1919 = vadd.xlane.f32.xlu1 %v3535_v41 }
 0x1e5   :  { %3554 = vlog2.f32 %v1317_v6  ;;  %1717 = vadd.xlane.f32.xlu0 %v3537_v13  ;;  %v1506_v14 = vpop.xlane.xlu1 %1505  ;;  %v4912_v6 = vstv %s4882_s21 }
 0x1e6   :  { %v1521_v15 = vmax.f32 %v1506_v14, 1e-10  ;;  %v1504_v16 = vpop.xlane.xlu0 %1503  ;;  %3556 = vpow2.f32 %v2007_v2 }
 0x1e7   :  { %v1520_v5 = vmax.f32 %v1504_v16, 1e-10  ;;  %3558 = vpow2.f32 %v2311_v7  ;;  %v4915_v7 = vstv %s4884_s22 }
 0x1e8   :  { %3560 = vlog2.f32 %v1521_v15  ;;  %2021 = vadd.xlane.f32.xlu1 %v3539_v22  ;;  %v4919_v15 = vstv %s4886_s23 }
 0x1e9   :  { %3562 = vlog2.f32 %v1520_v5  ;;  %1819 = vadd.xlane.f32.xlu0 %v3541_v26  ;;  %v1608_v38 = vpop.xlane.xlu1 %1607 }
 0x1ea   :  { %v1623_v43 = vmax.f32 %v1608_v38, 1e-10  ;;  %v1606_v36 = vpop.xlane.xlu0 %1605  ;;  %3564 = vpow2.f32 %v2109_v3  ;;  %v3549_v45 = vpop.eup %3548 }
 0x1eb   :  { %v1622_v21 = vmax.f32 %v1606_v36, 1e-10  ;;  %3566 = vpow2.f32 %v2313_v25  ;;  %v3551_v48 = vpop.eup %3550  ;;  %v1427_v63 = vmul.f32 0.6931472, %v3549_v45  ;;  %v4926_v25 = vstv %s4888_s24 }
 0x1ec   :  { %3568 = vlog2.f32 %v1623_v43  ;;  %2123 = vadd.xlane.f32.xlu1 %v3543_v30  ;;  %v1325_v1 = vmul.f32 0.6931472, %v3551_v48  ;;  %v1206_v30 = vsel %vm1198_vm0, 1, %v3880_v60  ;;  %v1234_v60 = vrot.slane %v1205_v20, %v4574_v23 }
 0x1ed   :  { %3570 = vlog2.f32 %v1622_v21  ;;  %1921 = vadd.xlane.f32.xlu0 %v3545_v42  ;;  %v1710_v49 = vpop.xlane.xlu1 %1709  ;;  %v1443_v42 = vmul.f32 %v4901_v52, %v1427_v63  ;;  %v4936_v48 = vstv %s4896_s29 }
 0x1ee   :  { %v3553_v51 = vpop.eup %3552  ;;  %v1725_v55 = vmax.f32 %v1710_v49, 1e-10  ;;  %v1708_v56 = vpop.xlane.xlu0 %1707  ;;  %3572 = vpow2.f32 %v2211_v27  ;;  %v1341_v43 = vmul.f32 %v4904_v54, %v1325_v1  ;;  %vm4949_vm1 = vcmp.eq.s32.totalorder %v1234_v60, 1 }
 0x1ef   :  { %v3555_v57 = vpop.eup %3554  ;;  %v1429_v58 = vmul.f32 0.6931472, %v3553_v51  ;;  %v1724_v62 = vmax.f32 %v1708_v56, 1e-10 }
 0x1f0   :  { %v3557_v24 = vpop.eup %3556  ;;  %v1327_v2 = vmul.f32 0.6931472, %v3555_v57  ;;  %3574 = vlog2.f32 %v1725_v55  ;;  %2225 = vadd.xlane.f32.xlu1 %v3547_v44  ;;  %v1238_v55 = vrot.slane %v1206_v30, %v4574_v23  ;;  %v1451_v1 = vadd.f32 %v1443_v42, %v1341_v43 }
 0x1f1   :  { %v3559_v4 = vpop.eup %3558  ;;  %v1444_v41 = vmul.f32 %v4901_v52, %v1429_v58  ;;  %3576 = vlog2.f32 %v1724_v62  ;;  %2023 = vadd.xlane.f32.xlu0 %v3557_v24  ;;  %v1812_v12 = vpop.xlane.xlu1 %1811  ;;  %v4940_v62 = vstv %s4898_s30  ;;  %v4943_v24 = vstv %s4906_s9 }
 0x1f2   :  { %v3561_v13 = vpop.eup %3560  ;;  %v1342_v14 = vmul.f32 %v4904_v54, %v1327_v2  ;;  %v1827_v16 = vmax.f32 %v1812_v12, 1e-10  ;;  %v1810_v3 = vpop.xlane.xlu0 %1809  ;;  %vm4954_vm2 = vcmp.eq.s32.totalorder %v1238_v55, 1 }
 0x1f3   :  { %v3563_v22 = vpop.eup %3562  ;;  %v1531_v5 = vmul.f32 0.6931472, %v3561_v13  ;;  %v1826_v26 = vmax.f32 %v1810_v3, 1e-10 }
 0x1f4   :  { %v3565_v38 = vpop.eup %3564  ;;  %v1529_v36 = vmul.f32 0.6931472, %v3563_v22  ;;  %3578 = vlog2.f32 %v1827_v16  ;;  %2327 = vadd.xlane.f32.xlu1 %v3559_v4  ;;  %v1452_v44 = vadd.f32 %v1444_v41, %v1342_v14  ;;  %v4946_v4 = vstv %s4908_s3 }
 0x1f5   :  { %v3567_v27 = vpop.eup %3566  ;;  %v1546_v21 = vmul.f32 %v4912_v6, %v1531_v5  ;;  %3580 = vlog2.f32 %v1826_v26  ;;  %2125 = vadd.xlane.f32.xlu0 %v3565_v38  ;;  %v1914_v45 = vpop.xlane.xlu1 %1913 }
 0x1f6   :  { %v3569_v8 = vpop.eup %3568  ;;  %v1545_v32 = vmul.f32 %v4912_v6, %v1529_v36  ;;  %v1929_v49 = vmax.f32 %v1914_v45, 1e-10  ;;  %v1912_v51 = vpop.xlane.xlu0 %1911  ;;  %v4959_v36 = vstv %s4923_s10 }
 0x1f7   :  { %v3571_v56 = vpop.eup %3570  ;;  %v1633_v57 = vmul.f32 0.6931472, %v3569_v8  ;;  %v1928_v58 = vmax.f32 %v1912_v51, 1e-10  ;;  %v1554_v41 = vadd.f32 %v1546_v21, %v1452_v44 }
 0x1f8   :  { %v3573_v63 = vpop.eup %3572  ;;  %v1631_v2 = vmul.f32 0.6931472, %v3571_v56  ;;  %3582 = vlog2.f32 %v1929_v49  ;;  %2329 = vadd.xlane.f32.xlu1 %v3567_v27  ;;  %v1553_v16 = vadd.f32 %v1545_v32, %v1451_v1 }
 0x1f9   :  { %v1648_v12 = vmul.f32 %v4915_v7, %v1633_v57  ;;  %3584 = vlog2.f32 %v1928_v58  ;;  %2227 = vadd.xlane.f32.xlu0 %v3573_v63  ;;  %v2016_v23 = vpop.xlane.xlu1 %2015 }
 0x1fa   :  { %v3575_v14 = vpop.eup %3574  ;;  %v1647_v3 = vmul.f32 %v4915_v7, %v1631_v2  ;;  %v2031_v20 = vmax.f32 %v2016_v23, 1e-10  ;;  %v2014_v22 = vpop.xlane.xlu0 %2013 }
 0x1fb   :  { %v3577_v26 = vpop.eup %3576  ;;  %v1656_v30 = vadd.f32 %v1648_v12, %v1554_v41  ;;  %v1735_v38 = vmul.f32 0.6931472, %v3575_v14  ;;  %v2030_v42 = vmax.f32 %v2014_v22, 1e-10  ;;  %v1066_v43 = vpop.f32.mrb[6].mxu0 }
 0x1fc   :  { %v1655_v27 = vadd.f32 %v1647_v3, %v1553_v16  ;;  %v1733_v44 = vmul.f32 0.6931472, %v3577_v26  ;;  %3586 = vlog2.f32 %v2031_v20  ;;  %v4963_v21 = vsel %vm4949_vm1, %v1066_v43, -10000.0  ;;  %v3124_v45 = vpop.f32.mrb[7].mxu0  ;;  %v1187_v60 = vpop.f32.mrb[6].mxu1 }
 0x1fd   :  { %v1750_v8 = vmul.f32 %v4919_v15, %v1735_v38  ;;  %3588 = vlog2.f32 %v2030_v42  ;;  %v2118_v32 = vpop.xlane.xlu1 %2117  ;;  %v4968_v49 = vsel %vm4954_vm2, %v1187_v60, -10000.0  ;;  %v3159_v51 = vpop.f32.mrb[7].mxu1  ;;  %v1365_v55 = vsub.f32 %v4963_v21, %v4580_v28 }
 0x1fe   :  { %v3579_v56 = vpop.eup %3578  ;;  %v1749_v57 = vmul.f32 %v4919_v15, %v1733_v44  ;;  %v2133_v58 = vmax.f32 %v2118_v32, 1e-10  ;;  %v2116_v63 = vpop.xlane.xlu0 %2115  ;;  %v1263_v1 = vsub.f32 %v4963_v21, %v4582_v29  ;;  %v1366_v2 = vsub.f32 %v4968_v49, %v4580_v28 }
 0x1ff   :  { %v3581_v41 = vpop.eup %3580  ;;  %v1758_v12 = vadd.f32 %v1750_v8, %v1656_v30  ;;  %v1837_v23 = vmul.f32 0.6931472, %v3579_v56  ;;  %v2132_v13 = vmax.f32 %v2116_v63, 1e-10  ;;  %v1373_v14 = vmul.f32 %v1365_v55, %v1365_v55 }
 0x200   :  { %v1757_v16 = vadd.f32 %v1749_v57, %v1655_v27  ;;  %v1835_v3 = vmul.f32 0.6931472, %v3581_v41  ;;  %3590 = vlog2.f32 %v2133_v58  ;;  %v1271_v20 = vmul.f32 %v1263_v1, %v1263_v1 }
 0x201   :  { %v1852_v22 = vmul.f32 %v4926_v25, %v1837_v23  ;;  %3592 = vlog2.f32 %v2132_v13  ;;  %v2220_v5 = vpop.xlane.xlu1 %2219  ;;  %v1383_v26 = vmul.f32 %v4592_v35, %v1373_v14  ;;  %v1374_v38 = vmul.f32 %v1366_v2, %v1366_v2 }
 0x202   :  { %v3583_v42 = vpop.eup %3582  ;;  %v1851_v43 = vmul.f32 %v4926_v25, %v1835_v3  ;;  %v2235_v28 = vmax.f32 %v2220_v5, 1e-10  ;;  %v2218_v44 = vpop.xlane.xlu0 %2217  ;;  %v1281_v30 = vmul.f32 %v4600_v40, %v1271_v20  ;;  %v1264_v27 = vsub.f32 %v4968_v49, %v4582_v29 }
 0x203   :  { %v3585_v45 = vpop.eup %3584  ;;  %v1860_v60 = vadd.f32 %v1852_v22, %v1758_v12  ;;  %v1939_v8 = vmul.f32 0.6931472, %v3583_v42  ;;  %v2234_v32 = vmax.f32 %v2218_v44, 1e-10  ;;  %v1397_v51 = vmul.f32 1.442695, %v1383_v26 }
 0x204   :  { %v1859_v55 = vadd.f32 %v1851_v43, %v1757_v16  ;;  %v1937_v56 = vmul.f32 0.6931472, %v3585_v45  ;;  %3594 = vlog2.f32 %v2235_v28  ;;  %v1295_v57 = vmul.f32 1.442695, %v1281_v30 }
 0x205   :  { %v1954_v58 = vmul.f32 %v4936_v48, %v1939_v8  ;;  %3596 = vlog2.f32 %v2234_v32  ;;  %v2322_v63 = vpop.xlane.xlu1 %2321  ;;  %v1384_v1 = vmul.f32 %v4592_v35, %v1374_v38  ;;  %v1272_v2 = vmul.f32 %v1264_v27, %v1264_v27 }
 0x206   :  { %v3587_v41 = vpop.eup %3586  ;;  %v1953_v23 = vmul.f32 %v4936_v48, %v1937_v56  ;;  %v2337_v29 = vmax.f32 %v2322_v63, 1e-10  ;;  %v2320_v13 = vpop.xlane.xlu0 %2319  ;;  %3598 = vpow2.f32 %v1397_v51  ;;  %v1468_v12 = vsub.f32 %v4968_v49, %v4584_v31 }
 0x207   :  { %v3589_v14 = vpop.eup %3588  ;;  %v1962_v16 = vadd.f32 %v1954_v58, %v1860_v60  ;;  %v2041_v3 = vmul.f32 0.6931472, %v3587_v41  ;;  %v2336_v20 = vmax.f32 %v2320_v13, 1e-10  ;;  %3600 = vpow2.f32 %v1295_v57 }
 0x208   :  { %v1961_v22 = vadd.f32 %v1953_v23, %v1859_v55  ;;  %v2039_v5 = vmul.f32 0.6931472, %v3589_v14  ;;  %3602 = vlog2.f32 %v2337_v29  ;;  %v1399_v26 = vmul.f32 1.442695, %v1384_v1 }
 0x209   :  { %v2056_v35 = vmul.f32 %v4940_v62, %v2041_v3  ;;  %3604 = vlog2.f32 %v2336_v20  ;;  %v1282_v38 = vmul.f32 %v4600_v40, %v1272_v2  ;;  %v1476_v42 = vmul.f32 %v1468_v12, %v1468_v12 }
 0x20a   :  { %v3591_v43 = vpop.eup %3590  ;;  %v2055_v28 = vmul.f32 %v4940_v62, %v2039_v5  ;;  %3606 = vpow2.f32 %v1399_v26  ;;  %v1467_v44 = vsub.f32 %v4963_v21, %v4584_v31  ;;  %v1570_v30 = vsub.f32 %v4968_v49, %v4610_v46 }
 0x20b   :  { %v3593_v27 = vpop.eup %3592  ;;  %v2064_v45 = vadd.f32 %v2056_v35, %v1962_v16  ;;  %v2143_v60 = vmul.f32 0.6931472, %v3591_v43  ;;  %v1297_v8 = vmul.f32 1.442695, %v1282_v38  ;;  %v1486_v32 = vmul.f32 %v4621_v59, %v1476_v42 }
 0x20c   :  { %v2063_v51 = vadd.f32 %v2055_v28, %v1961_v22  ;;  %v2141_v55 = vmul.f32 0.6931472, %v3593_v27  ;;  %v1475_v40 = vmul.f32 %v1467_v44, %v1467_v44  ;;  %v1578_v56 = vmul.f32 %v1570_v30, %v1570_v30 }
 0x20d   :  { %v2158_v57 = vmul.f32 %v4943_v24, %v2143_v60  ;;  %3608 = vpow2.f32 %v1297_v8  ;;  %v1501_v58 = vmul.f32 1.442695, %v1486_v32  ;;  %v1569_v31 = vsub.f32 %v4963_v21, %v4610_v46 }
 0x20e   :  { %v3595_v63 = vpop.eup %3594  ;;  %v2157_v1 = vmul.f32 %v4943_v24, %v2141_v55  ;;  %v1485_v2 = vmul.f32 %v4621_v59, %v1475_v40  ;;  %v1588_v41 = vmul.f32 %v4632_v9, %v1578_v56  ;;  %v1672_v23 = vsub.f32 %v4968_v49, %v4624_v61 }
 0x20f   :  { %v3597_v29 = vpop.eup %3596  ;;  %v2166_v13 = vadd.f32 %v2158_v57, %v2064_v45  ;;  %v2245_v12 = vmul.f32 0.6931472, %v3595_v63  ;;  %3610 = vpow2.f32 %v1501_v58  ;;  %v1577_v14 = vmul.f32 %v1569_v31, %v1569_v31 }
 0x210   :  { %v3599_v16 = vpop.eup %3598  ;;  %v2165_v3 = vadd.f32 %v2157_v1, %v2063_v51  ;;  %v2243_v20 = vmul.f32 0.6931472, %v3597_v29  ;;  %v1499_v46 = vmul.f32 1.442695, %v1485_v2  ;;  %v1603_v22 = vmul.f32 1.442695, %v1588_v41 }
 0x211   :  { %v3601_v5 = vpop.eup %3600  ;;  %v2260_v26 = vmul.f32 %v4946_v4, %v2245_v12  ;;  %1413 = vadd.xlane.f32.xlu1 %v3599_v16  ;;  %v1587_v59 = vmul.f32 %v4632_v9, %v1577_v14  ;;  %v1680_v35 = vmul.f32 %v1672_v23, %v1672_v23  ;;  %v1671_v38 = vsub.f32 %v4963_v21, %v4624_v61  ;;  %v203_v41 = vld [vmem:[%s5180_s2] sm:$0xff] }
 0x212   :  { %v3603_v42 = vpop.eup %3602  ;;  %v2259_v43 = vmul.f32 %v4946_v4, %v2243_v20  ;;  %1311 = vadd.xlane.f32.xlu0 %v3601_v5  ;;  %3612 = vpow2.f32 %v1499_v46  ;;  %v1774_v28 = vsub.f32 %v4968_v49, %v4634_v10  ;;  %v1773_v44 = vsub.f32 %v4963_v21, %v4634_v10  ;;  %v204_v10 = vld [vmem:[%s5180_s2 + $0x8] sm:$0xff] }
 0x213   :  { %v3605_v30 = vpop.eup %3604  ;;  %v2268_v27 = vadd.f32 %v2260_v26, %v2166_v13  ;;  %v2347_v45 = vmul.f32 0.6931472, %v3603_v42  ;;  %3614 = vpow2.f32 %v1603_v22  ;;  %v1601_v9 = vmul.f32 1.442695, %v1587_v59 }
 0x214   :  { %v3607_v60 = vpop.eup %3606  ;;  %v2267_v8 = vadd.f32 %v2259_v43, %v2165_v3  ;;  %v2345_v32 = vmul.f32 0.6931472, %v3605_v30  ;;  %v1690_v61 = vmul.f32 %v4644_v19, %v1680_v35  ;;  %v1679_v51 = vmul.f32 %v1671_v38, %v1671_v38 }
 0x215   :  { %v2362_v55 = vmul.f32 %v4959_v36, %v2347_v45  ;;  %1415 = vadd.xlane.f32.xlu1 %v3607_v60  ;;  %3616 = vpow2.f32 %v1601_v9  ;;  %v1782_v40 = vmul.f32 %v1774_v28, %v1774_v28  ;;  %v1781_v56 = vmul.f32 %v1773_v44, %v1773_v44 }
 0x216   :  { %v2361_v57 = vmul.f32 %v4959_v36, %v2345_v32  ;;  %v1705_v58 = vmul.f32 1.442695, %v1690_v61  ;;  %v1689_v31 = vmul.f32 %v4644_v19, %v1679_v51  ;;  %v1876_v63 = vsub.f32 %v4968_v49, %v4636_v11 }
 0x217   :  { %v3609_v1 = vpop.eup %3608  ;;  %v2370_v2 = vadd.f32 %v2362_v55, %v2268_v27  ;;  %v1792_v23 = vmul.f32 %v4656_v33, %v1782_v40  ;;  %v1791_v29 = vmul.f32 %v4656_v33, %v1781_v56  ;;  %v1875_v13 = vsub.f32 %v4963_v21, %v4636_v11 }
 0x218   :  { %v2369_v12 = vadd.f32 %v2361_v57, %v2267_v8  ;;  %1313 = vadd.xlane.f32.xlu0 %v3609_v1  ;;  %3618 = vpow2.f32 %v1705_v58  ;;  %v1703_v19 = vmul.f32 1.442695, %v1689_v31  ;;  %v1884_v14 = vmul.f32 %v1876_v63, %v1876_v63 }
 0x219   :  { %v3611_v16 = vpop.eup %3610  ;;  %v2378_v3 = vmul.f32 %v2370_v2, %v204_v10  ;;  %v1807_v20 = vmul.f32 1.442695, %v1792_v23  ;;  %v1805_v46 = vmul.f32 1.442695, %v1791_v29  ;;  %v1883_v22 = vmul.f32 %v1875_v13, %v1875_v13 }
 0x21a   :  { %v2377_v5 = vmul.f32 %v2369_v12, %v203_v41  ;;  %1517 = vadd.xlane.f32.xlu1 %v3611_v16  ;;  %3620 = vpow2.f32 %v1703_v19  ;;  %v1894_v26 = vmul.f32 %v4662_v39, %v1884_v14  ;;  %v1978_v33 = vsub.f32 %v4968_v49, %v4658_v34 }
 0x21b   :  { %v2393_v11 = vsel %vm2385_vm3, %v2378_v3, 0.0  ;;  %v1893_v59 = vmul.f32 %v4662_v39, %v1883_v22  ;;  %v1977_v35 = vsub.f32 %v4963_v21, %v4658_v34  ;;  %3622 = vpow2.f32 %v1807_v20 }
 0x21c   :  { %v3613_v38 = vpop.eup %3612  ;;  %v2394_v42 = vrot.slane %v2393_v11, 4  ;;  %v2386_v43 = vsel %vm2385_vm3, %v2377_v5, 0.0  ;;  %v1909_v28 = vmul.f32 1.442695, %v1894_v26  ;;  %v1986_v45 = vmul.f32 %v1978_v33, %v1978_v33 }
 0x21d   :  { %v3615_v44 = vpop.eup %3614  ;;  %v2387_v30 = vrot.slane %v2386_v43, 4  ;;  %1515 = vadd.xlane.f32.xlu0 %v3613_v38  ;;  %v1406_v27 = vpop.xlane.xlu1 %1405  ;;  %v1985_v9 = vmul.f32 %v1977_v35, %v1977_v35  ;;  %3624 = vpow2.f32 %v1805_v46  ;;  %v1907_v39 = vmul.f32 1.442695, %v1893_v59 }
 0x21e   :  { %v2395_v60 = vadd.f32 %v2394_v42, %v2393_v11  ;;  %1619 = vadd.xlane.f32.xlu1 %v3615_v44  ;;  %v1304_v8 = vpop.xlane.xlu0 %1303  ;;  %v2080_v34 = vsub.f32 %v4968_v49, %v4671_v50  ;;  %v1420_v51 = vmax.f32 %v1406_v27, 1e-10  ;;  %v1996_v55 = vmul.f32 %v4687_v0, %v1986_v45 }
 0x21f   :  { %v3617_v32 = vpop.eup %3616  ;;  %v2388_v61 = vadd.f32 %v2387_v30, %v2386_v43  ;;  %3626 = vpow2.f32 %v1909_v28  ;;  %v1995_v56 = vmul.f32 %v4687_v0, %v1985_v9  ;;  %v2079_v63 = vsub.f32 %v4963_v21, %v4671_v50 }
 0x220   :  { %v2396_v40 = vrot.slane %v2395_v60, 2  ;;  %v2088_v10 = vmul.f32 %v2080_v34, %v2080_v34  ;;  %v2011_v31 = vmul.f32 1.442695, %v1996_v55  ;;  %3628 = vpow2.f32 %v1907_v39 }
 0x221   :  { %v2389_v57 = vrot.slane %v2388_v61, 2  ;;  %1617 = vadd.xlane.f32.xlu0 %v3617_v32  ;;  %v1408_v58 = vpop.xlane.xlu1 %1407  ;;  %v2009_v23 = vmul.f32 1.442695, %v1995_v56  ;;  %3630 = vlog2.f32 %v1420_v51  ;;  %v1318_v12 = vmax.f32 %v1304_v8, 1e-10 }
 0x222   :  { %v3619_v1 = vpop.eup %3618  ;;  %v2397_v2 = vadd.f32 %v2396_v40, %v2395_v60  ;;  %v5043_v41 = vpop.xlane.xlu0 %1305  ;;  %v2098_v29 = vmul.f32 %v4698_v17, %v2088_v10  ;;  %v2087_v0 = vmul.f32 %v2079_v63, %v2079_v63  ;;  %3632 = vpow2.f32 %v2011_v31 }
 0x223   :  { %v2390_v13 = vadd.f32 %v2389_v57, %v2388_v61  ;;  %1721 = vadd.xlane.f32.xlu1 %v3619_v1  ;;  %v2284_v50 = vsub.f32 %v4968_v49, %v4701_v18  ;;  %v1421_v20 = vmax.f32 %v1408_v58, 1e-10  ;;  %v2181_v5 = vsub.f32 %v4963_v21, %v4680_v53 }
 0x224   :  { %v3621_v19 = vpop.eup %3620  ;;  %v2398_v14 = vrot.slane %v2397_v2, 1  ;;  %v2113_v16 = vmul.f32 1.442695, %v2098_v29  ;;  %v2097_v22 = vmul.f32 %v4698_v17, %v2087_v0  ;;  %v5054_v33 = vstv %s5185_s7 }
 0x225   :  { %v2391_v3 = vrot.slane %v2390_v13, 1  ;;  %1719 = vadd.xlane.f32.xlu0 %v3621_v19  ;;  %v1510_v46 = vpop.xlane.xlu1 %1509  ;;  %v3623_v26 = vpop.eup %3622  ;;  %3634 = vpow2.f32 %v2009_v23  ;;  %v2292_v35 = vmul.f32 %v2284_v50, %v2284_v50  ;;  %v2189_v44 = vmul.f32 %v2181_v5, %v2181_v5 }
 0x226   :  { %v2399_v11 = vadd.f32 %v2398_v14, %v2397_v2  ;;  %v1508_v59 = vpop.xlane.xlu0 %1507  ;;  %3636 = vlog2.f32 %v1318_v12  ;;  %v2111_v43 = vmul.f32 1.442695, %v2097_v22  ;;  %v2182_v45 = vsub.f32 %v4968_v49, %v4680_v53 }
 0x227   :  { %v2392_v38 = vadd.f32 %v2391_v3, %v2390_v13  ;;  %1823 = vadd.xlane.f32.xlu1 %v3623_v26  ;;  %v1522_v42 = vmax.f32 %v1508_v59, 1e-10  ;;  %v3625_v28 = vpop.eup %3624  ;;  %3638 = vpow2.f32 %v2113_v16  ;;  %v2302_v34 = vmul.f32 %v4714_v47, %v2292_v35 }
 0x228   :  { %v2443_v17 = vmul.f32 0.01, %v2399_v11  ;;  %3640 = vlog2.f32 %v1421_v20  ;;  %v1319_v32 = vmax.f32 %v5043_v41, 1e-10  ;;  %v2199_v61 = vmul.f32 %v4710_v37, %v2189_v44 }
 0x229   :  { %v2442_v30 = vmul.f32 0.01, %v2392_v38  ;;  %1821 = vadd.xlane.f32.xlu0 %v3625_v28  ;;  %v1610_v27 = vpop.xlane.xlu1 %1609  ;;  %v3627_v9 = vpop.eup %3626  ;;  %3642 = vpow2.f32 %v2111_v43  ;;  %v2283_v51 = vsub.f32 %v4963_v21, %v4701_v18  ;;  %v1523_v49 = vmax.f32 %v1510_v46, 1e-10 }
 0x22a   :  { %v2451_v60 = vadd.f32 %v2443_v17, %v5054_v33  ;;  %v1624_v8 = vmax.f32 %v1610_v27, 1e-10  ;;  %v1712_v39 = vpop.xlane.xlu0 %1711  ;;  %3644 = vlog2.f32 %v1522_v42  ;;  %v3629_v55 = vpop.eup %3628  ;;  %v2190_v56 = vmul.f32 %v2182_v45, %v2182_v45 }
 0x22b   :  { %1925 = vadd.xlane.f32.xlu1 %v3627_v9  ;;  %v2450_v53 = vadd.f32 %v2442_v30, %v5054_v33  ;;  %v3631_v10 = vpop.eup %3630  ;;  %v1726_v57 = vmax.f32 %v1712_v39, 1e-10  ;;  %v2317_v1 = vmul.f32 1.442695, %v2302_v34  ;;  %v2213_v2 = vmul.f32 1.442695, %v2199_v61 }
 0x22c   :  { %v2737_v40 = vmul.f32 -1.442695, %v2451_v60  ;;  %3646 = vlog2.f32 %v1624_v8  ;;  %v3633_v31 = vpop.eup %3632  ;;  %v2200_v18 = vmul.f32 %v4710_v37, %v2190_v56  ;;  %v2291_v21 = vmul.f32 %v2283_v51, %v2283_v51 }
 0x22d   :  { %1923 = vadd.xlane.f32.xlu0 %v3629_v55  ;;  %v1612_v58 = vpop.xlane.xlu1 %1611  ;;  %v2736_v23 = vmul.f32 -1.442695, %v2450_v53  ;;  %v1431_v22 = vmul.f32 0.6931472, %v3631_v10 }
 0x22e   :  { %3648 = vpow2.f32 %v2737_v40  ;;  %v1814_v63 = vpop.xlane.xlu0 %1813  ;;  %v2215_v50 = vmul.f32 1.442695, %v2200_v18  ;;  %v2301_v3 = vmul.f32 %v4714_v47, %v2291_v21  ;;  %v1625_v20 = vmax.f32 %v1612_v58, 1e-10 }
 0x22f   :  { %3650 = vlog2.f32 %v1319_v32  ;;  %2027 = vadd.xlane.f32.xlu1 %v3633_v31  ;;  %v3635_v41 = vpop.eup %3634  ;;  %v1828_v13 = vmax.f32 %v1814_v63, 1e-10  ;;  %v1445_v44 = vmul.f32 %v4901_v52, %v1431_v22 }
 0x230   :  { %3652 = vlog2.f32 %v1523_v49  ;;  %v3637_v29 = vpop.eup %3636  ;;  %v2315_v42 = vmul.f32 1.442695, %v2301_v3 }
 0x231   :  { %3654 = vlog2.f32 %v1726_v57  ;;  %2025 = vadd.xlane.f32.xlu0 %v3635_v41  ;;  %v1714_v12 = vpop.xlane.xlu1 %1713  ;;  %v3639_v0 = vpop.eup %3638  ;;  %v1329_v26 = vmul.f32 0.6931472, %v3637_v29 }
 0x232   :  { %v1916_v19 = vpop.xlane.xlu0 %1915  ;;  %3656 = vpow2.f32 %v2317_v1  ;;  %v3641_v14 = vpop.eup %3640  ;;  %v1727_v11 = vmax.f32 %v1714_v12, 1e-10 }
 0x233   :  { %2129 = vadd.xlane.f32.xlu1 %v3639_v0  ;;  %v1930_v16 = vmax.f32 %v1916_v19, 1e-10  ;;  %3658 = vpow2.f32 %v2213_v2  ;;  %v3643_v37 = vpop.eup %3642  ;;  %v1343_v45 = vmul.f32 %v4904_v54, %v1329_v26  ;;  %v1433_v31 = vmul.f32 0.6931472, %v3641_v14 }
 0x234   :  { %3660 = vpow2.f32 %v2736_v23  ;;  %v3645_v46 = vpop.eup %3644 }
 0x235   :  { %3662 = vlog2.f32 %v1828_v13  ;;  %2127 = vadd.xlane.f32.xlu0 %v3643_v37  ;;  %v1816_v5 = vpop.xlane.xlu1 %1815  ;;  %v1533_v28 = vmul.f32 0.6931472, %v3645_v46  ;;  %v1453_v49 = vadd.f32 %v1445_v44, %v1343_v45 }
 0x236   :  { %3664 = vlog2.f32 %v1930_v16  ;;  %v2018_v59 = vpop.xlane.xlu0 %2017  ;;  %v3647_v35 = vpop.eup %3646  ;;  %v1829_v47 = vmax.f32 %v1816_v5, 1e-10 }
 0x237   :  { %v2032_v38 = vmax.f32 %v2018_v59, 1e-10  ;;  %3666 = vpow2.f32 %v2215_v50  ;;  %v1635_v9 = vmul.f32 0.6931472, %v3647_v35  ;;  %v1547_v51 = vmul.f32 %v4912_v6, %v1533_v28 }
 0x238   :  { %v3649_v43 = vpop.eup %3648  ;;  %3668 = vlog2.f32 %v1625_v20  ;;  %v1446_v50 = vmul.f32 %v4901_v52, %v1433_v31 }
 0x239   :  { %v3651_v17 = vpop.eup %3650  ;;  %3670 = vlog2.f32 %v2032_v38  ;;  %v1918_v30 = vpop.xlane.xlu1 %1917  ;;  %v2483_v34 = vadd.f32 1.0, %v3649_v43  ;;  %v1649_v56 = vmul.f32 %v4915_v7, %v1635_v9  ;;  %v1555_v18 = vadd.f32 %v1547_v51, %v1453_v49 }
 0x23a   :  { %v3653_v27 = vpop.eup %3652  ;;  %3672 = vlog2.f32 %v1727_v11  ;;  %v1931_v60 = vmax.f32 %v1918_v30, 1e-10  ;;  %v2120_v8 = vpop.xlane.xlu0 %2119  ;;  %v1331_v63 = vmul.f32 0.6931472, %v3651_v17 }
 0x23b   :  { %v3655_v39 = vpop.eup %3654  ;;  %v2134_v32 = vmax.f32 %v2120_v8, 1e-10  ;;  %3674 = vpow2.f32 %v2315_v42  ;;  %v1657_v13 = vadd.f32 %v1649_v56, %v1555_v18  ;;  %v1535_v3 = vmul.f32 0.6931472, %v3653_v27 }
 0x23c   :  { %v3657_v61 = vpop.eup %3656  ;;  %3676 = vlog2.f32 %v1829_v47  ;;  %v1737_v21 = vmul.f32 0.6931472, %v3655_v39  ;;  %v1344_v14 = vmul.f32 %v4904_v54, %v1331_v63 }
 0x23d   :  { %v3659_v55 = vpop.eup %3658  ;;  %2333 = vadd.xlane.f32.xlu1 %v3657_v61  ;;  %3678 = vlog2.f32 %v1931_v60  ;;  %v2020_v40 = vpop.xlane.xlu1 %2019  ;;  %v1548_v17 = vmul.f32 %v4912_v6, %v1535_v3 }
 0x23e   :  { %v5070_v53 = vpop.eup %3660  ;;  %2229 = vadd.xlane.f32.xlu0 %v3659_v55  ;;  %3680 = vlog2.f32 %v2134_v32  ;;  %v2033_v10 = vmax.f32 %v2020_v40, 1e-10  ;;  %v2222_v57 = vpop.xlane.xlu0 %2221  ;;  %v1751_v46 = vmul.f32 %v4919_v15, %v1737_v21  ;;  %v1454_v47 = vadd.f32 %v1446_v50, %v1344_v14 }
 0x23f   :  { %v3663_v58 = vpop.eup %3662  ;;  %3682 = vrcp.f32 %v2483_v34  ;;  %v2236_v1 = vmax.f32 %v2222_v57, 1e-10  ;;  %v2482_v31 = vadd.f32 1.0, %v5070_v53 }
 0x240   :  { %v3665_v2 = vpop.eup %3664  ;;  %3684 = vlog2.f32 %v2033_v10  ;;  %v1839_v12 = vmul.f32 0.6931472, %v3663_v58  ;;  %v1759_v35 = vadd.f32 %v1751_v46, %v1657_v13  ;;  %v1556_v40 = vadd.f32 %v1548_v17, %v1454_v47  ;;  %v205_v46 = vld [vmem:[%s5180_s2 + $0x10] sm:$0xff] }
 0x241   :  { %v3667_v41 = vpop.eup %3666  ;;  %3686 = vlog2.f32 %v2236_v1  ;;  %v2122_v23 = vpop.xlane.xlu1 %2121  ;;  %v1941_v22 = vmul.f32 0.6931472, %v3665_v2 }
 0x242   :  { %v3669_v29 = vpop.eup %3668  ;;  %2231 = vadd.xlane.f32.xlu0 %v3667_v41  ;;  %v2135_v0 = vmax.f32 %v2122_v23, 1e-10  ;;  %v2324_v19 = vpop.xlane.xlu0 %2323  ;;  %v1853_v38 = vmul.f32 %v4926_v25, %v1839_v12 }
 0x243   :  { %v3671_v16 = vpop.eup %3670  ;;  %v2338_v37 = vmax.f32 %v2324_v19, 1e-10  ;;  %v1637_v26 = vmul.f32 0.6931472, %v3669_v29  ;;  %v1955_v27 = vmul.f32 %v4936_v48, %v1941_v22 }
 0x244   :  { %v3673_v20 = vpop.eup %3672  ;;  %3688 = vlog2.f32 %v2135_v0  ;;  %v2043_v42 = vmul.f32 0.6931472, %v3671_v16  ;;  %v1861_v32 = vadd.f32 %v1853_v38, %v1759_v35 }
 0x245   :  { %v3675_v5 = vpop.eup %3674  ;;  %3690 = vlog2.f32 %v2338_v37  ;;  %v2224_v11 = vpop.xlane.xlu1 %2223  ;;  %v1739_v44 = vmul.f32 0.6931472, %v3673_v20  ;;  %v1650_v9 = vmul.f32 %v4915_v7, %v1637_v26 }
 0x246   :  { %v3677_v59 = vpop.eup %3676  ;;  %2331 = vadd.xlane.f32.xlu0 %v3675_v5  ;;  %v2237_v43 = vmax.f32 %v2224_v11, 1e-10  ;;  %v2057_v61 = vmul.f32 %v4940_v62, %v2043_v42  ;;  %v1963_v10 = vadd.f32 %v1955_v27, %v1861_v32 }
 0x247   :  { %v3679_v28 = vpop.eup %3678  ;;  %v1841_v60 = vmul.f32 0.6931472, %v3677_v59  ;;  %v1752_v49 = vmul.f32 %v4919_v15, %v1739_v44  ;;  %v1658_v63 = vadd.f32 %v1650_v9, %v1556_v40  ;;  %v206_v44 = vld [vmem:[%s5180_s2 + $0x18] sm:$0xff] }
 0x248   :  { %v3681_v30 = vpop.eup %3680  ;;  %3692 = vlog2.f32 %v2237_v43  ;;  %v1943_v56 = vmul.f32 0.6931472, %v3679_v28  ;;  %v2065_v21 = vadd.f32 %v2057_v61, %v1963_v10 }
 0x249   :  { %v3683_v45 = vpop.eup %3682  ;;  %v2145_v8 = vmul.f32 0.6931472, %v3681_v30  ;;  %v2326_v39 = vpop.xlane.xlu1 %2325  ;;  %v1854_v1 = vmul.f32 %v4926_v25, %v1841_v60  ;;  %v1760_v29 = vadd.f32 %v1752_v49, %v1658_v63 }
 0x24a   :  { %v3685_v34 = vpop.eup %3684  ;;  %v2339_v51 = vmax.f32 %v2326_v39, 1e-10  ;;  %v1956_v13 = vmul.f32 %v4936_v48, %v1943_v56 }
 0x24b   :  { %v3687_v55 = vpop.eup %3686  ;;  %v2159_v57 = vmul.f32 %v4943_v24, %v2145_v8  ;;  %v2045_v2 = vmul.f32 0.6931472, %v3685_v34  ;;  %v1862_v16 = vadd.f32 %v1854_v1, %v1760_v29 }
 0x24c   :  { %v2247_v58 = vmul.f32 0.6931472, %v3687_v55  ;;  %3694 = vlog2.f32 %v2339_v51 }
 0x24d   :  { %v2167_v0 = vadd.f32 %v2159_v57, %v2065_v21  ;;  %3696 = vrcp.f32 %v2482_v31  ;;  %v2058_v53 = vmul.f32 %v4940_v62, %v2045_v2  ;;  %v1964_v37 = vadd.f32 %v1956_v13, %v1862_v16 }
 0x24e   :  { %v3689_v18 = vpop.eup %3688  ;;  %v2261_v41 = vmul.f32 %v4946_v4, %v2247_v58  ;;  %2512 = vperm.xlu1 %3425, %v3683_v45  }
 0x24f   :  { %v3691_v23 = vpop.eup %3690  ;;  %v2147_v12 = vmul.f32 0.6931472, %v3689_v18  ;;  %v2066_v26 = vadd.f32 %v2058_v53, %v1964_v37 }
 0x250   :  { %v2349_v19 = vmul.f32 0.6931472, %v3691_v23  ;;  %v2269_v14 = vadd.f32 %v2261_v41, %v2167_v0 }
 0x251   :  { %v2160_v20 = vmul.f32 %v4943_v24, %v2147_v12 }
 0x252   :  { %v3693_v50 = vpop.eup %3692  ;;  %v2363_v3 = vmul.f32 %v4959_v36, %v2349_v19 }
 0x253   :  { %v2249_v22 = vmul.f32 0.6931472, %v3693_v50  ;;  %v2168_v38 = vadd.f32 %v2160_v20, %v2066_v26 }
 0x254   :  { %v2371_v5 = vadd.f32 %v2363_v3, %v2269_v14 }
 0x255   :  { %v2262_v11 = vmul.f32 %v4946_v4, %v2249_v22 }
 0x256   :  { %v3695_v59 = vpop.eup %3694  ;;  %v2379_v35 = vmul.f32 %v2371_v5, %v205_v46 }
 0x257   :  { %v2351_v42 = vmul.f32 0.6931472, %v3695_v59  ;;  %v2270_v47 = vadd.f32 %v2262_v11, %v2168_v38  ;;  %v3697_v30 = vpop.eup %3696 }
 0x258   :  { %v2400_v43 = vsel %vm2385_vm3, %v2379_v35, 0.0 }
 0x259   :  { %v2401_v28 = vrot.slane %v2400_v43, 4  ;;  %v2364_v17 = vmul.f32 %v4959_v36, %v2351_v42 }
 0x25b   :  { %v2402_v27 = vadd.f32 %v2401_v28, %v2400_v43  ;;  %v2372_v45 = vadd.f32 %v2364_v17, %v2270_v47 }
 0x25c   :  { %2508 = vperm.xlu0 %3424, %v3697_v30  }
 0x25d   :  { %v2403_v9 = vrot.slane %v2402_v27, 2  ;;  %v2380_v60 = vmul.f32 %v2372_v45, %v206_v44  ;;  %v1410_v8 = vpop.xlane.xlu1 %1409 }
 0x25e   :  { %v1308_v39 = vpop.xlane.xlu0 %1307  ;;  %v1422_v10 = vmax.f32 %v1410_v8, 1e-10 }
 0x25f   :  { %v2404_v34 = vadd.f32 %v2403_v9, %v2402_v27  ;;  %v2407_v32 = vsel %vm2385_vm3, %v2380_v60, 0.0  ;;  %v1320_v58 = vmax.f32 %v1308_v39, 1e-10 }
 0x260   :  { %v2408_v61 = vrot.slane %v2407_v32, 4  ;;  %3698 = vlog2.f32 %v1422_v10 }
 0x261   :  { %v2405_v51 = vrot.slane %v2404_v34, 1  ;;  %v1310_v55 = vpop.xlane.xlu1 %1309  ;;  %3700 = vlog2.f32 %v1320_v58 }
 0x262   :  { %v2409_v40 = vadd.f32 %v2408_v61, %v2407_v32  ;;  %v1412_v49 = vpop.xlane.xlu0 %1411  ;;  %v1321_v12 = vmax.f32 %v1310_v55, 1e-10 }
 0x263   :  { %v2406_v56 = vadd.f32 %v2405_v51, %v2404_v34  ;;  %v1423_v19 = vmax.f32 %v1412_v49, 1e-10 }
 0x264   :  { %v2410_v57 = vrot.slane %v2409_v40, 2 }
 0x265   :  { %v2444_v31 = vmul.f32 0.01, %v2406_v56  ;;  %v1614_v63 = vpop.xlane.xlu1 %1613 }
 0x266   :  { %v2411_v1 = vadd.f32 %v2410_v57, %v2409_v40  ;;  %v1512_v2 = vpop.xlane.xlu0 %1511  ;;  %v1626_v53 = vmax.f32 %v1614_v63, 1e-10 }
 0x267   :  { %v2452_v18 = vadd.f32 %v2444_v31, %v5054_v33  ;;  %v1524_v21 = vmax.f32 %v1512_v2, 1e-10 }
 0x268   :  { %v2412_v41 = vrot.slane %v2411_v1, 1 }
 0x269   :  { %v2738_v23 = vmul.f32 -1.442695, %v2452_v18  ;;  %v1716_v29 = vpop.xlane.xlu1 %1715  ;;  %3702 = vlog2.f32 %v1524_v21 }
 0x26a   :  { %v2413_v13 = vadd.f32 %v2412_v41, %v2411_v1  ;;  %v1514_v0 = vpop.xlane.xlu0 %1513  ;;  %v1728_v50 = vmax.f32 %v1716_v29, 1e-10  ;;  %v3699_v5 = vpop.eup %3698 }
 0x26b   :  { %3704 = vpow2.f32 %v2738_v23  ;;  %v1525_v20 = vmax.f32 %v1514_v0, 1e-10  ;;  %v3701_v59 = vpop.eup %3700  ;;  %v1435_v47 = vmul.f32 0.6931472, %v3699_v5 }
 0x26c   :  { %v2445_v16 = vmul.f32 0.01, %v2413_v13  ;;  %3706 = vlog2.f32 %v1321_v12  ;;  %v1333_v17 = vmul.f32 0.6931472, %v3701_v59 }
 0x26d   :  { %v1818_v14 = vpop.xlane.xlu1 %1817  ;;  %3708 = vlog2.f32 %v1423_v19  ;;  %v1447_v34 = vmul.f32 %v4901_v52, %v1435_v47 }
 0x26e   :  { %v2453_v3 = vadd.f32 %v2445_v16, %v5054_v33  ;;  %v1616_v37 = vpop.xlane.xlu0 %1615  ;;  %3710 = vlog2.f32 %v1626_v53  ;;  %v1830_v22 = vmax.f32 %v1818_v14, 1e-10  ;;  %v1345_v32 = vmul.f32 %v4904_v54, %v1333_v17 }
 0x26f   :  { %3712 = vlog2.f32 %v1728_v50  ;;  %v1627_v26 = vmax.f32 %v1616_v37, 1e-10 }
 0x270   :  { %v2739_v46 = vmul.f32 -1.442695, %v2453_v3  ;;  %v1455_v63 = vadd.f32 %v1447_v34, %v1345_v32 }
 0x271   :  { %v1920_v11 = vpop.xlane.xlu1 %1919 }
 0x272   :  { %3714 = vpow2.f32 %v2739_v46  ;;  %v1932_v35 = vmax.f32 %v1920_v11, 1e-10  ;;  %v1718_v38 = vpop.xlane.xlu0 %1717 }
 0x273   :  { %3716 = vlog2.f32 %v1525_v20  ;;  %v1729_v42 = vmax.f32 %v1718_v38, 1e-10  ;;  %v3703_v43 = vpop.eup %3702 }
 0x274   :  { %3718 = vlog2.f32 %v1830_v22  ;;  %v1537_v9 = vmul.f32 0.6931472, %v3703_v43 }
 0x275   :  { %v3705_v28 = vpop.eup %3704  ;;  %3720 = vlog2.f32 %v1627_v26  ;;  %v2022_v44 = vpop.xlane.xlu1 %2021 }
 0x276   :  { %v2484_v30 = vadd.f32 1.0, %v3705_v28  ;;  %3722 = vlog2.f32 %v1932_v35  ;;  %v2034_v27 = vmax.f32 %v2022_v44, 1e-10  ;;  %v1820_v45 = vpop.xlane.xlu0 %1819  ;;  %v3707_v8 = vpop.eup %3706  ;;  %v1549_v56 = vmul.f32 %v4912_v6, %v1537_v9 }
 0x277   :  { %3724 = vlog2.f32 %v1729_v42  ;;  %v1831_v60 = vmax.f32 %v1820_v45, 1e-10  ;;  %v3709_v39 = vpop.eup %3708  ;;  %v1335_v19 = vmul.f32 0.6931472, %v3707_v8 }
 0x278   :  { %3726 = vrcp.f32 %v2484_v30  ;;  %v3711_v51 = vpop.eup %3710  ;;  %v1557_v29 = vadd.f32 %v1549_v56, %v1455_v63  ;;  %v1437_v16 = vmul.f32 0.6931472, %v3709_v39 }
 0x279   :  { %3728 = vlog2.f32 %v2034_v27  ;;  %v2124_v61 = vpop.xlane.xlu1 %2123  ;;  %v3713_v49 = vpop.eup %3712  ;;  %v1639_v1 = vmul.f32 0.6931472, %v3711_v51  ;;  %v1346_v38 = vmul.f32 %v4904_v54, %v1335_v19 }
 0x27a   :  { %v2136_v55 = vmax.f32 %v2124_v61, 1e-10  ;;  %v1922_v40 = vpop.xlane.xlu0 %1921  ;;  %3730 = vlog2.f32 %v1831_v60  ;;  %v1741_v13 = vmul.f32 0.6931472, %v3713_v49  ;;  %v1448_v42 = vmul.f32 %v4901_v52, %v1437_v16 }
 0x27b   :  { %v1933_v10 = vmax.f32 %v1922_v40, 1e-10  ;;  %v1651_v50 = vmul.f32 %v4915_v7, %v1639_v1 }
 0x27c   :  { %v3715_v57 = vpop.eup %3714  ;;  %3732 = vlog2.f32 %v2136_v55  ;;  %v1753_v11 = vmul.f32 %v4919_v15, %v1741_v13  ;;  %v1456_v51 = vadd.f32 %v1448_v42, %v1346_v38 }
 0x27d   :  { %v3717_v58 = vpop.eup %3716  ;;  %v2485_v31 = vadd.f32 1.0, %v3715_v57  ;;  %3734 = vlog2.f32 %v1933_v10  ;;  %v2226_v2 = vpop.xlane.xlu1 %2225  ;;  %v1659_v26 = vadd.f32 %v1651_v50, %v1557_v29 }
 0x27e   :  { %v3719_v18 = vpop.eup %3718  ;;  %v2238_v21 = vmax.f32 %v2226_v2, 1e-10  ;;  %v2024_v41 = vpop.xlane.xlu0 %2023  ;;  %v1539_v20 = vmul.f32 0.6931472, %v3717_v58 }
 0x27f   :  { %v3721_v23 = vpop.eup %3720  ;;  %3736 = vrcp.f32 %v2485_v31  ;;  %v2035_v12 = vmax.f32 %v2024_v41, 1e-10  ;;  %v1843_v14 = vmul.f32 0.6931472, %v3719_v18  ;;  %v1761_v39 = vadd.f32 %v1753_v11, %v1659_v26  ;;  %v207_v11 = vld [vmem:[%s5180_s2 + $0x20] sm:$0xff] }
 0x280   :  { %v3723_v0 = vpop.eup %3722  ;;  %3738 = vlog2.f32 %v2238_v21  ;;  %v1641_v43 = vmul.f32 0.6931472, %v3721_v23  ;;  %v1550_v27 = vmul.f32 %v4912_v6, %v1539_v20 }
 0x281   :  { %v3725_v53 = vpop.eup %3724  ;;  %3740 = vlog2.f32 %v2035_v12  ;;  %v2328_v3 = vpop.xlane.xlu1 %2327  ;;  %v1945_v59 = vmul.f32 0.6931472, %v3723_v0  ;;  %v1855_v47 = vmul.f32 %v4926_v25, %v1843_v14 }
 0x282   :  { %v3727_v37 = vpop.eup %3726  ;;  %v2340_v46 = vmax.f32 %v2328_v3, 1e-10  ;;  %v2126_v22 = vpop.xlane.xlu0 %2125  ;;  %v1743_v45 = vmul.f32 0.6931472, %v3725_v53  ;;  %v1652_v55 = vmul.f32 %v4915_v7, %v1641_v43  ;;  %v1558_v58 = vadd.f32 %v1550_v27, %v1456_v51 }
 0x283   :  { %v3729_v5 = vpop.eup %3728  ;;  %v2137_v35 = vmax.f32 %v2126_v22, 1e-10  ;;  %2516 = vperm.xlu1 %3425, %v3727_v37   ;;  %v1957_v34 = vmul.f32 %v4936_v48, %v1945_v59  ;;  %v1863_v56 = vadd.f32 %v1855_v47, %v1761_v39 }
 0x284   :  { %3742 = vlog2.f32 %v2340_v46  ;;  %v3731_v28 = vpop.eup %3730  ;;  %v2047_v17 = vmul.f32 0.6931472, %v3729_v5  ;;  %v1754_v31 = vmul.f32 %v4919_v15, %v1743_v45  ;;  %v1660_v41 = vadd.f32 %v1652_v55, %v1558_v58 }
 0x285   :  { %3744 = vlog2.f32 %v2137_v35  ;;  %v2330_v44 = vpop.xlane.xlu1 %2329  ;;  %v1845_v40 = vmul.f32 0.6931472, %v3731_v28  ;;  %v1965_v2 = vadd.f32 %v1957_v34, %v1863_v56 }
 0x286   :  { %v3733_v30 = vpop.eup %3732  ;;  %v2341_v9 = vmax.f32 %v2330_v44, 1e-10  ;;  %v2228_v60 = vpop.xlane.xlu0 %2227  ;;  %v2059_v10 = vmul.f32 %v4940_v62, %v2047_v17  ;;  %v1762_v19 = vadd.f32 %v1754_v31, %v1660_v41 }
 0x287   :  { %v3735_v8 = vpop.eup %3734  ;;  %v2149_v32 = vmul.f32 0.6931472, %v3733_v30  ;;  %v2239_v61 = vmax.f32 %v2228_v60, 1e-10  ;;  %v1856_v23 = vmul.f32 %v4926_v25, %v1845_v40  ;;  %v208_v60 = vld [vmem:[%s5180_s2 + $0x28] sm:$0xff] }
 0x288   :  { %3746 = vlog2.f32 %v2341_v9  ;;  %v1947_v63 = vmul.f32 0.6931472, %v3735_v8  ;;  %v2067_v13 = vadd.f32 %v2059_v10, %v1965_v2 }
 0x289   :  { %v3737_v49 = vpop.eup %3736  ;;  %3748 = vlog2.f32 %v2239_v61  ;;  %v2161_v18 = vmul.f32 %v4943_v24, %v2149_v32  ;;  %v1864_v3 = vadd.f32 %v1856_v23, %v1762_v19 }
 0x28a   :  { %v3739_v57 = vpop.eup %3738  ;;  %2520 = vperm.xlu1 %3425, %v3737_v49   ;;  %v1958_v16 = vmul.f32 %v4936_v48, %v1947_v63 }
 0x28b   :  { %v3741_v1 = vpop.eup %3740  ;;  %v2251_v21 = vmul.f32 0.6931472, %v3739_v57  ;;  %v2169_v50 = vadd.f32 %v2161_v18, %v2067_v13 }
 0x28c   :  { %v2049_v29 = vmul.f32 0.6931472, %v3741_v1  ;;  %v1966_v26 = vadd.f32 %v1958_v16, %v1864_v3 }
 0x28d   :  { %v2263_v12 = vmul.f32 %v4946_v4, %v2251_v21 }
 0x28e   :  { %v3743_v0 = vpop.eup %3742  ;;  %v2060_v37 = vmul.f32 %v4940_v62, %v2049_v29 }
 0x28f   :  { %v3745_v53 = vpop.eup %3744  ;;  %v2353_v14 = vmul.f32 0.6931472, %v3743_v0  ;;  %v2271_v46 = vadd.f32 %v2263_v12, %v2169_v50 }
 0x290   :  { %v2151_v20 = vmul.f32 0.6931472, %v3745_v53  ;;  %v2068_v42 = vadd.f32 %v2060_v37, %v1966_v26 }
 0x291   :  { %v2365_v22 = vmul.f32 %v4959_v36, %v2353_v14 }
 0x292   :  { %v3747_v5 = vpop.eup %3746  ;;  %v2162_v59 = vmul.f32 %v4943_v24, %v2151_v20 }
 0x293   :  { %v3749_v35 = vpop.eup %3748  ;;  %v2373_v38 = vadd.f32 %v2365_v22, %v2271_v46  ;;  %v2355_v43 = vmul.f32 0.6931472, %v3747_v5 }
 0x294   :  { %v2253_v28 = vmul.f32 0.6931472, %v3749_v35  ;;  %v2170_v17 = vadd.f32 %v2162_v59, %v2068_v42 }
 0x295   :  { %v2381_v47 = vmul.f32 %v2373_v38, %v207_v11  ;;  %v2366_v45 = vmul.f32 %v4959_v36, %v2355_v43 }
 0x296   :  { %v2264_v44 = vmul.f32 %v4946_v4, %v2253_v28 }
 0x297   :  { %v2414_v30 = vsel %vm2385_vm3, %v2381_v47, 0.0 }
 0x298   :  { %v2415_v27 = vrot.slane %v2414_v30, 4  ;;  %v2272_v9 = vadd.f32 %v2264_v44, %v2170_v17 }
 0x29a   :  { %v2416_v8 = vadd.f32 %v2415_v27, %v2414_v30  ;;  %v2374_v39 = vadd.f32 %v2366_v45, %v2272_v9 }
 0x29c   :  { %v2417_v34 = vrot.slane %v2416_v8, 2  ;;  %v2382_v32 = vmul.f32 %v2374_v39, %v208_v60 }
 0x29e   :  { %v2418_v61 = vadd.f32 %v2417_v34, %v2416_v8  ;;  %v2421_v51 = vsel %vm2385_vm3, %v2382_v32, 0.0  ;;  %v1414_v55 = vpop.xlane.xlu1 %1413 }
 0x29f   :  { %v2422_v40 = vrot.slane %v2421_v51, 4  ;;  %v1312_v49 = vpop.xlane.xlu0 %1311  ;;  %v1424_v46 = vmax.f32 %v1414_v55, 1e-10 }
 0x2a0   :  { %v2419_v56 = vrot.slane %v2418_v61, 1  ;;  %v1322_v22 = vmax.f32 %v1312_v49, 1e-10 }
 0x2a1   :  { %v2423_v10 = vadd.f32 %v2422_v40, %v2421_v51 }
 0x2a2   :  { %v2420_v57 = vadd.f32 %v2419_v56, %v2418_v61  ;;  %v1416_v58 = vpop.xlane.xlu1 %1415 }
 0x2a3   :  { %v2424_v31 = vrot.slane %v2423_v10, 2  ;;  %v1425_v26 = vmax.f32 %v1416_v58, 1e-10 }
 0x2a4   :  { %v2446_v63 = vmul.f32 0.01, %v2420_v57 }
 0x2a5   :  { %v2425_v1 = vadd.f32 %v2424_v31, %v2423_v10  ;;  %v1314_v2 = vpop.xlane.xlu0 %1313 }
 0x2a6   :  { %v2454_v18 = vadd.f32 %v2446_v63, %v5054_v33  ;;  %v1323_v11 = vmax.f32 %v1314_v2, 1e-10 }
 0x2a7   :  { %v2426_v21 = vrot.slane %v2425_v1, 1  ;;  %v1518_v41 = vpop.xlane.xlu1 %1517 }
 0x2a8   :  { %v2740_v23 = vmul.f32 -1.442695, %v2454_v18  ;;  %v1527_v35 = vmax.f32 %v1518_v41, 1e-10 }
 0x2a9   :  { %v2427_v29 = vadd.f32 %v2426_v21, %v2425_v1 }
 0x2aa   :  { %3750 = vpow2.f32 %v2740_v23  ;;  %v1516_v13 = vpop.xlane.xlu0 %1515 }
 0x2ab   :  { %v2447_v12 = vmul.f32 0.01, %v2427_v29  ;;  %v1620_v0 = vpop.xlane.xlu1 %1619  ;;  %v1526_v43 = vmax.f32 %v1516_v13, 1e-10 }
 0x2ac   :  { %v1629_v28 = vmax.f32 %v1620_v0, 1e-10 }
 0x2ad   :  { %v2455_v19 = vadd.f32 %v2447_v12, %v5054_v33 }
 0x2ae   :  { %v1618_v16 = vpop.xlane.xlu0 %1617 }
 0x2af   :  { %v2741_v53 = vmul.f32 -1.442695, %v2455_v19  ;;  %v1628_v17 = vmax.f32 %v1618_v16, 1e-10 }
 0x2b0   :  { %v1722_v50 = vpop.xlane.xlu1 %1721 }
 0x2b1   :  { %3752 = vpow2.f32 %v2741_v53  ;;  %v1731_v30 = vmax.f32 %v1722_v50, 1e-10 }
 0x2b2   :  { %v1720_v14 = vpop.xlane.xlu0 %1719 }
 0x2b3   :  { %v1730_v27 = vmax.f32 %v1720_v14, 1e-10 }
 0x2b4   :  { %v3751_v3 = vpop.eup %3750  ;;  %v1824_v37 = vpop.xlane.xlu1 %1823 }
 0x2b5   :  { %v2486_v20 = vadd.f32 1.0, %v3751_v3  ;;  %v1833_v9 = vmax.f32 %v1824_v37, 1e-10 }
 0x2b6   :  { %v1822_v5 = vpop.xlane.xlu0 %1821 }
 0x2b7   :  { %3754 = vrcp.f32 %v2486_v20  ;;  %v1832_v8 = vmax.f32 %v1822_v5, 1e-10 }
 0x2b8   :  { %v1926_v59 = vpop.xlane.xlu1 %1925  ;;  %3756 = vlog2.f32 %v1424_v46 }
 0x2b9   :  { %3758 = vlog2.f32 %v1322_v22  ;;  %v1935_v39 = vmax.f32 %v1926_v59, 1e-10 }
 0x2ba   :  { %v1924_v38 = vpop.xlane.xlu0 %1923  ;;  %3760 = vlog2.f32 %v1425_v26 }
 0x2bb   :  { %v3753_v42 = vpop.eup %3752  ;;  %3762 = vlog2.f32 %v1323_v11  ;;  %v1934_v32 = vmax.f32 %v1924_v38, 1e-10 }
 0x2bc   :  { %v2487_v47 = vadd.f32 1.0, %v3753_v42  ;;  %3764 = vlog2.f32 %v1527_v35  ;;  %v2028_v44 = vpop.xlane.xlu1 %2027 }
 0x2bd   :  { %v2037_v55 = vmax.f32 %v2028_v44, 1e-10 }
 0x2be   :  { %3766 = vrcp.f32 %v2487_v47  ;;  %v2026_v45 = vpop.xlane.xlu0 %2025 }
 0x2bf   :  { %3768 = vlog2.f32 %v1526_v43  ;;  %v2036_v49 = vmax.f32 %v2026_v45, 1e-10 }
 0x2c0   :  { %3770 = vlog2.f32 %v1629_v28  ;;  %v2130_v61 = vpop.xlane.xlu1 %2129 }
 0x2c1   :  { %v3755_v60 = vpop.eup %3754  ;;  %3772 = vlog2.f32 %v1628_v17  ;;  %v2139_v57 = vmax.f32 %v2130_v61, 1e-10 }
 0x2c2   :  { %3774 = vlog2.f32 %v1731_v30  ;;  %2524 = vperm.xlu1 %3425, %v3755_v60   ;;  %v3757_v34 = vpop.eup %3756  ;;  %v2128_v56 = vpop.xlane.xlu0 %2127 }
 0x2c3   :  { %3776 = vlog2.f32 %v1730_v27  ;;  %v3759_v51 = vpop.eup %3758  ;;  %v2138_v63 = vmax.f32 %v2128_v56, 1e-10  ;;  %v1439_v41 = vmul.f32 0.6931472, %v3757_v34 }
 0x2c4   :  { %3778 = vlog2.f32 %v1833_v9  ;;  %v3761_v40 = vpop.eup %3760  ;;  %v1337_v23 = vmul.f32 0.6931472, %v3759_v51 }
 0x2c5   :  { %3780 = vlog2.f32 %v1832_v8  ;;  %v3763_v10 = vpop.eup %3762  ;;  %v1441_v2 = vmul.f32 0.6931472, %v3761_v40  ;;  %v1449_v22 = vmul.f32 %v4901_v52, %v1439_v41 }
 0x2c6   :  { %3782 = vlog2.f32 %v1935_v39  ;;  %v3765_v58 = vpop.eup %3764  ;;  %v1339_v18 = vmul.f32 0.6931472, %v3763_v10  ;;  %v1347_v5 = vmul.f32 %v4904_v54, %v1337_v23 }
 0x2c7   :  { %3784 = vlog2.f32 %v1934_v32  ;;  %v1543_v12 = vmul.f32 0.6931472, %v3765_v58  ;;  %v1450_v3 = vmul.f32 %v4901_v52, %v1441_v2 }
 0x2c8   :  { %v3767_v31 = vpop.eup %3766  ;;  %3786 = vlog2.f32 %v2037_v55  ;;  %v1348_v37 = vmul.f32 %v4904_v54, %v1339_v18  ;;  %v1457_v54 = vadd.f32 %v1449_v22, %v1347_v5 }
 0x2c9   :  { %v3769_v1 = vpop.eup %3768  ;;  %3788 = vlog2.f32 %v2036_v49  ;;  %2528 = vperm.xlu1 %3425, %v3767_v31   ;;  %v1552_v59 = vmul.f32 %v4912_v6, %v1543_v12 }
 0x2ca   :  { %v3771_v21 = vpop.eup %3770  ;;  %3790 = vlog2.f32 %v2139_v57  ;;  %v2334_v29 = vpop.xlane.xlu1 %2333  ;;  %v1541_v16 = vmul.f32 0.6931472, %v3769_v1  ;;  %v1458_v44 = vadd.f32 %v1450_v3, %v1348_v37 }
 0x2cb   :  { %v3773_v13 = vpop.eup %3772  ;;  %v2230_v0 = vpop.xlane.xlu0 %2229  ;;  %3792 = vlog2.f32 %v2138_v63  ;;  %v2343_v53 = vmax.f32 %v2334_v29, 1e-10  ;;  %v1645_v20 = vmul.f32 0.6931472, %v3771_v21 }
 0x2cc   :  { %v3775_v19 = vpop.eup %3774  ;;  %v2240_v50 = vmax.f32 %v2230_v0, 1e-10  ;;  %v1643_v26 = vmul.f32 0.6931472, %v3773_v13  ;;  %v1551_v43 = vmul.f32 %v4912_v6, %v1541_v16  ;;  %v1560_v8 = vadd.f32 %v1552_v59, %v1458_v44 }
 0x2cd   :  { %v3777_v14 = vpop.eup %3776  ;;  %v1747_v35 = vmul.f32 0.6931472, %v3775_v19  ;;  %v1654_v30 = vmul.f32 %v4915_v7, %v1645_v20 }
 0x2ce   :  { %v3779_v46 = vpop.eup %3778  ;;  %3794 = vlog2.f32 %v2240_v50  ;;  %v1745_v28 = vmul.f32 0.6931472, %v3777_v14  ;;  %v1653_v45 = vmul.f32 %v4915_v7, %v1643_v26  ;;  %v1559_v61 = vadd.f32 %v1551_v43, %v1457_v54 }
 0x2cf   :  { %v3781_v11 = vpop.eup %3780  ;;  %v2232_v38 = vpop.xlane.xlu0 %2231  ;;  %3796 = vlog2.f32 %v2343_v53  ;;  %v1849_v52 = vmul.f32 0.6931472, %v3779_v46  ;;  %v1756_v39 = vmul.f32 %v4919_v15, %v1747_v35  ;;  %v1662_v49 = vadd.f32 %v1654_v30, %v1560_v8 }
 0x2d0   :  { %v3783_v42 = vpop.eup %3782  ;;  %v2241_v47 = vmax.f32 %v2232_v38, 1e-10  ;;  %v1847_v9 = vmul.f32 0.6931472, %v3781_v11  ;;  %v1755_v51 = vmul.f32 %v4919_v15, %v1745_v28  ;;  %v1661_v7 = vadd.f32 %v1653_v45, %v1559_v61  ;;  %v210_v38 = vld [vmem:[%s5180_s2 + $0x38] sm:$0xff]  ;;  %v209_v28 = vld [vmem:[%s5180_s2 + $0x30] sm:$0xff] }
 0x2d1   :  { %v3785_v17 = vpop.eup %3784  ;;  %v1951_v34 = vmul.f32 0.6931472, %v3783_v42  ;;  %v1858_v56 = vmul.f32 %v4926_v25, %v1849_v52  ;;  %v1764_v31 = vadd.f32 %v1756_v39, %v1662_v49  ;;  %s3881_s2 = smov [#allocation9]  }
 0x2d2   :  { %v3787_v27 = vpop.eup %3786  ;;  %3798 = vlog2.f32 %v2241_v47  ;;  %v1949_v55 = vmul.f32 0.6931472, %v3785_v17  ;;  %v1857_v58 = vmul.f32 %v4926_v25, %v1847_v9  ;;  %v1763_v21 = vadd.f32 %v1755_v51, %v1661_v7  ;;  %s2560_s23 = sshll.u32 %s3881_s2, 4  ;;  %s2561_s23 = int_to_ptr.vmem [resolvable:$true] %s2560_s23 }
 0x2d3   :  { %v3789_v60 = vpop.eup %3788  ;;  %v2332_v6 = vpop.xlane.xlu0 %2331  ;;  %v2053_v10 = vmul.f32 0.6931472, %v3787_v27  ;;  %v1960_v63 = vmul.f32 %v4936_v48, %v1951_v34  ;;  %v1866_v41 = vadd.f32 %v1858_v56, %v1764_v31  ;;  %s3846_s24 = scalar_lea.vmem %s2561_s23, 128  ;;  %p3851_p2 = scmp.lt.s32.totalorder %s2561_s23, %s2561_s23 }
 0x2d4   :  { %v3791_v32 = vpop.eup %3790  ;;  %v2342_v40 = vmax.f32 %v2332_v6, 1e-10  ;;  %v2051_v1 = vmul.f32 0.6931472, %v3789_v60  ;;  %v1959_v15 = vmul.f32 %v4936_v48, %v1949_v55  ;;  %v1865_v12 = vadd.f32 %v1857_v58, %v1763_v21  ;;  %p3847_p1 = scmp.ne.s32.totalorder %s2561_s23, %s3846_s24  ;;  %p3852_p3 = scmp.lt.s32.totalorder %s3846_s24, %s3846_s24 }
 0x2d5   :  { %v3793_v57 = vpop.eup %3792  ;;  %v2155_v2 = vmul.f32 0.6931472, %v3791_v32  ;;  %v2062_v23 = vmul.f32 %v4940_v62, %v2053_v10  ;;  %v1968_v0 = vadd.f32 %v1960_v63, %v1866_v41 }
 0x2d6   :  { %3800 = vlog2.f32 %v2342_v40  ;;  %v2153_v29 = vmul.f32 0.6931472, %v3793_v57  ;;  %v2061_v19 = vmul.f32 %v4940_v62, %v2051_v1  ;;  %v1967_v50 = vadd.f32 %v1959_v15, %v1865_v12  ;;  %v2513_v1 = vpop.permute.xlu1 %2512  ;;  %p3853_p4 = por %p3852_p3, %p3851_p2 }
 0x2d7   :  { %v2164_v25 = vmul.f32 %v4943_v24, %v2155_v2  ;;  %v2070_v14 = vadd.f32 %v2062_v23, %v1968_v0 }
 0x2d8   :  { %v3795_v18 = vpop.eup %3794  ;;  %v2163_v3 = vmul.f32 %v4943_v24, %v2153_v29  ;;  %v2069_v48 = vadd.f32 %v2061_v19, %v1967_v50  ;;  %p3854_p5 = pnand %p3853_p4, %p3847_p1 }
 0x2d9   :  { %v3797_v13 = vpop.eup %3796  ;;  %v2255_v16 = vmul.f32 0.6931472, %v3795_v18  ;;  %v2172_v46 = vadd.f32 %v2164_v25, %v2070_v14 }
 0x2da   :  { %v2359_v37 = vmul.f32 0.6931472, %v3797_v13  ;;  %v2171_v11 = vadd.f32 %v2163_v3, %v2069_v48 }
 0x2db   :  { %v2265_v22 = vmul.f32 %v4946_v4, %v2255_v16  ;;  %v2509_v15 = vpop.permute.xlu0 %2508 }
 0x2dc   :  { %v3799_v53 = vpop.eup %3798  ;;  %v2368_v62 = vmul.f32 %v4959_v36, %v2359_v37  ;;  %v2539_v41 = vsel %vm2538_vm4, %v2513_v1, %v2509_v15 }
 0x2dd   :  { %v2257_v20 = vmul.f32 0.6931472, %v3799_v53  ;;  %v2273_v42 = vadd.f32 %v2265_v22, %v2171_v11 }
 0x2df   :  { %v2266_v5 = vmul.f32 %v4946_v4, %v2257_v20 }
 0x2e0   :  { %v3801_v26 = vpop.eup %3800 }
 0x2e1   :  { %v2274_v59 = vadd.f32 %v2266_v5, %v2172_v46  ;;  %v2357_v35 = vmul.f32 0.6931472, %v3801_v26 }
 0x2e3   :  { %v2376_v24 = vadd.f32 %v2368_v62, %v2274_v59  ;;  %v2367_v43 = vmul.f32 %v4959_v36, %v2357_v35 }
 0x2e5   :  { %v2384_v47 = vmul.f32 %v2376_v24, %v210_v38  ;;  %v2375_v4 = vadd.f32 %v2367_v43, %v2273_v42 }
 0x2e7   :  { %v2435_v17 = vsel %vm2385_vm3, %v2384_v47, 0.0  ;;  %v2383_v44 = vmul.f32 %v2375_v4, %v209_v28 }
 0x2e8   :  { %v2436_v30 = vrot.slane %v2435_v17, 4 }
 0x2e9   :  { %v2428_v52 = vsel %vm2385_vm3, %v2383_v44, 0.0 }
 0x2ea   :  { %v2437_v27 = vadd.f32 %v2436_v30, %v2435_v17  ;;  %v2429_v54 = vrot.slane %v2428_v52, 4 }
 0x2ec   :  { %v2438_v45 = vrot.slane %v2437_v27, 2  ;;  %v2430_v9 = vadd.f32 %v2429_v54, %v2428_v52 }
 0x2ee   :  { %v2439_v60 = vadd.f32 %v2438_v45, %v2437_v27  ;;  %v2431_v8 = vrot.slane %v2430_v9, 2 }
 0x2f0   :  { %v2440_v39 = vrot.slane %v2439_v60, 1  ;;  %v2432_v36 = vadd.f32 %v2431_v8, %v2430_v9 }
 0x2f2   :  { %v2441_v34 = vadd.f32 %v2440_v39, %v2439_v60  ;;  %v2433_v6 = vrot.slane %v2432_v36, 1 }
 0x2f4   :  { %v2449_v32 = vmul.f32 0.01, %v2441_v34  ;;  %v2434_v61 = vadd.f32 %v2433_v6, %v2432_v36 }
 0x2f6   :  { %v2457_v51 = vadd.f32 %v2449_v32, %v5054_v33  ;;  %v2448_v55 = vmul.f32 0.01, %v2434_v61 }
 0x2f8   :  { %v2743_v40 = vmul.f32 -1.442695, %v2457_v51  ;;  %v2456_v49 = vadd.f32 %v2448_v55, %v5054_v33 }
 0x2fa   :  { %v2742_v56 = vmul.f32 -1.442695, %v2456_v49  ;;  %3802 = vpow2.f32 %v2743_v40 }
 0x2fc   :  { %3804 = vpow2.f32 %v2742_v56 }
 0x302   :  { %v2517_v2 = vpop.permute.xlu1 %2516 }
 0x303   :  { %v2541_v23 = vsel %vm2540_vm5, %v2517_v2, %v2539_v41 }
 0x304   :  { %v3803_v10 = vpop.eup %3802 }
 0x305   :  { %v2489_v58 = vadd.f32 1.0, %v3803_v10 }
 0x306   :  { %v3805_v57 = vpop.eup %3804 }
 0x307   :  { %v2488_v7 = vadd.f32 1.0, %v3805_v57 }
 0x309   :  { %3806 = vrcp.f32 %v2488_v7  ;;  %v2521_v18 = vpop.permute.xlu1 %2520 }
 0x30a   :  { %3808 = vrcp.f32 %v2489_v58  ;;  %v2543_v13 = vsel %vm2542_vm6, %v2521_v18, %v2541_v23 }
 0x313   :  { %v3807_v31 = vpop.eup %3806 }
 0x314   :  { %2532 = vperm.xlu1 %3425, %v3807_v31   ;;  %v3809_v63 = vpop.eup %3808 }
 0x318   :  { %2536 = vperm.xlu1 %3425, %v3809_v63  }
 0x341   :  { %v2525_v21 = vpop.permute.xlu1 %2524 }
 0x342   :  { %v2545_v12 = vsel %vm2544_vm7, %v2525_v21, %v2543_v13 }
 0x348   :  { %v2529_v33 = vpop.permute.xlu1 %2528 }
 0x349   :  { %v2547_v0 = vsel %vm2546_vm8, %v2529_v33, %v2545_v12 }
 0x393   :  { %v2533_v29 = vpop.permute.xlu1 %2532 }
 0x394   :  { %v2549_v19 = vsel %vm2548_vm9, %v2533_v29, %v2547_v0 }
 0x397   :  { %v2537_v25 = vpop.permute.xlu1 %2536 }
 0x398   :  { %v2551_v16 = vsel %vm2550_vm10, %v2537_v25, %v2549_v19 }
 0x399   :  { %2553 = vst [vmem:[#allocation9] sm:$0xff] %v2551_v16 }
 0x39a   :  { %3857 = shalt.err (!%p3854_p5)
}
 0x39b   :  { %s3858_s27 = scalar_lea.hbm %s5186_s8, 128 }
 0x39c   :  { %p3859_p6 = scmp.ne.s32.totalorder %s5186_s8, %s3858_s27  ;;  %p3862_p7 = scmp.lt.u32.totalorder %s3858_s27, %s5186_s8 }
 0x39e   :  { %p3864_p8 = pnand %p3862_p7, %p3859_p6 }
 0x3a0   :  { %3867 = shalt.err (!%p3864_p8)
}
 0x3a1   :  { %2563 = dma.vmem_to_hbm [thread:$0]  %s2561_s23, 128, %s5186_s8, [#allocation4]  }
 0x3a2   :  { %3872 = dma.done.wait [#allocation4], 128  }
 0x3a3   :  { %3873 = vsyncadd [#allocation4], 4294967168 }
 0x3a4   :  { %2567 = vsyncpa [#allocation4], 1 }
 0x3a5   :  { %2568 = vsyncpa [#allocation5], 1 }
 0x3a6   :  { %2569 = vsyncpa [#allocation7], 1 }

</bundles_post_ra>
